<compile_context>
chip_gen: v5e
topology: v5e:2x2
jax: 0.10.0
libtpu: 0.0.40
codegen_flags: <defaults>
</compile_context>

<pallas_src>
import functools

import jax
import jax.numpy as jnp
from jax.experimental import pallas as pl
from jax.experimental.pallas import tpu as pltpu

# ---- scaled-down model dims (stand-ins for 512/256/2048/768 of the original) ----
B = 2          # batch
C_IN = 4       # image channels
IMG_HW = 16    # image spatial size
IMG_FEAT = 64  # stand-in for ResNet50's 2048-dim pooled feature
BERT_DIM = 48  # stand-in for BERT's 768-dim pooled output
HIDDEN = 32    # stand-in for hidden_dim=512
EMB = 16       # stand-in for decoder embedding_size=256
VOCAB = 128    # answers_vocab_size
Q_VOCAB = 64   # question token vocab (stand-in for BERT wordpiece vocab)
T_ANS = 8      # answer sequence length (teacher forcing)
S_Q = 8        # question length


def _lstm_cell(gates, c_prev, hid):
    # PyTorch gate order: i, f, g, o
    i = jax.nn.sigmoid(gates[:, 0:hid])
    f = jax.nn.sigmoid(gates[:, hid:2 * hid])
    g = jnp.tanh(gates[:, 2 * hid:3 * hid])
    o = jax.nn.sigmoid(gates[:, 3 * hid:4 * hid])
    c_new = f * c_prev + i * g
    h_new = o * jnp.tanh(c_new)
    return h_new, c_new


def _vqa_fused_kernel(imgp_ref, wbb_ref, bbb_ref, wif_ref, bif_ref,
                      qemb_ref, mask_ref, wqp_ref, bqp_ref, wqf_ref, bqf_ref,
                      x_ref,
                      w0x_ref, w0c_ref, u0_ref, b0_ref,
                      w1_ref, u1_ref, b1_ref,
                      w2_ref, u2_ref, b2_ref,
                      fcw_ref, fcb_ref,
                      o_ref, h2_buf, *, t_len, bsz):
    f32 = jnp.float32
    hid = u0_ref.shape[0]

    # ---------------- image encoder ----------------
    # Global average pool done in the wrapper; here just the backbone projection
    # stand-in (ReLU) and the module's nn.Linear(2048, 512).
    backbone = jnp.maximum(
        jnp.dot(imgp_ref[...], wbb_ref[...], preferred_element_type=f32) + bbb_ref[...], 0.0)
    image_feat = jnp.dot(backbone, wif_ref[...], preferred_element_type=f32) + bif_ref[...]   # (B, H)

    # ---------------- question encoder ----------------
    q = qemb_ref[...]                                        # (B, S, D)
    m = mask_ref[...]                                        # (B, S, 1)
    qsum = jnp.sum(q * m, axis=1)                            # (B, D)
    inv_len = pl.reciprocal(jnp.maximum(jnp.sum(m, axis=1), 1e-6), approx=True)  # EUP slot
    pooled_q = jnp.tanh(
        jnp.dot(qsum * inv_len, wqp_ref[...], preferred_element_type=f32) + bqp_ref[...])
    question_feat = jnp.dot(pooled_q, wqf_ref[...], preferred_element_type=f32) + bqf_ref[...]  # (B, H)

    # ---------------- answer decoder (teacher forcing) ----------------
    # Attention is a provable no-op in the reference: v(energy) has shape (B, 1) and
    # softmax over that length-1 axis is exactly 1.0, so context == cat(q_feat, img_feat)
    # every step; the attn/v weights never affect the output (bit-identical).
    #
    # Time-invariant work hoisted out of the recurrence:
    #   - context half of the layer-0 W_ih matmul + combined bias (constant over time),
    #   - x-part of the layer-0 W_ih matmul for ALL steps in one MXU call,
    #   - all weight loads and bias broadcasts (static unroll would re-emit them).
    ctx_b0 = (jnp.dot(question_feat, w0c_ref[0:hid, :], preferred_element_type=f32)
              + jnp.dot(image_feat, w0c_ref[hid:2 * hid, :], preferred_element_type=f32)
              + b0_ref[...])                                                    # (B, 4H)
    x_proj = jnp.dot(x_ref[...], w0x_ref[...], preferred_element_type=f32)      # (T*B, 4H)

    u0 = u0_ref[...]
    w1 = w1_ref[...]; u1 = u1_ref[...]
    w2 = w2_ref[...]; u2 = u2_ref[...]
    b1f = jnp.broadcast_to(b1_ref[...], (bsz, 4 * hid))
    b2f = jnp.broadcast_to(b2_ref[...], (bsz, 4 * hid))

    zeros = jnp.zeros((bsz, hid), f32)
    h0, c0 = zeros, zeros
    h1, c1 = zeros, zeros
    h2, c2 = zeros, zeros

    # TODO(synk): nn.LSTM(dropout=0.2) inter-layer dropout omitted (eval-mode semantics).
    # Wavefront schedule: wave w runs layer0@step w, layer1@step w-1, layer2@step w-2.
    # All matmuls inside a wave depend only on previous-wave state, so they are mutually
    # independent and can be kept in flight together on the MXU.
    for w in range(t_len + 2):                      # static unroll: full LLO visibility
        h0_p, c0_p = h0, c0
        h1_p, c1_p = h1, c1
        h2_p, c2_p = h2, c2
        if w < t_len:                               # layer 0, step w
            g0 = (x_proj[w * bsz:(w + 1) * bsz, :] + ctx_b0
                  + jnp.dot(h0_p, u0, preferred_element_type=f32))
            h0, c0 = _lstm_cell(g0, c0_p, hid)
        if 1 <= w <= t_len:                         # layer 1, step w-1
            g1 = (jnp.dot(h0_p, w1, preferred_element_type=f32)
                  + jnp.dot(h1_p, u1, preferred_element_type=f32) + b1f)
            h1, c1 = _lstm_cell(g1, c1_p, hid)
        if 2 <= w <= t_len + 1:                     # layer 2, step w-2
            g2 = (jnp.dot(h1_p, w2, preferred_element_type=f32)
                  + jnp.dot(h2_p, u2, preferred_element_type=f32) + b2f)
            h2, c2 = _lstm_cell(g2, c2_p, hid)
            h2_buf[pl.ds((w - 2) * bsz, bsz), :] = h2   # per-step store, no tail concat

    # fc hoisted out of the recurrence: one (T*B, H) @ (H, VOCAB) matmul and a single
    # lane-dense (VOCAB = 128) unmasked store.
    o_ref[...] = jnp.dot(h2_buf[...], fcw_ref[...], preferred_element_type=f32) + fcb_ref[...]


# ------------------------------ parameters ------------------------------

def init_params(key):
    ks = jax.random.split(key, 32)

    def nrm(k, shape, scale=0.1):
        return scale * jax.random.normal(k, shape, dtype=jnp.float32)

    p = {}
    # image encoder
    p["img_backbone_w"] = nrm(ks[0], (C_IN, IMG_FEAT))        # stand-in for ResNet50 stages
    p["img_backbone_b"] = nrm(ks[1], (1, IMG_FEAT))
    p["img_fc_w"] = nrm(ks[2], (IMG_FEAT, HIDDEN))            # module's nn.Linear(2048, 512)
    p["img_fc_b"] = nrm(ks[3], (1, HIDDEN))
    # question encoder
    p["q_tok_emb"] = nrm(ks[4], (Q_VOCAB, BERT_DIM))          # stand-in for BERT embeddings/encoder
    p["q_pooler_w"] = nrm(ks[5], (BERT_DIM, BERT_DIM))        # stand-in for BERT pooler (tanh)
    p["q_pooler_b"] = nrm(ks[6], (1, BERT_DIM))
    p["q_fc_w"] = nrm(ks[7], (BERT_DIM, HIDDEN))              # module's nn.Linear(768, 512)
    p["q_fc_b"] = nrm(ks[8], (1, HIDDEN))
    # answer decoder
    p["ans_emb"] = nrm(ks[9], (VOCAB, EMB))                   # nn.Embedding
    # Attention params kept for parameter fidelity, but provably dead (softmax over a
    # (B,1) axis is 1.0), so they never affect the original module's output either.
    p["attn_w_h"] = nrm(ks[10], (HIDDEN, HIDDEN))
    p["attn_w_c"] = nrm(ks[11], (2 * HIDDEN, HIDDEN))
    p["attn_b"] = nrm(ks[12], (1, HIDDEN))
    p["attn_v"] = nrm(ks[13], (HIDDEN, 1))
    p["w0x"] = nrm(ks[14], (EMB, 4 * HIDDEN))                 # LSTM layer0 W_ih (x part)
    p["w0c"] = nrm(ks[15], (2 * HIDDEN, 4 * HIDDEN))          # LSTM layer0 W_ih (context part)
    p["u0"] = nrm(ks[16], (HIDDEN, 4 * HIDDEN))
    p["b0"] = nrm(ks[17], (1, 4 * HIDDEN))                    # b_ih + b_hh combined
    p["w1"] = nrm(ks[18], (HIDDEN, 4 * HIDDEN))
    p["u1"] = nrm(ks[19], (HIDDEN, 4 * HIDDEN))
    p["b1"] = nrm(ks[20], (1, 4 * HIDDEN))
    p["w2"] = nrm(ks[21], (HIDDEN, 4 * HIDDEN))
    p["u2"] = nrm(ks[22], (HIDDEN, 4 * HIDDEN))
    p["b2"] = nrm(ks[23], (1, 4 * HIDDEN))
    p["fc_w"] = nrm(ks[24], (HIDDEN, VOCAB))                  # fc: Linear(hidden, answer_vocab)
    p["fc_b"] = nrm(ks[25], (1, VOCAB))
    return p


# ------------------------------ forward ------------------------------

@jax.jit
def vqa_forward(p, image_nchw, input_ids, attention_mask, answer_seq):
    bsz = image_nchw.shape[0]
    t_len = answer_seq.shape[1]
    # Pad batch to a full sublane group (8): every vreg / MXU pass is fully occupied;
    # padded rows are computed on garbage-but-finite inputs and sliced off below.
    b_pad = max(8, ((bsz + 7) // 8) * 8)
    pad = b_pad - bsz

    # ---- host/XLA glue: pooling, padding, embedding gathers ----
    # TODO(synk): ResNet50 backbone with file-loaded pretrained weights replaced by a
    # global-average-pool + projection stand-in; the pool runs here as jnp.mean (cheap
    # XLA reduce) so the kernel only sees the (B, C) pooled feature and the raw weight.
    img_pooled = jnp.mean(image_nchw.astype(jnp.float32), axis=(2, 3))      # (B, C_IN)
    img_pooled = jnp.pad(img_pooled, ((0, pad), (0, 0)))

    ids_p = jnp.pad(input_ids, ((0, pad), (0, 0)))
    mask_p = jnp.pad(attention_mask, ((0, pad), (0, 0)))
    ans_p = jnp.pad(answer_seq, ((0, pad), (0, 0)))

    # TODO(synk): pretrained BERT replaced by token-embedding + masked-mean + tanh pooler stand-in.
    q_emb = p["q_tok_emb"][ids_p]                                            # (B_pad, S, BERT_DIM)
    mask = mask_p.astype(jnp.float32)[:, :, None]                            # (B_pad, S, 1)

    # Answer embeddings gathered already time-major: row order t*B_pad + b (no transpose op).
    x_flat = p["ans_emb"][ans_p.T].reshape(t_len * b_pad, EMB)               # (T*B_pad, EMB)

    # TODO(synk): beam-search inference branch (answer_seq is None) is host-side Python
    # control flow with data-dependent sequence growth; not implemented as a kernel.
    # TODO(synk): v7x dual-TC split (encoders + x_proj on core 1 via pl.core_map/CMEM) omitted;
    # the latency-bound recurrence dominates and a batch grid split would serialize on v5e/v6e.
    kernel = functools.partial(_vqa_fused_kernel, t_len=t_len, bsz=b_pad)
    logits_flat = pl.pallas_call(
        kernel,
        out_shape=jax.ShapeDtypeStruct((t_len * b_pad, VOCAB), jnp.float32),
        # grid=() single invocation: every operand is a full-array VMEM block (<100 KiB
        # total), so there is no per-step pipelining and no double-buffering of weights.
        # At real dims (HIDDEN=512, big vocab): bf16 weights, tile fc over an N grid axis,
        # and set pltpu.CompilerParams(vmem_limit_bytes=...) for v7x's 64 MiB VMEM.
        scratch_shapes=[pltpu.VMEM((t_len * b_pad, HIDDEN), jnp.float32)],
    )(img_pooled, p["img_backbone_w"], p["img_backbone_b"], p["img_fc_w"], p["img_fc_b"],
      q_emb, mask, p["q_pooler_w"], p["q_pooler_b"], p["q_fc_w"], p["q_fc_b"],
      x_flat,
      p["w0x"], p["w0c"], p["u0"], p["b0"],
      p["w1"], p["u1"], p["b1"],
      p["w2"], p["u2"], p["b2"],
      p["fc_w"], p["fc_b"])

    # (T*B_pad, V) -> drop padded rows -> (B, T, V), matching torch.stack(outputs, dim=1)
    logits = logits_flat.reshape(t_len, b_pad, VOCAB)[:, :bsz, :]
    return jnp.transpose(logits, (1, 0, 2))


if __name__ == "__main__":
    key = jax.random.PRNGKey(0)
    k_img, k_ids, k_ans, k_par = jax.random.split(key, 4)

    image = jax.random.normal(k_img, (B, C_IN, IMG_HW, IMG_HW), dtype=jnp.float32)  # NCHW (PyTorch)
    input_ids = jax.random.randint(k_ids, (B, S_Q), 0, Q_VOCAB, dtype=jnp.int32)
    attention_mask = jnp.ones((B, S_Q), dtype=jnp.int32)
    answer_seq = jax.random.randint(k_ans, (B, T_ANS), 0, VOCAB, dtype=jnp.int32)

    params = init_params(k_par)
    out = vqa_forward(params, image, input_ids, attention_mask, answer_seq)
    out = jax.block_until_ready(out)

    assert out.shape == (B, T_ANS, VOCAB), out.shape
    assert out.dtype == jnp.float32
    assert bool(jnp.all(jnp.isfinite(out)))
    print("KERNEL_OK")
</pallas_src>

<mosaic_0001>
module attributes {stable_mosaic.version = 11 : i64} {
  func.func @_vqa_fused_kernel(%arg0: memref<8x4xf32, #tpu.memory_space<vmem>>, %arg1: memref<4x64xf32, #tpu.memory_space<vmem>>, %arg2: memref<1x64xf32, #tpu.memory_space<vmem>>, %arg3: memref<64x32xf32, #tpu.memory_space<vmem>>, %arg4: memref<1x32xf32, #tpu.memory_space<vmem>>, %arg5: memref<8x8x48xf32, #tpu.memory_space<vmem>>, %arg6: memref<8x8x1xf32, #tpu.memory_space<vmem>>, %arg7: memref<48x48xf32, #tpu.memory_space<vmem>>, %arg8: memref<1x48xf32, #tpu.memory_space<vmem>>, %arg9: memref<48x32xf32, #tpu.memory_space<vmem>>, %arg10: memref<1x32xf32, #tpu.memory_space<vmem>>, %arg11: memref<64x16xf32, #tpu.memory_space<vmem>>, %arg12: memref<16x128xf32, #tpu.memory_space<vmem>>, %arg13: memref<64x128xf32, #tpu.memory_space<vmem>>, %arg14: memref<32x128xf32, #tpu.memory_space<vmem>>, %arg15: memref<1x128xf32, #tpu.memory_space<vmem>>, %arg16: memref<32x128xf32, #tpu.memory_space<vmem>>, %arg17: memref<32x128xf32, #tpu.memory_space<vmem>>, %arg18: memref<1x128xf32, #tpu.memory_space<vmem>>, %arg19: memref<32x128xf32, #tpu.memory_space<vmem>>, %arg20: memref<32x128xf32, #tpu.memory_space<vmem>>, %arg21: memref<1x128xf32, #tpu.memory_space<vmem>>, %arg22: memref<32x128xf32, #tpu.memory_space<vmem>>, %arg23: memref<1x128xf32, #tpu.memory_space<vmem>>, %arg24: memref<64x128xf32, #tpu.memory_space<vmem>>, %arg25: memref<64x32xf32, #tpu.memory_space<vmem>>) attributes {dimension_semantics = [], scalar_prefetch = 0 : i64, scratch_operands = 1 : i64, tpu.core_type = #tpu.core_type<tc>} {
    %c0 = arith.constant 0 : index
    %c0_0 = arith.constant 0 : index
    %0 = vector.load %arg0[%c0, %c0_0] : memref<8x4xf32, #tpu.memory_space<vmem>>, vector<8x4xf32>
    %c0_1 = arith.constant 0 : index
    %c0_2 = arith.constant 0 : index
    %1 = vector.load %arg1[%c0_1, %c0_2] : memref<4x64xf32, #tpu.memory_space<vmem>>, vector<4x64xf32>
    %cst = arith.constant dense<0.000000e+00> : vector<8x64xf32>
    %2 = tpu.matmul %0, %1, %cst {dimension_numbers = #tpu.dot_dimension_numbers<[1], [0], [0], [1], [0, 0, 1, 1], [], []>} : vector<8x4xf32>, vector<4x64xf32>, vector<8x64xf32> -> vector<8x64xf32>
    %c0_3 = arith.constant 0 : index
    %c0_4 = arith.constant 0 : index
    %3 = vector.load %arg2[%c0_3, %c0_4] : memref<1x64xf32, #tpu.memory_space<vmem>>, vector<1x64xf32>
    %4 = vector.broadcast %3 : vector<1x64xf32> to vector<8x64xf32>
    %5 = arith.addf %2, %4 : vector<8x64xf32>
    %cst_5 = arith.constant 0.000000e+00 : f32
    %6 = vector.broadcast %cst_5 : f32 to vector<8x64xf32>
    %7 = arith.maximumf %5, %6 : vector<8x64xf32>
    %c0_6 = arith.constant 0 : index
    %c0_7 = arith.constant 0 : index
    %8 = vector.load %arg3[%c0_6, %c0_7] : memref<64x32xf32, #tpu.memory_space<vmem>>, vector<64x32xf32>
    %cst_8 = arith.constant dense<0.000000e+00> : vector<8x32xf32>
    %9 = tpu.matmul %7, %8, %cst_8 {dimension_numbers = #tpu.dot_dimension_numbers<[1], [0], [0], [1], [0, 0, 1, 1], [], []>} : vector<8x64xf32>, vector<64x32xf32>, vector<8x32xf32> -> vector<8x32xf32>
    %c0_9 = arith.constant 0 : index
    %c0_10 = arith.constant 0 : index
    %10 = vector.load %arg4[%c0_9, %c0_10] : memref<1x32xf32, #tpu.memory_space<vmem>>, vector<1x32xf32>
    %11 = vector.broadcast %10 : vector<1x32xf32> to vector<8x32xf32>
    %12 = arith.addf %9, %11 : vector<8x32xf32>
    %c0_11 = arith.constant 0 : index
    %c0_12 = arith.constant 0 : index
    %c0_13 = arith.constant 0 : index
    %13 = vector.load %arg5[%c0_11, %c0_12, %c0_13] : memref<8x8x48xf32, #tpu.memory_space<vmem>>, vector<8x8x48xf32>
    %c0_14 = arith.constant 0 : index
    %c0_15 = arith.constant 0 : index
    %c0_16 = arith.constant 0 : index
    %14 = vector.load %arg6[%c0_14, %c0_15, %c0_16] : memref<8x8x1xf32, #tpu.memory_space<vmem>>, vector<8x8x1xf32>
    %15 = vector.broadcast %14 : vector<8x8x1xf32> to vector<8x8x48xf32>
    %16 = arith.mulf %13, %15 : vector<8x8x48xf32>
    %cst_17 = arith.constant dense<0.000000e+00> : vector<8x48xf32>
    %17 = vector.multi_reduction <add>, %16, %cst_17 [1] : vector<8x8x48xf32> to vector<8x48xf32>
    %cst_18 = arith.constant dense<0.000000e+00> : vector<8x1xf32>
    %18 = vector.multi_reduction <add>, %14, %cst_18 [1] : vector<8x8x1xf32> to vector<8x1xf32>
    %cst_19 = arith.constant 9.99999997E-7 : f32
    %19 = vector.broadcast %cst_19 : f32 to vector<8x1xf32>
    %20 = arith.maximumf %18, %19 : vector<8x1xf32>
    %21 = tpu.reciprocal %20 {approx = true} : vector<8x1xf32> -> vector<8x1xf32>
    %22 = vector.broadcast %21 : vector<8x1xf32> to vector<8x48xf32>
    %23 = arith.mulf %17, %22 : vector<8x48xf32>
    %c0_20 = arith.constant 0 : index
    %c0_21 = arith.constant 0 : index
    %24 = vector.load %arg7[%c0_20, %c0_21] : memref<48x48xf32, #tpu.memory_space<vmem>>, vector<48x48xf32>
    %cst_22 = arith.constant dense<0.000000e+00> : vector<8x48xf32>
    %25 = tpu.matmul %23, %24, %cst_22 {dimension_numbers = #tpu.dot_dimension_numbers<[1], [0], [0], [1], [0, 0, 1, 1], [], []>} : vector<8x48xf32>, vector<48x48xf32>, vector<8x48xf32> -> vector<8x48xf32>
    %c0_23 = arith.constant 0 : index
    %c0_24 = arith.constant 0 : index
    %26 = vector.load %arg8[%c0_23, %c0_24] : memref<1x48xf32, #tpu.memory_space<vmem>>, vector<1x48xf32>
    %27 = vector.broadcast %26 : vector<1x48xf32> to vector<8x48xf32>
    %28 = arith.addf %25, %27 : vector<8x48xf32>
    %29 = math.tanh %28 : vector<8x48xf32>
    %c0_25 = arith.constant 0 : index
    %c0_26 = arith.constant 0 : index
    %30 = vector.load %arg9[%c0_25, %c0_26] : memref<48x32xf32, #tpu.memory_space<vmem>>, vector<48x32xf32>
    %cst_27 = arith.constant dense<0.000000e+00> : vector<8x32xf32>
    %31 = tpu.matmul %29, %30, %cst_27 {dimension_numbers = #tpu.dot_dimension_numbers<[1], [0], [0], [1], [0, 0, 1, 1], [], []>} : vector<8x48xf32>, vector<48x32xf32>, vector<8x32xf32> -> vector<8x32xf32>
    %c0_28 = arith.constant 0 : index
    %c0_29 = arith.constant 0 : index
    %32 = vector.load %arg10[%c0_28, %c0_29] : memref<1x32xf32, #tpu.memory_space<vmem>>, vector<1x32xf32>
    %33 = vector.broadcast %32 : vector<1x32xf32> to vector<8x32xf32>
    %34 = arith.addf %31, %33 : vector<8x32xf32>
    %c0_30 = arith.constant 0 : index
    %c0_31 = arith.constant 0 : index
    %35 = vector.load %arg13[%c0_30, %c0_31] : memref<64x128xf32, #tpu.memory_space<vmem>>, vector<32x128xf32>
    %cst_32 = arith.constant dense<0.000000e+00> : vector<8x128xf32>
    %36 = tpu.matmul %34, %35, %cst_32 {dimension_numbers = #tpu.dot_dimension_numbers<[1], [0], [0], [1], [0, 0, 1, 1], [], []>} : vector<8x32xf32>, vector<32x128xf32>, vector<8x128xf32> -> vector<8x128xf32>
    %c32 = arith.constant 32 : index
    %c0_33 = arith.constant 0 : index
    %37 = vector.load %arg13[%c32, %c0_33] : memref<64x128xf32, #tpu.memory_space<vmem>>, vector<32x128xf32>
    %cst_34 = arith.constant dense<0.000000e+00> : vector<8x128xf32>
    %38 = tpu.matmul %12, %37, %cst_34 {dimension_numbers = #tpu.dot_dimension_numbers<[1], [0], [0], [1], [0, 0, 1, 1], [], []>} : vector<8x32xf32>, vector<32x128xf32>, vector<8x128xf32> -> vector<8x128xf32>
    %39 = arith.addf %36, %38 : vector<8x128xf32>
    %c0_35 = arith.constant 0 : index
    %c0_36 = arith.constant 0 : index
    %40 = vector.load %arg15[%c0_35, %c0_36] : memref<1x128xf32, #tpu.memory_space<vmem>>, vector<1x128xf32>
    %41 = vector.broadcast %40 : vector<1x128xf32> to vector<8x128xf32>
    %42 = arith.addf %39, %41 : vector<8x128xf32>
    %c0_37 = arith.constant 0 : index
    %c0_38 = arith.constant 0 : index
    %43 = vector.load %arg11[%c0_37, %c0_38] : memref<64x16xf32, #tpu.memory_space<vmem>>, vector<64x16xf32>
    %c0_39 = arith.constant 0 : index
    %c0_40 = arith.constant 0 : index
    %44 = vector.load %arg12[%c0_39, %c0_40] : memref<16x128xf32, #tpu.memory_space<vmem>>, vector<16x128xf32>
    %cst_41 = arith.constant dense<0.000000e+00> : vector<64x128xf32>
    %45 = tpu.matmul %43, %44, %cst_41 {dimension_numbers = #tpu.dot_dimension_numbers<[1], [0], [0], [1], [0, 0, 1, 1], [], []>} : vector<64x16xf32>, vector<16x128xf32>, vector<64x128xf32> -> vector<64x128xf32>
    %c0_42 = arith.constant 0 : index
    %c0_43 = arith.constant 0 : index
    %46 = vector.load %arg14[%c0_42, %c0_43] : memref<32x128xf32, #tpu.memory_space<vmem>>, vector<32x128xf32>
    %c0_44 = arith.constant 0 : index
    %c0_45 = arith.constant 0 : index
    %47 = vector.load %arg16[%c0_44, %c0_45] : memref<32x128xf32, #tpu.memory_space<vmem>>, vector<32x128xf32>
    %c0_46 = arith.constant 0 : index
    %c0_47 = arith.constant 0 : index
    %48 = vector.load %arg17[%c0_46, %c0_47] : memref<32x128xf32, #tpu.memory_space<vmem>>, vector<32x128xf32>
    %c0_48 = arith.constant 0 : index
    %c0_49 = arith.constant 0 : index
    %49 = vector.load %arg19[%c0_48, %c0_49] : memref<32x128xf32, #tpu.memory_space<vmem>>, vector<32x128xf32>
    %c0_50 = arith.constant 0 : index
    %c0_51 = arith.constant 0 : index
    %50 = vector.load %arg20[%c0_50, %c0_51] : memref<32x128xf32, #tpu.memory_space<vmem>>, vector<32x128xf32>
    %c0_52 = arith.constant 0 : index
    %c0_53 = arith.constant 0 : index
    %51 = vector.load %arg18[%c0_52, %c0_53] : memref<1x128xf32, #tpu.memory_space<vmem>>, vector<1x128xf32>
    %52 = vector.shape_cast %51 : vector<1x128xf32> to vector<1x128xf32>
    %53 = vector.broadcast %52 : vector<1x128xf32> to vector<8x128xf32>
    %c0_54 = arith.constant 0 : index
    %c0_55 = arith.constant 0 : index
    %54 = vector.load %arg21[%c0_54, %c0_55] : memref<1x128xf32, #tpu.memory_space<vmem>>, vector<1x128xf32>
    %55 = vector.shape_cast %54 : vector<1x128xf32> to vector<1x128xf32>
    %56 = vector.broadcast %55 : vector<1x128xf32> to vector<8x128xf32>
    %cst_56 = arith.constant 0.000000e+00 : f32
    %57 = vector.broadcast %cst_56 : f32 to vector<8x32xf32>
    %58 = vector.extract_strided_slice %45 {offsets = [0, 0], sizes = [8, 128], strides = [1, 1]} : vector<64x128xf32> to vector<8x128xf32>
    %59 = arith.addf %58, %42 : vector<8x128xf32>
    %cst_57 = arith.constant dense<0.000000e+00> : vector<8x128xf32>
    %60 = tpu.matmul %57, %46, %cst_57 {dimension_numbers = #tpu.dot_dimension_numbers<[1], [0], [0], [1], [0, 0, 1, 1], [], []>} : vector<8x32xf32>, vector<32x128xf32>, vector<8x128xf32> -> vector<8x128xf32>
    %61 = arith.addf %59, %60 : vector<8x128xf32>
    %62 = vector.extract_strided_slice %61 {offsets = [0, 0], sizes = [8, 32], strides = [1, 1]} : vector<8x128xf32> to vector<8x32xf32>
    %63 = arith.negf %62 : vector<8x32xf32>
    %64 = math.exp %63 : vector<8x32xf32>
    %cst_58 = arith.constant 1.000000e+00 : f32
    %65 = vector.broadcast %cst_58 : f32 to vector<8x32xf32>
    %66 = arith.addf %65, %64 : vector<8x32xf32>
    %67 = arith.divf %65, %66 : vector<8x32xf32>
    %68 = vector.extract_strided_slice %61 {offsets = [0, 32], sizes = [8, 32], strides = [1, 1]} : vector<8x128xf32> to vector<8x32xf32>
    %69 = arith.negf %68 : vector<8x32xf32>
    %70 = math.exp %69 : vector<8x32xf32>
    %cst_59 = arith.constant 1.000000e+00 : f32
    %71 = vector.broadcast %cst_59 : f32 to vector<8x32xf32>
    %72 = arith.addf %71, %70 : vector<8x32xf32>
    %73 = arith.divf %71, %72 : vector<8x32xf32>
    %74 = vector.extract_strided_slice %61 {offsets = [0, 64], sizes = [8, 32], strides = [1, 1]} : vector<8x128xf32> to vector<8x32xf32>
    %75 = math.tanh %74 : vector<8x32xf32>
    %76 = vector.extract_strided_slice %61 {offsets = [0, 96], sizes = [8, 32], strides = [1, 1]} : vector<8x128xf32> to vector<8x32xf32>
    %77 = arith.negf %76 : vector<8x32xf32>
    %78 = math.exp %77 : vector<8x32xf32>
    %cst_60 = arith.constant 1.000000e+00 : f32
    %79 = vector.broadcast %cst_60 : f32 to vector<8x32xf32>
    %80 = arith.addf %79, %78 : vector<8x32xf32>
    %81 = arith.divf %79, %80 : vector<8x32xf32>
    %82 = arith.mulf %73, %57 : vector<8x32xf32>
    %83 = arith.mulf %67, %75 : vector<8x32xf32>
    %84 = arith.addf %82, %83 : vector<8x32xf32>
    %85 = math.tanh %84 : vector<8x32xf32>
    %86 = arith.mulf %81, %85 : vector<8x32xf32>
    %87 = vector.extract_strided_slice %45 {offsets = [8, 0], sizes = [8, 128], strides = [1, 1]} : vector<64x128xf32> to vector<8x128xf32>
    %88 = arith.addf %87, %42 : vector<8x128xf32>
    %cst_61 = arith.constant dense<0.000000e+00> : vector<8x128xf32>
    %89 = tpu.matmul %86, %46, %cst_61 {dimension_numbers = #tpu.dot_dimension_numbers<[1], [0], [0], [1], [0, 0, 1, 1], [], []>} : vector<8x32xf32>, vector<32x128xf32>, vector<8x128xf32> -> vector<8x128xf32>
    %90 = arith.addf %88, %89 : vector<8x128xf32>
    %91 = vector.extract_strided_slice %90 {offsets = [0, 0], sizes = [8, 32], strides = [1, 1]} : vector<8x128xf32> to vector<8x32xf32>
    %92 = arith.negf %91 : vector<8x32xf32>
    %93 = math.exp %92 : vector<8x32xf32>
    %cst_62 = arith.constant 1.000000e+00 : f32
    %94 = vector.broadcast %cst_62 : f32 to vector<8x32xf32>
    %95 = arith.addf %94, %93 : vector<8x32xf32>
    %96 = arith.divf %94, %95 : vector<8x32xf32>
    %97 = vector.extract_strided_slice %90 {offsets = [0, 32], sizes = [8, 32], strides = [1, 1]} : vector<8x128xf32> to vector<8x32xf32>
    %98 = arith.negf %97 : vector<8x32xf32>
    %99 = math.exp %98 : vector<8x32xf32>
    %cst_63 = arith.constant 1.000000e+00 : f32
    %100 = vector.broadcast %cst_63 : f32 to vector<8x32xf32>
    %101 = arith.addf %100, %99 : vector<8x32xf32>
    %102 = arith.divf %100, %101 : vector<8x32xf32>
    %103 = vector.extract_strided_slice %90 {offsets = [0, 64], sizes = [8, 32], strides = [1, 1]} : vector<8x128xf32> to vector<8x32xf32>
    %104 = math.tanh %103 : vector<8x32xf32>
    %105 = vector.extract_strided_slice %90 {offsets = [0, 96], sizes = [8, 32], strides = [1, 1]} : vector<8x128xf32> to vector<8x32xf32>
    %106 = arith.negf %105 : vector<8x32xf32>
    %107 = math.exp %106 : vector<8x32xf32>
    %cst_64 = arith.constant 1.000000e+00 : f32
    %108 = vector.broadcast %cst_64 : f32 to vector<8x32xf32>
    %109 = arith.addf %108, %107 : vector<8x32xf32>
    %110 = arith.divf %108, %109 : vector<8x32xf32>
    %111 = arith.mulf %102, %84 : vector<8x32xf32>
    %112 = arith.mulf %96, %104 : vector<8x32xf32>
    %113 = arith.addf %111, %112 : vector<8x32xf32>
    %114 = math.tanh %113 : vector<8x32xf32>
    %115 = arith.mulf %110, %114 : vector<8x32xf32>
    %cst_65 = arith.constant dense<0.000000e+00> : vector<8x128xf32>
    %116 = tpu.matmul %86, %47, %cst_65 {dimension_numbers = #tpu.dot_dimension_numbers<[1], [0], [0], [1], [0, 0, 1, 1], [], []>} : vector<8x32xf32>, vector<32x128xf32>, vector<8x128xf32> -> vector<8x128xf32>
    %cst_66 = arith.constant dense<0.000000e+00> : vector<8x128xf32>
    %117 = tpu.matmul %57, %48, %cst_66 {dimension_numbers = #tpu.dot_dimension_numbers<[1], [0], [0], [1], [0, 0, 1, 1], [], []>} : vector<8x32xf32>, vector<32x128xf32>, vector<8x128xf32> -> vector<8x128xf32>
    %118 = arith.addf %116, %117 : vector<8x128xf32>
    %119 = arith.addf %118, %53 : vector<8x128xf32>
    %120 = vector.extract_strided_slice %119 {offsets = [0, 0], sizes = [8, 32], strides = [1, 1]} : vector<8x128xf32> to vector<8x32xf32>
    %121 = arith.negf %120 : vector<8x32xf32>
    %122 = math.exp %121 : vector<8x32xf32>
    %cst_67 = arith.constant 1.000000e+00 : f32
    %123 = vector.broadcast %cst_67 : f32 to vector<8x32xf32>
    %124 = arith.addf %123, %122 : vector<8x32xf32>
    %125 = arith.divf %123, %124 : vector<8x32xf32>
    %126 = vector.extract_strided_slice %119 {offsets = [0, 32], sizes = [8, 32], strides = [1, 1]} : vector<8x128xf32> to vector<8x32xf32>
    %127 = arith.negf %126 : vector<8x32xf32>
    %128 = math.exp %127 : vector<8x32xf32>
    %cst_68 = arith.constant 1.000000e+00 : f32
    %129 = vector.broadcast %cst_68 : f32 to vector<8x32xf32>
    %130 = arith.addf %129, %128 : vector<8x32xf32>
    %131 = arith.divf %129, %130 : vector<8x32xf32>
    %132 = vector.extract_strided_slice %119 {offsets = [0, 64], sizes = [8, 32], strides = [1, 1]} : vector<8x128xf32> to vector<8x32xf32>
    %133 = math.tanh %132 : vector<8x32xf32>
    %134 = vector.extract_strided_slice %119 {offsets = [0, 96], sizes = [8, 32], strides = [1, 1]} : vector<8x128xf32> to vector<8x32xf32>
    %135 = arith.negf %134 : vector<8x32xf32>
    %136 = math.exp %135 : vector<8x32xf32>
    %cst_69 = arith.constant 1.000000e+00 : f32
    %137 = vector.broadcast %cst_69 : f32 to vector<8x32xf32>
    %138 = arith.addf %137, %136 : vector<8x32xf32>
    %139 = arith.divf %137, %138 : vector<8x32xf32>
    %140 = arith.mulf %131, %57 : vector<8x32xf32>
    %141 = arith.mulf %125, %133 : vector<8x32xf32>
    %142 = arith.addf %140, %141 : vector<8x32xf32>
    %143 = math.tanh %142 : vector<8x32xf32>
    %144 = arith.mulf %139, %143 : vector<8x32xf32>
    %145 = vector.extract_strided_slice %45 {offsets = [16, 0], sizes = [8, 128], strides = [1, 1]} : vector<64x128xf32> to vector<8x128xf32>
    %146 = arith.addf %145, %42 : vector<8x128xf32>
    %cst_70 = arith.constant dense<0.000000e+00> : vector<8x128xf32>
    %147 = tpu.matmul %115, %46, %cst_70 {dimension_numbers = #tpu.dot_dimension_numbers<[1], [0], [0], [1], [0, 0, 1, 1], [], []>} : vector<8x32xf32>, vector<32x128xf32>, vector<8x128xf32> -> vector<8x128xf32>
    %148 = arith.addf %146, %147 : vector<8x128xf32>
    %149 = vector.extract_strided_slice %148 {offsets = [0, 0], sizes = [8, 32], strides = [1, 1]} : vector<8x128xf32> to vector<8x32xf32>
    %150 = arith.negf %149 : vector<8x32xf32>
    %151 = math.exp %150 : vector<8x32xf32>
    %cst_71 = arith.constant 1.000000e+00 : f32
    %152 = vector.broadcast %cst_71 : f32 to vector<8x32xf32>
    %153 = arith.addf %152, %151 : vector<8x32xf32>
    %154 = arith.divf %152, %153 : vector<8x32xf32>
    %155 = vector.extract_strided_slice %148 {offsets = [0, 32], sizes = [8, 32], strides = [1, 1]} : vector<8x128xf32> to vector<8x32xf32>
    %156 = arith.negf %155 : vector<8x32xf32>
    %157 = math.exp %156 : vector<8x32xf32>
    %cst_72 = arith.constant 1.000000e+00 : f32
    %158 = vector.broadcast %cst_72 : f32 to vector<8x32xf32>
    %159 = arith.addf %158, %157 : vector<8x32xf32>
    %160 = arith.divf %158, %159 : vector<8x32xf32>
    %161 = vector.extract_strided_slice %148 {offsets = [0, 64], sizes = [8, 32], strides = [1, 1]} : vector<8x128xf32> to vector<8x32xf32>
    %162 = math.tanh %161 : vector<8x32xf32>
    %163 = vector.extract_strided_slice %148 {offsets = [0, 96], sizes = [8, 32], strides = [1, 1]} : vector<8x128xf32> to vector<8x32xf32>
    %164 = arith.negf %163 : vector<8x32xf32>
    %165 = math.exp %164 : vector<8x32xf32>
    %cst_73 = arith.constant 1.000000e+00 : f32
    %166 = vector.broadcast %cst_73 : f32 to vector<8x32xf32>
    %167 = arith.addf %166, %165 : vector<8x32xf32>
    %168 = arith.divf %166, %167 : vector<8x32xf32>
    %169 = arith.mulf %160, %113 : vector<8x32xf32>
    %170 = arith.mulf %154, %162 : vector<8x32xf32>
    %171 = arith.addf %169, %170 : vector<8x32xf32>
    %172 = math.tanh %171 : vector<8x32xf32>
    %173 = arith.mulf %168, %172 : vector<8x32xf32>
    %cst_74 = arith.constant dense<0.000000e+00> : vector<8x128xf32>
    %174 = tpu.matmul %115, %47, %cst_74 {dimension_numbers = #tpu.dot_dimension_numbers<[1], [0], [0], [1], [0, 0, 1, 1], [], []>} : vector<8x32xf32>, vector<32x128xf32>, vector<8x128xf32> -> vector<8x128xf32>
    %cst_75 = arith.constant dense<0.000000e+00> : vector<8x128xf32>
    %175 = tpu.matmul %144, %48, %cst_75 {dimension_numbers = #tpu.dot_dimension_numbers<[1], [0], [0], [1], [0, 0, 1, 1], [], []>} : vector<8x32xf32>, vector<32x128xf32>, vector<8x128xf32> -> vector<8x128xf32>
    %176 = arith.addf %174, %175 : vector<8x128xf32>
    %177 = arith.addf %176, %53 : vector<8x128xf32>
    %178 = vector.extract_strided_slice %177 {offsets = [0, 0], sizes = [8, 32], strides = [1, 1]} : vector<8x128xf32> to vector<8x32xf32>
    %179 = arith.negf %178 : vector<8x32xf32>
    %180 = math.exp %179 : vector<8x32xf32>
    %cst_76 = arith.constant 1.000000e+00 : f32
    %181 = vector.broadcast %cst_76 : f32 to vector<8x32xf32>
    %182 = arith.addf %181, %180 : vector<8x32xf32>
    %183 = arith.divf %181, %182 : vector<8x32xf32>
    %184 = vector.extract_strided_slice %177 {offsets = [0, 32], sizes = [8, 32], strides = [1, 1]} : vector<8x128xf32> to vector<8x32xf32>
    %185 = arith.negf %184 : vector<8x32xf32>
    %186 = math.exp %185 : vector<8x32xf32>
    %cst_77 = arith.constant 1.000000e+00 : f32
    %187 = vector.broadcast %cst_77 : f32 to vector<8x32xf32>
    %188 = arith.addf %187, %186 : vector<8x32xf32>
    %189 = arith.divf %187, %188 : vector<8x32xf32>
    %190 = vector.extract_strided_slice %177 {offsets = [0, 64], sizes = [8, 32], strides = [1, 1]} : vector<8x128xf32> to vector<8x32xf32>
    %191 = math.tanh %190 : vector<8x32xf32>
    %192 = vector.extract_strided_slice %177 {offsets = [0, 96], sizes = [8, 32], strides = [1, 1]} : vector<8x128xf32> to vector<8x32xf32>
    %193 = arith.negf %192 : vector<8x32xf32>
    %194 = math.exp %193 : vector<8x32xf32>
    %cst_78 = arith.constant 1.000000e+00 : f32
    %195 = vector.broadcast %cst_78 : f32 to vector<8x32xf32>
    %196 = arith.addf %195, %194 : vector<8x32xf32>
    %197 = arith.divf %195, %196 : vector<8x32xf32>
    %198 = arith.mulf %189, %142 : vector<8x32xf32>
    %199 = arith.mulf %183, %191 : vector<8x32xf32>
    %200 = arith.addf %198, %199 : vector<8x32xf32>
    %201 = math.tanh %200 : vector<8x32xf32>
    %202 = arith.mulf %197, %201 : vector<8x32xf32>
    %cst_79 = arith.constant dense<0.000000e+00> : vector<8x128xf32>
    %203 = tpu.matmul %144, %49, %cst_79 {dimension_numbers = #tpu.dot_dimension_numbers<[1], [0], [0], [1], [0, 0, 1, 1], [], []>} : vector<8x32xf32>, vector<32x128xf32>, vector<8x128xf32> -> vector<8x128xf32>
    %cst_80 = arith.constant dense<0.000000e+00> : vector<8x128xf32>
    %204 = tpu.matmul %57, %50, %cst_80 {dimension_numbers = #tpu.dot_dimension_numbers<[1], [0], [0], [1], [0, 0, 1, 1], [], []>} : vector<8x32xf32>, vector<32x128xf32>, vector<8x128xf32> -> vector<8x128xf32>
    %205 = arith.addf %203, %204 : vector<8x128xf32>
    %206 = arith.addf %205, %56 : vector<8x128xf32>
    %207 = vector.extract_strided_slice %206 {offsets = [0, 0], sizes = [8, 32], strides = [1, 1]} : vector<8x128xf32> to vector<8x32xf32>
    %208 = arith.negf %207 : vector<8x32xf32>
    %209 = math.exp %208 : vector<8x32xf32>
    %cst_81 = arith.constant 1.000000e+00 : f32
    %210 = vector.broadcast %cst_81 : f32 to vector<8x32xf32>
    %211 = arith.addf %210, %209 : vector<8x32xf32>
    %212 = arith.divf %210, %211 : vector<8x32xf32>
    %213 = vector.extract_strided_slice %206 {offsets = [0, 32], sizes = [8, 32], strides = [1, 1]} : vector<8x128xf32> to vector<8x32xf32>
    %214 = arith.negf %213 : vector<8x32xf32>
    %215 = math.exp %214 : vector<8x32xf32>
    %cst_82 = arith.constant 1.000000e+00 : f32
    %216 = vector.broadcast %cst_82 : f32 to vector<8x32xf32>
    %217 = arith.addf %216, %215 : vector<8x32xf32>
    %218 = arith.divf %216, %217 : vector<8x32xf32>
    %219 = vector.extract_strided_slice %206 {offsets = [0, 64], sizes = [8, 32], strides = [1, 1]} : vector<8x128xf32> to vector<8x32xf32>
    %220 = math.tanh %219 : vector<8x32xf32>
    %221 = vector.extract_strided_slice %206 {offsets = [0, 96], sizes = [8, 32], strides = [1, 1]} : vector<8x128xf32> to vector<8x32xf32>
    %222 = arith.negf %221 : vector<8x32xf32>
    %223 = math.exp %222 : vector<8x32xf32>
    %cst_83 = arith.constant 1.000000e+00 : f32
    %224 = vector.broadcast %cst_83 : f32 to vector<8x32xf32>
    %225 = arith.addf %224, %223 : vector<8x32xf32>
    %226 = arith.divf %224, %225 : vector<8x32xf32>
    %227 = arith.mulf %218, %57 : vector<8x32xf32>
    %228 = arith.mulf %212, %220 : vector<8x32xf32>
    %229 = arith.addf %227, %228 : vector<8x32xf32>
    %230 = math.tanh %229 : vector<8x32xf32>
    %231 = arith.mulf %226, %230 : vector<8x32xf32>
    %c0_84 = arith.constant 0 : index
    %c0_85 = arith.constant 0 : index
    %232 = vector.load %arg25[%c0_84, %c0_85] : memref<64x32xf32, #tpu.memory_space<vmem>>, vector<8x32xf32>
    tpu.vector_store %arg25[%c0_84, %c0_85], %231 {strides = array<i32>} : memref<64x32xf32, #tpu.memory_space<vmem>>, vector<8x32xf32>,
    %233 = vector.extract_strided_slice %45 {offsets = [24, 0], sizes = [8, 128], strides = [1, 1]} : vector<64x128xf32> to vector<8x128xf32>
    %234 = arith.addf %233, %42 : vector<8x128xf32>
    %cst_86 = arith.constant dense<0.000000e+00> : vector<8x128xf32>
    %235 = tpu.matmul %173, %46, %cst_86 {dimension_numbers = #tpu.dot_dimension_numbers<[1], [0], [0], [1], [0, 0, 1, 1], [], []>} : vector<8x32xf32>, vector<32x128xf32>, vector<8x128xf32> -> vector<8x128xf32>
    %236 = arith.addf %234, %235 : vector<8x128xf32>
    %237 = vector.extract_strided_slice %236 {offsets = [0, 0], sizes = [8, 32], strides = [1, 1]} : vector<8x128xf32> to vector<8x32xf32>
    %238 = arith.negf %237 : vector<8x32xf32>
    %239 = math.exp %238 : vector<8x32xf32>
    %cst_87 = arith.constant 1.000000e+00 : f32
    %240 = vector.broadcast %cst_87 : f32 to vector<8x32xf32>
    %241 = arith.addf %240, %239 : vector<8x32xf32>
    %242 = arith.divf %240, %241 : vector<8x32xf32>
    %243 = vector.extract_strided_slice %236 {offsets = [0, 32], sizes = [8, 32], strides = [1, 1]} : vector<8x128xf32> to vector<8x32xf32>
    %244 = arith.negf %243 : vector<8x32xf32>
    %245 = math.exp %244 : vector<8x32xf32>
    %cst_88 = arith.constant 1.000000e+00 : f32
    %246 = vector.broadcast %cst_88 : f32 to vector<8x32xf32>
    %247 = arith.addf %246, %245 : vector<8x32xf32>
    %248 = arith.divf %246, %247 : vector<8x32xf32>
    %249 = vector.extract_strided_slice %236 {offsets = [0, 64], sizes = [8, 32], strides = [1, 1]} : vector<8x128xf32> to vector<8x32xf32>
    %250 = math.tanh %249 : vector<8x32xf32>
    %251 = vector.extract_strided_slice %236 {offsets = [0, 96], sizes = [8, 32], strides = [1, 1]} : vector<8x128xf32> to vector<8x32xf32>
    %252 = arith.negf %251 : vector<8x32xf32>
    %253 = math.exp %252 : vector<8x32xf32>
    %cst_89 = arith.constant 1.000000e+00 : f32
    %254 = vector.broadcast %cst_89 : f32 to vector<8x32xf32>
    %255 = arith.addf %254, %253 : vector<8x32xf32>
    %256 = arith.divf %254, %255 : vector<8x32xf32>
    %257 = arith.mulf %248, %171 : vector<8x32xf32>
    %258 = arith.mulf %242, %250 : vector<8x32xf32>
    %259 = arith.addf %257, %258 : vector<8x32xf32>
    %260 = math.tanh %259 : vector<8x32xf32>
    %261 = arith.mulf %256, %260 : vector<8x32xf32>
    %cst_90 = arith.constant dense<0.000000e+00> : vector<8x128xf32>
    %262 = tpu.matmul %173, %47, %cst_90 {dimension_numbers = #tpu.dot_dimension_numbers<[1], [0], [0], [1], [0, 0, 1, 1], [], []>} : vector<8x32xf32>, vector<32x128xf32>, vector<8x128xf32> -> vector<8x128xf32>
    %cst_91 = arith.constant dense<0.000000e+00> : vector<8x128xf32>
    %263 = tpu.matmul %202, %48, %cst_91 {dimension_numbers = #tpu.dot_dimension_numbers<[1], [0], [0], [1], [0, 0, 1, 1], [], []>} : vector<8x32xf32>, vector<32x128xf32>, vector<8x128xf32> -> vector<8x128xf32>
    %264 = arith.addf %262, %263 : vector<8x128xf32>
    %265 = arith.addf %264, %53 : vector<8x128xf32>
    %266 = vector.extract_strided_slice %265 {offsets = [0, 0], sizes = [8, 32], strides = [1, 1]} : vector<8x128xf32> to vector<8x32xf32>
    %267 = arith.negf %266 : vector<8x32xf32>
    %268 = math.exp %267 : vector<8x32xf32>
    %cst_92 = arith.constant 1.000000e+00 : f32
    %269 = vector.broadcast %cst_92 : f32 to vector<8x32xf32>
    %270 = arith.addf %269, %268 : vector<8x32xf32>
    %271 = arith.divf %269, %270 : vector<8x32xf32>
    %272 = vector.extract_strided_slice %265 {offsets = [0, 32], sizes = [8, 32], strides = [1, 1]} : vector<8x128xf32> to vector<8x32xf32>
    %273 = arith.negf %272 : vector<8x32xf32>
    %274 = math.exp %273 : vector<8x32xf32>
    %cst_93 = arith.constant 1.000000e+00 : f32
    %275 = vector.broadcast %cst_93 : f32 to vector<8x32xf32>
    %276 = arith.addf %275, %274 : vector<8x32xf32>
    %277 = arith.divf %275, %276 : vector<8x32xf32>
    %278 = vector.extract_strided_slice %265 {offsets = [0, 64], sizes = [8, 32], strides = [1, 1]} : vector<8x128xf32> to vector<8x32xf32>
    %279 = math.tanh %278 : vector<8x32xf32>
    %280 = vector.extract_strided_slice %265 {offsets = [0, 96], sizes = [8, 32], strides = [1, 1]} : vector<8x128xf32> to vector<8x32xf32>
    %281 = arith.negf %280 : vector<8x32xf32>
    %282 = math.exp %281 : vector<8x32xf32>
    %cst_94 = arith.constant 1.000000e+00 : f32
    %283 = vector.broadcast %cst_94 : f32 to vector<8x32xf32>
    %284 = arith.addf %283, %282 : vector<8x32xf32>
    %285 = arith.divf %283, %284 : vector<8x32xf32>
    %286 = arith.mulf %277, %200 : vector<8x32xf32>
    %287 = arith.mulf %271, %279 : vector<8x32xf32>
    %288 = arith.addf %286, %287 : vector<8x32xf32>
    %289 = math.tanh %288 : vector<8x32xf32>
    %290 = arith.mulf %285, %289 : vector<8x32xf32>
    %cst_95 = arith.constant dense<0.000000e+00> : vector<8x128xf32>
    %291 = tpu.matmul %202, %49, %cst_95 {dimension_numbers = #tpu.dot_dimension_numbers<[1], [0], [0], [1], [0, 0, 1, 1], [], []>} : vector<8x32xf32>, vector<32x128xf32>, vector<8x128xf32> -> vector<8x128xf32>
    %cst_96 = arith.constant dense<0.000000e+00> : vector<8x128xf32>
    %292 = tpu.matmul %231, %50, %cst_96 {dimension_numbers = #tpu.dot_dimension_numbers<[1], [0], [0], [1], [0, 0, 1, 1], [], []>} : vector<8x32xf32>, vector<32x128xf32>, vector<8x128xf32> -> vector<8x128xf32>
    %293 = arith.addf %291, %292 : vector<8x128xf32>
    %294 = arith.addf %293, %56 : vector<8x128xf32>
    %295 = vector.extract_strided_slice %294 {offsets = [0, 0], sizes = [8, 32], strides = [1, 1]} : vector<8x128xf32> to vector<8x32xf32>
    %296 = arith.negf %295 : vector<8x32xf32>
    %297 = math.exp %296 : vector<8x32xf32>
    %cst_97 = arith.constant 1.000000e+00 : f32
    %298 = vector.broadcast %cst_97 : f32 to vector<8x32xf32>
    %299 = arith.addf %298, %297 : vector<8x32xf32>
    %300 = arith.divf %298, %299 : vector<8x32xf32>
    %301 = vector.extract_strided_slice %294 {offsets = [0, 32], sizes = [8, 32], strides = [1, 1]} : vector<8x128xf32> to vector<8x32xf32>
    %302 = arith.negf %301 : vector<8x32xf32>
    %303 = math.exp %302 : vector<8x32xf32>
    %cst_98 = arith.constant 1.000000e+00 : f32
    %304 = vector.broadcast %cst_98 : f32 to vector<8x32xf32>
    %305 = arith.addf %304, %303 : vector<8x32xf32>
    %306 = arith.divf %304, %305 : vector<8x32xf32>
    %307 = vector.extract_strided_slice %294 {offsets = [0, 64], sizes = [8, 32], strides = [1, 1]} : vector<8x128xf32> to vector<8x32xf32>
    %308 = math.tanh %307 : vector<8x32xf32>
    %309 = vector.extract_strided_slice %294 {offsets = [0, 96], sizes = [8, 32], strides = [1, 1]} : vector<8x128xf32> to vector<8x32xf32>
    %310 = arith.negf %309 : vector<8x32xf32>
    %311 = math.exp %310 : vector<8x32xf32>
    %cst_99 = arith.constant 1.000000e+00 : f32
    %312 = vector.broadcast %cst_99 : f32 to vector<8x32xf32>
    %313 = arith.addf %312, %311 : vector<8x32xf32>
    %314 = arith.divf %312, %313 : vector<8x32xf32>
    %315 = arith.mulf %306, %229 : vector<8x32xf32>
    %316 = arith.mulf %300, %308 : vector<8x32xf32>
    %317 = arith.addf %315, %316 : vector<8x32xf32>
    %318 = math.tanh %317 : vector<8x32xf32>
    %319 = arith.mulf %314, %318 : vector<8x32xf32>
    %c8 = arith.constant 8 : index
    %c0_100 = arith.constant 0 : index
    %320 = vector.load %arg25[%c8, %c0_100] : memref<64x32xf32, #tpu.memory_space<vmem>>, vector<8x32xf32>
    tpu.vector_store %arg25[%c8, %c0_100], %319 {strides = array<i32>} : memref<64x32xf32, #tpu.memory_space<vmem>>, vector<8x32xf32>,
    %321 = vector.extract_strided_slice %45 {offsets = [32, 0], sizes = [8, 128], strides = [1, 1]} : vector<64x128xf32> to vector<8x128xf32>
    %322 = arith.addf %321, %42 : vector<8x128xf32>
    %cst_101 = arith.constant dense<0.000000e+00> : vector<8x128xf32>
    %323 = tpu.matmul %261, %46, %cst_101 {dimension_numbers = #tpu.dot_dimension_numbers<[1], [0], [0], [1], [0, 0, 1, 1], [], []>} : vector<8x32xf32>, vector<32x128xf32>, vector<8x128xf32> -> vector<8x128xf32>
    %324 = arith.addf %322, %323 : vector<8x128xf32>
    %325 = vector.extract_strided_slice %324 {offsets = [0, 0], sizes = [8, 32], strides = [1, 1]} : vector<8x128xf32> to vector<8x32xf32>
    %326 = arith.negf %325 : vector<8x32xf32>
    %327 = math.exp %326 : vector<8x32xf32>
    %cst_102 = arith.constant 1.000000e+00 : f32
    %328 = vector.broadcast %cst_102 : f32 to vector<8x32xf32>
    %329 = arith.addf %328, %327 : vector<8x32xf32>
    %330 = arith.divf %328, %329 : vector<8x32xf32>
    %331 = vector.extract_strided_slice %324 {offsets = [0, 32], sizes = [8, 32], strides = [1, 1]} : vector<8x128xf32> to vector<8x32xf32>
    %332 = arith.negf %331 : vector<8x32xf32>
    %333 = math.exp %332 : vector<8x32xf32>
    %cst_103 = arith.constant 1.000000e+00 : f32
    %334 = vector.broadcast %cst_103 : f32 to vector<8x32xf32>
    %335 = arith.addf %334, %333 : vector<8x32xf32>
    %336 = arith.divf %334, %335 : vector<8x32xf32>
    %337 = vector.extract_strided_slice %324 {offsets = [0, 64], sizes = [8, 32], strides = [1, 1]} : vector<8x128xf32> to vector<8x32xf32>
    %338 = math.tanh %337 : vector<8x32xf32>
    %339 = vector.extract_strided_slice %324 {offsets = [0, 96], sizes = [8, 32], strides = [1, 1]} : vector<8x128xf32> to vector<8x32xf32>
    %340 = arith.negf %339 : vector<8x32xf32>
    %341 = math.exp %340 : vector<8x32xf32>
    %cst_104 = arith.constant 1.000000e+00 : f32
    %342 = vector.broadcast %cst_104 : f32 to vector<8x32xf32>
    %343 = arith.addf %342, %341 : vector<8x32xf32>
    %344 = arith.divf %342, %343 : vector<8x32xf32>
    %345 = arith.mulf %336, %259 : vector<8x32xf32>
    %346 = arith.mulf %330, %338 : vector<8x32xf32>
    %347 = arith.addf %345, %346 : vector<8x32xf32>
    %348 = math.tanh %347 : vector<8x32xf32>
    %349 = arith.mulf %344, %348 : vector<8x32xf32>
    %cst_105 = arith.constant dense<0.000000e+00> : vector<8x128xf32>
    %350 = tpu.matmul %261, %47, %cst_105 {dimension_numbers = #tpu.dot_dimension_numbers<[1], [0], [0], [1], [0, 0, 1, 1], [], []>} : vector<8x32xf32>, vector<32x128xf32>, vector<8x128xf32> -> vector<8x128xf32>
    %cst_106 = arith.constant dense<0.000000e+00> : vector<8x128xf32>
    %351 = tpu.matmul %290, %48, %cst_106 {dimension_numbers = #tpu.dot_dimension_numbers<[1], [0], [0], [1], [0, 0, 1, 1], [], []>} : vector<8x32xf32>, vector<32x128xf32>, vector<8x128xf32> -> vector<8x128xf32>
    %352 = arith.addf %350, %351 : vector<8x128xf32>
    %353 = arith.addf %352, %53 : vector<8x128xf32>
    %354 = vector.extract_strided_slice %353 {offsets = [0, 0], sizes = [8, 32], strides = [1, 1]} : vector<8x128xf32> to vector<8x32xf32>
    %355 = arith.negf %354 : vector<8x32xf32>
    %356 = math.exp %355 : vector<8x32xf32>
    %cst_107 = arith.constant 1.000000e+00 : f32
    %357 = vector.broadcast %cst_107 : f32 to vector<8x32xf32>
    %358 = arith.addf %357, %356 : vector<8x32xf32>
    %359 = arith.divf %357, %358 : vector<8x32xf32>
    %360 = vector.extract_strided_slice %353 {offsets = [0, 32], sizes = [8, 32], strides = [1, 1]} : vector<8x128xf32> to vector<8x32xf32>
    %361 = arith.negf %360 : vector<8x32xf32>
    %362 = math.exp %361 : vector<8x32xf32>
    %cst_108 = arith.constant 1.000000e+00 : f32
    %363 = vector.broadcast %cst_108 : f32 to vector<8x32xf32>
    %364 = arith.addf %363, %362 : vector<8x32xf32>
    %365 = arith.divf %363, %364 : vector<8x32xf32>
    %366 = vector.extract_strided_slice %353 {offsets = [0, 64], sizes = [8, 32], strides = [1, 1]} : vector<8x128xf32> to vector<8x32xf32>
    %367 = math.tanh %366 : vector<8x32xf32>
    %368 = vector.extract_strided_slice %353 {offsets = [0, 96], sizes = [8, 32], strides = [1, 1]} : vector<8x128xf32> to vector<8x32xf32>
    %369 = arith.negf %368 : vector<8x32xf32>
    %370 = math.exp %369 : vector<8x32xf32>
    %cst_109 = arith.constant 1.000000e+00 : f32
    %371 = vector.broadcast %cst_109 : f32 to vector<8x32xf32>
    %372 = arith.addf %371, %370 : vector<8x32xf32>
    %373 = arith.divf %371, %372 : vector<8x32xf32>
    %374 = arith.mulf %365, %288 : vector<8x32xf32>
    %375 = arith.mulf %359, %367 : vector<8x32xf32>
    %376 = arith.addf %374, %375 : vector<8x32xf32>
    %377 = math.tanh %376 : vector<8x32xf32>
    %378 = arith.mulf %373, %377 : vector<8x32xf32>
    %cst_110 = arith.constant dense<0.000000e+00> : vector<8x128xf32>
    %379 = tpu.matmul %290, %49, %cst_110 {dimension_numbers = #tpu.dot_dimension_numbers<[1], [0], [0], [1], [0, 0, 1, 1], [], []>} : vector<8x32xf32>, vector<32x128xf32>, vector<8x128xf32> -> vector<8x128xf32>
    %cst_111 = arith.constant dense<0.000000e+00> : vector<8x128xf32>
    %380 = tpu.matmul %319, %50, %cst_111 {dimension_numbers = #tpu.dot_dimension_numbers<[1], [0], [0], [1], [0, 0, 1, 1], [], []>} : vector<8x32xf32>, vector<32x128xf32>, vector<8x128xf32> -> vector<8x128xf32>
    %381 = arith.addf %379, %380 : vector<8x128xf32>
    %382 = arith.addf %381, %56 : vector<8x128xf32>
    %383 = vector.extract_strided_slice %382 {offsets = [0, 0], sizes = [8, 32], strides = [1, 1]} : vector<8x128xf32> to vector<8x32xf32>
    %384 = arith.negf %383 : vector<8x32xf32>
    %385 = math.exp %384 : vector<8x32xf32>
    %cst_112 = arith.constant 1.000000e+00 : f32
    %386 = vector.broadcast %cst_112 : f32 to vector<8x32xf32>
    %387 = arith.addf %386, %385 : vector<8x32xf32>
    %388 = arith.divf %386, %387 : vector<8x32xf32>
    %389 = vector.extract_strided_slice %382 {offsets = [0, 32], sizes = [8, 32], strides = [1, 1]} : vector<8x128xf32> to vector<8x32xf32>
    %390 = arith.negf %389 : vector<8x32xf32>
    %391 = math.exp %390 : vector<8x32xf32>
    %cst_113 = arith.constant 1.000000e+00 : f32
    %392 = vector.broadcast %cst_113 : f32 to vector<8x32xf32>
    %393 = arith.addf %392, %391 : vector<8x32xf32>
    %394 = arith.divf %392, %393 : vector<8x32xf32>
    %395 = vector.extract_strided_slice %382 {offsets = [0, 64], sizes = [8, 32], strides = [1, 1]} : vector<8x128xf32> to vector<8x32xf32>
    %396 = math.tanh %395 : vector<8x32xf32>
    %397 = vector.extract_strided_slice %382 {offsets = [0, 96], sizes = [8, 32], strides = [1, 1]} : vector<8x128xf32> to vector<8x32xf32>
    %398 = arith.negf %397 : vector<8x32xf32>
    %399 = math.exp %398 : vector<8x32xf32>
    %cst_114 = arith.constant 1.000000e+00 : f32
    %400 = vector.broadcast %cst_114 : f32 to vector<8x32xf32>
    %401 = arith.addf %400, %399 : vector<8x32xf32>
    %402 = arith.divf %400, %401 : vector<8x32xf32>
    %403 = arith.mulf %394, %317 : vector<8x32xf32>
    %404 = arith.mulf %388, %396 : vector<8x32xf32>
    %405 = arith.addf %403, %404 : vector<8x32xf32>
    %406 = math.tanh %405 : vector<8x32xf32>
    %407 = arith.mulf %402, %406 : vector<8x32xf32>
    %c16 = arith.constant 16 : index
    %c0_115 = arith.constant 0 : index
    %408 = vector.load %arg25[%c16, %c0_115] : memref<64x32xf32, #tpu.memory_space<vmem>>, vector<8x32xf32>
    tpu.vector_store %arg25[%c16, %c0_115], %407 {strides = array<i32>} : memref<64x32xf32, #tpu.memory_space<vmem>>, vector<8x32xf32>,
    %409 = vector.extract_strided_slice %45 {offsets = [40, 0], sizes = [8, 128], strides = [1, 1]} : vector<64x128xf32> to vector<8x128xf32>
    %410 = arith.addf %409, %42 : vector<8x128xf32>
    %cst_116 = arith.constant dense<0.000000e+00> : vector<8x128xf32>
    %411 = tpu.matmul %349, %46, %cst_116 {dimension_numbers = #tpu.dot_dimension_numbers<[1], [0], [0], [1], [0, 0, 1, 1], [], []>} : vector<8x32xf32>, vector<32x128xf32>, vector<8x128xf32> -> vector<8x128xf32>
    %412 = arith.addf %410, %411 : vector<8x128xf32>
    %413 = vector.extract_strided_slice %412 {offsets = [0, 0], sizes = [8, 32], strides = [1, 1]} : vector<8x128xf32> to vector<8x32xf32>
    %414 = arith.negf %413 : vector<8x32xf32>
    %415 = math.exp %414 : vector<8x32xf32>
    %cst_117 = arith.constant 1.000000e+00 : f32
    %416 = vector.broadcast %cst_117 : f32 to vector<8x32xf32>
    %417 = arith.addf %416, %415 : vector<8x32xf32>
    %418 = arith.divf %416, %417 : vector<8x32xf32>
    %419 = vector.extract_strided_slice %412 {offsets = [0, 32], sizes = [8, 32], strides = [1, 1]} : vector<8x128xf32> to vector<8x32xf32>
    %420 = arith.negf %419 : vector<8x32xf32>
    %421 = math.exp %420 : vector<8x32xf32>
    %cst_118 = arith.constant 1.000000e+00 : f32
    %422 = vector.broadcast %cst_118 : f32 to vector<8x32xf32>
    %423 = arith.addf %422, %421 : vector<8x32xf32>
    %424 = arith.divf %422, %423 : vector<8x32xf32>
    %425 = vector.extract_strided_slice %412 {offsets = [0, 64], sizes = [8, 32], strides = [1, 1]} : vector<8x128xf32> to vector<8x32xf32>
    %426 = math.tanh %425 : vector<8x32xf32>
    %427 = vector.extract_strided_slice %412 {offsets = [0, 96], sizes = [8, 32], strides = [1, 1]} : vector<8x128xf32> to vector<8x32xf32>
    %428 = arith.negf %427 : vector<8x32xf32>
    %429 = math.exp %428 : vector<8x32xf32>
    %cst_119 = arith.constant 1.000000e+00 : f32
    %430 = vector.broadcast %cst_119 : f32 to vector<8x32xf32>
    %431 = arith.addf %430, %429 : vector<8x32xf32>
    %432 = arith.divf %430, %431 : vector<8x32xf32>
    %433 = arith.mulf %424, %347 : vector<8x32xf32>
    %434 = arith.mulf %418, %426 : vector<8x32xf32>
    %435 = arith.addf %433, %434 : vector<8x32xf32>
    %436 = math.tanh %435 : vector<8x32xf32>
    %437 = arith.mulf %432, %436 : vector<8x32xf32>
    %cst_120 = arith.constant dense<0.000000e+00> : vector<8x128xf32>
    %438 = tpu.matmul %349, %47, %cst_120 {dimension_numbers = #tpu.dot_dimension_numbers<[1], [0], [0], [1], [0, 0, 1, 1], [], []>} : vector<8x32xf32>, vector<32x128xf32>, vector<8x128xf32> -> vector<8x128xf32>
    %cst_121 = arith.constant dense<0.000000e+00> : vector<8x128xf32>
    %439 = tpu.matmul %378, %48, %cst_121 {dimension_numbers = #tpu.dot_dimension_numbers<[1], [0], [0], [1], [0, 0, 1, 1], [], []>} : vector<8x32xf32>, vector<32x128xf32>, vector<8x128xf32> -> vector<8x128xf32>
    %440 = arith.addf %438, %439 : vector<8x128xf32>
    %441 = arith.addf %440, %53 : vector<8x128xf32>
    %442 = vector.extract_strided_slice %441 {offsets = [0, 0], sizes = [8, 32], strides = [1, 1]} : vector<8x128xf32> to vector<8x32xf32>
    %443 = arith.negf %442 : vector<8x32xf32>
    %444 = math.exp %443 : vector<8x32xf32>
    %cst_122 = arith.constant 1.000000e+00 : f32
    %445 = vector.broadcast %cst_122 : f32 to vector<8x32xf32>
    %446 = arith.addf %445, %444 : vector<8x32xf32>
    %447 = arith.divf %445, %446 : vector<8x32xf32>
    %448 = vector.extract_strided_slice %441 {offsets = [0, 32], sizes = [8, 32], strides = [1, 1]} : vector<8x128xf32> to vector<8x32xf32>
    %449 = arith.negf %448 : vector<8x32xf32>
    %450 = math.exp %449 : vector<8x32xf32>
    %cst_123 = arith.constant 1.000000e+00 : f32
    %451 = vector.broadcast %cst_123 : f32 to vector<8x32xf32>
    %452 = arith.addf %451, %450 : vector<8x32xf32>
    %453 = arith.divf %451, %452 : vector<8x32xf32>
    %454 = vector.extract_strided_slice %441 {offsets = [0, 64], sizes = [8, 32], strides = [1, 1]} : vector<8x128xf32> to vector<8x32xf32>
    %455 = math.tanh %454 : vector<8x32xf32>
    %456 = vector.extract_strided_slice %441 {offsets = [0, 96], sizes = [8, 32], strides = [1, 1]} : vector<8x128xf32> to vector<8x32xf32>
    %457 = arith.negf %456 : vector<8x32xf32>
    %458 = math.exp %457 : vector<8x32xf32>
    %cst_124 = arith.constant 1.000000e+00 : f32
    %459 = vector.broadcast %cst_124 : f32 to vector<8x32xf32>
    %460 = arith.addf %459, %458 : vector<8x32xf32>
    %461 = arith.divf %459, %460 : vector<8x32xf32>
    %462 = arith.mulf %453, %376 : vector<8x32xf32>
    %463 = arith.mulf %447, %455 : vector<8x32xf32>
    %464 = arith.addf %462, %463 : vector<8x32xf32>
    %465 = math.tanh %464 : vector<8x32xf32>
    %466 = arith.mulf %461, %465 : vector<8x32xf32>
    %cst_125 = arith.constant dense<0.000000e+00> : vector<8x128xf32>
    %467 = tpu.matmul %378, %49, %cst_125 {dimension_numbers = #tpu.dot_dimension_numbers<[1], [0], [0], [1], [0, 0, 1, 1], [], []>} : vector<8x32xf32>, vector<32x128xf32>, vector<8x128xf32> -> vector<8x128xf32>
    %cst_126 = arith.constant dense<0.000000e+00> : vector<8x128xf32>
    %468 = tpu.matmul %407, %50, %cst_126 {dimension_numbers = #tpu.dot_dimension_numbers<[1], [0], [0], [1], [0, 0, 1, 1], [], []>} : vector<8x32xf32>, vector<32x128xf32>, vector<8x128xf32> -> vector<8x128xf32>
    %469 = arith.addf %467, %468 : vector<8x128xf32>
    %470 = arith.addf %469, %56 : vector<8x128xf32>
    %471 = vector.extract_strided_slice %470 {offsets = [0, 0], sizes = [8, 32], strides = [1, 1]} : vector<8x128xf32> to vector<8x32xf32>
    %472 = arith.negf %471 : vector<8x32xf32>
    %473 = math.exp %472 : vector<8x32xf32>
    %cst_127 = arith.constant 1.000000e+00 : f32
    %474 = vector.broadcast %cst_127 : f32 to vector<8x32xf32>
    %475 = arith.addf %474, %473 : vector<8x32xf32>
    %476 = arith.divf %474, %475 : vector<8x32xf32>
    %477 = vector.extract_strided_slice %470 {offsets = [0, 32], sizes = [8, 32], strides = [1, 1]} : vector<8x128xf32> to vector<8x32xf32>
    %478 = arith.negf %477 : vector<8x32xf32>
    %479 = math.exp %478 : vector<8x32xf32>
    %cst_128 = arith.constant 1.000000e+00 : f32
    %480 = vector.broadcast %cst_128 : f32 to vector<8x32xf32>
    %481 = arith.addf %480, %479 : vector<8x32xf32>
    %482 = arith.divf %480, %481 : vector<8x32xf32>
    %483 = vector.extract_strided_slice %470 {offsets = [0, 64], sizes = [8, 32], strides = [1, 1]} : vector<8x128xf32> to vector<8x32xf32>
    %484 = math.tanh %483 : vector<8x32xf32>
    %485 = vector.extract_strided_slice %470 {offsets = [0, 96], sizes = [8, 32], strides = [1, 1]} : vector<8x128xf32> to vector<8x32xf32>
    %486 = arith.negf %485 : vector<8x32xf32>
    %487 = math.exp %486 : vector<8x32xf32>
    %cst_129 = arith.constant 1.000000e+00 : f32
    %488 = vector.broadcast %cst_129 : f32 to vector<8x32xf32>
    %489 = arith.addf %488, %487 : vector<8x32xf32>
    %490 = arith.divf %488, %489 : vector<8x32xf32>
    %491 = arith.mulf %482, %405 : vector<8x32xf32>
    %492 = arith.mulf %476, %484 : vector<8x32xf32>
    %493 = arith.addf %491, %492 : vector<8x32xf32>
    %494 = math.tanh %493 : vector<8x32xf32>
    %495 = arith.mulf %490, %494 : vector<8x32xf32>
    %c24 = arith.constant 24 : index
    %c0_130 = arith.constant 0 : index
    %496 = vector.load %arg25[%c24, %c0_130] : memref<64x32xf32, #tpu.memory_space<vmem>>, vector<8x32xf32>
    tpu.vector_store %arg25[%c24, %c0_130], %495 {strides = array<i32>} : memref<64x32xf32, #tpu.memory_space<vmem>>, vector<8x32xf32>,
    %497 = vector.extract_strided_slice %45 {offsets = [48, 0], sizes = [8, 128], strides = [1, 1]} : vector<64x128xf32> to vector<8x128xf32>
    %498 = arith.addf %497, %42 : vector<8x128xf32>
    %cst_131 = arith.constant dense<0.000000e+00> : vector<8x128xf32>
    %499 = tpu.matmul %437, %46, %cst_131 {dimension_numbers = #tpu.dot_dimension_numbers<[1], [0], [0], [1], [0, 0, 1, 1], [], []>} : vector<8x32xf32>, vector<32x128xf32>, vector<8x128xf32> -> vector<8x128xf32>
    %500 = arith.addf %498, %499 : vector<8x128xf32>
    %501 = vector.extract_strided_slice %500 {offsets = [0, 0], sizes = [8, 32], strides = [1, 1]} : vector<8x128xf32> to vector<8x32xf32>
    %502 = arith.negf %501 : vector<8x32xf32>
    %503 = math.exp %502 : vector<8x32xf32>
    %cst_132 = arith.constant 1.000000e+00 : f32
    %504 = vector.broadcast %cst_132 : f32 to vector<8x32xf32>
    %505 = arith.addf %504, %503 : vector<8x32xf32>
    %506 = arith.divf %504, %505 : vector<8x32xf32>
    %507 = vector.extract_strided_slice %500 {offsets = [0, 32], sizes = [8, 32], strides = [1, 1]} : vector<8x128xf32> to vector<8x32xf32>
    %508 = arith.negf %507 : vector<8x32xf32>
    %509 = math.exp %508 : vector<8x32xf32>
    %cst_133 = arith.constant 1.000000e+00 : f32
    %510 = vector.broadcast %cst_133 : f32 to vector<8x32xf32>
    %511 = arith.addf %510, %509 : vector<8x32xf32>
    %512 = arith.divf %510, %511 : vector<8x32xf32>
    %513 = vector.extract_strided_slice %500 {offsets = [0, 64], sizes = [8, 32], strides = [1, 1]} : vector<8x128xf32> to vector<8x32xf32>
    %514 = math.tanh %513 : vector<8x32xf32>
    %515 = vector.extract_strided_slice %500 {offsets = [0, 96], sizes = [8, 32], strides = [1, 1]} : vector<8x128xf32> to vector<8x32xf32>
    %516 = arith.negf %515 : vector<8x32xf32>
    %517 = math.exp %516 : vector<8x32xf32>
    %cst_134 = arith.constant 1.000000e+00 : f32
    %518 = vector.broadcast %cst_134 : f32 to vector<8x32xf32>
    %519 = arith.addf %518, %517 : vector<8x32xf32>
    %520 = arith.divf %518, %519 : vector<8x32xf32>
    %521 = arith.mulf %512, %435 : vector<8x32xf32>
    %522 = arith.mulf %506, %514 : vector<8x32xf32>
    %523 = arith.addf %521, %522 : vector<8x32xf32>
    %524 = math.tanh %523 : vector<8x32xf32>
    %525 = arith.mulf %520, %524 : vector<8x32xf32>
    %cst_135 = arith.constant dense<0.000000e+00> : vector<8x128xf32>
    %526 = tpu.matmul %437, %47, %cst_135 {dimension_numbers = #tpu.dot_dimension_numbers<[1], [0], [0], [1], [0, 0, 1, 1], [], []>} : vector<8x32xf32>, vector<32x128xf32>, vector<8x128xf32> -> vector<8x128xf32>
    %cst_136 = arith.constant dense<0.000000e+00> : vector<8x128xf32>
    %527 = tpu.matmul %466, %48, %cst_136 {dimension_numbers = #tpu.dot_dimension_numbers<[1], [0], [0], [1], [0, 0, 1, 1], [], []>} : vector<8x32xf32>, vector<32x128xf32>, vector<8x128xf32> -> vector<8x128xf32>
    %528 = arith.addf %526, %527 : vector<8x128xf32>
    %529 = arith.addf %528, %53 : vector<8x128xf32>
    %530 = vector.extract_strided_slice %529 {offsets = [0, 0], sizes = [8, 32], strides = [1, 1]} : vector<8x128xf32> to vector<8x32xf32>
    %531 = arith.negf %530 : vector<8x32xf32>
    %532 = math.exp %531 : vector<8x32xf32>
    %cst_137 = arith.constant 1.000000e+00 : f32
    %533 = vector.broadcast %cst_137 : f32 to vector<8x32xf32>
    %534 = arith.addf %533, %532 : vector<8x32xf32>
    %535 = arith.divf %533, %534 : vector<8x32xf32>
    %536 = vector.extract_strided_slice %529 {offsets = [0, 32], sizes = [8, 32], strides = [1, 1]} : vector<8x128xf32> to vector<8x32xf32>
    %537 = arith.negf %536 : vector<8x32xf32>
    %538 = math.exp %537 : vector<8x32xf32>
    %cst_138 = arith.constant 1.000000e+00 : f32
    %539 = vector.broadcast %cst_138 : f32 to vector<8x32xf32>
    %540 = arith.addf %539, %538 : vector<8x32xf32>
    %541 = arith.divf %539, %540 : vector<8x32xf32>
    %542 = vector.extract_strided_slice %529 {offsets = [0, 64], sizes = [8, 32], strides = [1, 1]} : vector<8x128xf32> to vector<8x32xf32>
    %543 = math.tanh %542 : vector<8x32xf32>
    %544 = vector.extract_strided_slice %529 {offsets = [0, 96], sizes = [8, 32], strides = [1, 1]} : vector<8x128xf32> to vector<8x32xf32>
    %545 = arith.negf %544 : vector<8x32xf32>
    %546 = math.exp %545 : vector<8x32xf32>
    %cst_139 = arith.constant 1.000000e+00 : f32
    %547 = vector.broadcast %cst_139 : f32 to vector<8x32xf32>
    %548 = arith.addf %547, %546 : vector<8x32xf32>
    %549 = arith.divf %547, %548 : vector<8x32xf32>
    %550 = arith.mulf %541, %464 : vector<8x32xf32>
    %551 = arith.mulf %535, %543 : vector<8x32xf32>
    %552 = arith.addf %550, %551 : vector<8x32xf32>
    %553 = math.tanh %552 : vector<8x32xf32>
    %554 = arith.mulf %549, %553 : vector<8x32xf32>
    %cst_140 = arith.constant dense<0.000000e+00> : vector<8x128xf32>
    %555 = tpu.matmul %466, %49, %cst_140 {dimension_numbers = #tpu.dot_dimension_numbers<[1], [0], [0], [1], [0, 0, 1, 1], [], []>} : vector<8x32xf32>, vector<32x128xf32>, vector<8x128xf32> -> vector<8x128xf32>
    %cst_141 = arith.constant dense<0.000000e+00> : vector<8x128xf32>
    %556 = tpu.matmul %495, %50, %cst_141 {dimension_numbers = #tpu.dot_dimension_numbers<[1], [0], [0], [1], [0, 0, 1, 1], [], []>} : vector<8x32xf32>, vector<32x128xf32>, vector<8x128xf32> -> vector<8x128xf32>
    %557 = arith.addf %555, %556 : vector<8x128xf32>
    %558 = arith.addf %557, %56 : vector<8x128xf32>
    %559 = vector.extract_strided_slice %558 {offsets = [0, 0], sizes = [8, 32], strides = [1, 1]} : vector<8x128xf32> to vector<8x32xf32>
    %560 = arith.negf %559 : vector<8x32xf32>
    %561 = math.exp %560 : vector<8x32xf32>
    %cst_142 = arith.constant 1.000000e+00 : f32
    %562 = vector.broadcast %cst_142 : f32 to vector<8x32xf32>
    %563 = arith.addf %562, %561 : vector<8x32xf32>
    %564 = arith.divf %562, %563 : vector<8x32xf32>
    %565 = vector.extract_strided_slice %558 {offsets = [0, 32], sizes = [8, 32], strides = [1, 1]} : vector<8x128xf32> to vector<8x32xf32>
    %566 = arith.negf %565 : vector<8x32xf32>
    %567 = math.exp %566 : vector<8x32xf32>
    %cst_143 = arith.constant 1.000000e+00 : f32
    %568 = vector.broadcast %cst_143 : f32 to vector<8x32xf32>
    %569 = arith.addf %568, %567 : vector<8x32xf32>
    %570 = arith.divf %568, %569 : vector<8x32xf32>
    %571 = vector.extract_strided_slice %558 {offsets = [0, 64], sizes = [8, 32], strides = [1, 1]} : vector<8x128xf32> to vector<8x32xf32>
    %572 = math.tanh %571 : vector<8x32xf32>
    %573 = vector.extract_strided_slice %558 {offsets = [0, 96], sizes = [8, 32], strides = [1, 1]} : vector<8x128xf32> to vector<8x32xf32>
    %574 = arith.negf %573 : vector<8x32xf32>
    %575 = math.exp %574 : vector<8x32xf32>
    %cst_144 = arith.constant 1.000000e+00 : f32
    %576 = vector.broadcast %cst_144 : f32 to vector<8x32xf32>
    %577 = arith.addf %576, %575 : vector<8x32xf32>
    %578 = arith.divf %576, %577 : vector<8x32xf32>
    %579 = arith.mulf %570, %493 : vector<8x32xf32>
    %580 = arith.mulf %564, %572 : vector<8x32xf32>
    %581 = arith.addf %579, %580 : vector<8x32xf32>
    %582 = math.tanh %581 : vector<8x32xf32>
    %583 = arith.mulf %578, %582 : vector<8x32xf32>
    %c32_145 = arith.constant 32 : index
    %c0_146 = arith.constant 0 : index
    %584 = vector.load %arg25[%c32_145, %c0_146] : memref<64x32xf32, #tpu.memory_space<vmem>>, vector<8x32xf32>
    tpu.vector_store %arg25[%c32_145, %c0_146], %583 {strides = array<i32>} : memref<64x32xf32, #tpu.memory_space<vmem>>, vector<8x32xf32>,
    %585 = vector.extract_strided_slice %45 {offsets = [56, 0], sizes = [8, 128], strides = [1, 1]} : vector<64x128xf32> to vector<8x128xf32>
    %586 = arith.addf %585, %42 : vector<8x128xf32>
    %cst_147 = arith.constant dense<0.000000e+00> : vector<8x128xf32>
    %587 = tpu.matmul %525, %46, %cst_147 {dimension_numbers = #tpu.dot_dimension_numbers<[1], [0], [0], [1], [0, 0, 1, 1], [], []>} : vector<8x32xf32>, vector<32x128xf32>, vector<8x128xf32> -> vector<8x128xf32>
    %588 = arith.addf %586, %587 : vector<8x128xf32>
    %589 = vector.extract_strided_slice %588 {offsets = [0, 0], sizes = [8, 32], strides = [1, 1]} : vector<8x128xf32> to vector<8x32xf32>
    %590 = arith.negf %589 : vector<8x32xf32>
    %591 = math.exp %590 : vector<8x32xf32>
    %cst_148 = arith.constant 1.000000e+00 : f32
    %592 = vector.broadcast %cst_148 : f32 to vector<8x32xf32>
    %593 = arith.addf %592, %591 : vector<8x32xf32>
    %594 = arith.divf %592, %593 : vector<8x32xf32>
    %595 = vector.extract_strided_slice %588 {offsets = [0, 32], sizes = [8, 32], strides = [1, 1]} : vector<8x128xf32> to vector<8x32xf32>
    %596 = arith.negf %595 : vector<8x32xf32>
    %597 = math.exp %596 : vector<8x32xf32>
    %cst_149 = arith.constant 1.000000e+00 : f32
    %598 = vector.broadcast %cst_149 : f32 to vector<8x32xf32>
    %599 = arith.addf %598, %597 : vector<8x32xf32>
    %600 = arith.divf %598, %599 : vector<8x32xf32>
    %601 = vector.extract_strided_slice %588 {offsets = [0, 64], sizes = [8, 32], strides = [1, 1]} : vector<8x128xf32> to vector<8x32xf32>
    %602 = math.tanh %601 : vector<8x32xf32>
    %603 = vector.extract_strided_slice %588 {offsets = [0, 96], sizes = [8, 32], strides = [1, 1]} : vector<8x128xf32> to vector<8x32xf32>
    %604 = arith.negf %603 : vector<8x32xf32>
    %605 = math.exp %604 : vector<8x32xf32>
    %cst_150 = arith.constant 1.000000e+00 : f32
    %606 = vector.broadcast %cst_150 : f32 to vector<8x32xf32>
    %607 = arith.addf %606, %605 : vector<8x32xf32>
    %608 = arith.divf %606, %607 : vector<8x32xf32>
    %609 = arith.mulf %600, %523 : vector<8x32xf32>
    %610 = arith.mulf %594, %602 : vector<8x32xf32>
    %611 = arith.addf %609, %610 : vector<8x32xf32>
    %612 = math.tanh %611 : vector<8x32xf32>
    %613 = arith.mulf %608, %612 : vector<8x32xf32>
    %cst_151 = arith.constant dense<0.000000e+00> : vector<8x128xf32>
    %614 = tpu.matmul %525, %47, %cst_151 {dimension_numbers = #tpu.dot_dimension_numbers<[1], [0], [0], [1], [0, 0, 1, 1], [], []>} : vector<8x32xf32>, vector<32x128xf32>, vector<8x128xf32> -> vector<8x128xf32>
    %cst_152 = arith.constant dense<0.000000e+00> : vector<8x128xf32>
    %615 = tpu.matmul %554, %48, %cst_152 {dimension_numbers = #tpu.dot_dimension_numbers<[1], [0], [0], [1], [0, 0, 1, 1], [], []>} : vector<8x32xf32>, vector<32x128xf32>, vector<8x128xf32> -> vector<8x128xf32>
    %616 = arith.addf %614, %615 : vector<8x128xf32>
    %617 = arith.addf %616, %53 : vector<8x128xf32>
    %618 = vector.extract_strided_slice %617 {offsets = [0, 0], sizes = [8, 32], strides = [1, 1]} : vector<8x128xf32> to vector<8x32xf32>
    %619 = arith.negf %618 : vector<8x32xf32>
    %620 = math.exp %619 : vector<8x32xf32>
    %cst_153 = arith.constant 1.000000e+00 : f32
    %621 = vector.broadcast %cst_153 : f32 to vector<8x32xf32>
    %622 = arith.addf %621, %620 : vector<8x32xf32>
    %623 = arith.divf %621, %622 : vector<8x32xf32>
    %624 = vector.extract_strided_slice %617 {offsets = [0, 32], sizes = [8, 32], strides = [1, 1]} : vector<8x128xf32> to vector<8x32xf32>
    %625 = arith.negf %624 : vector<8x32xf32>
    %626 = math.exp %625 : vector<8x32xf32>
    %cst_154 = arith.constant 1.000000e+00 : f32
    %627 = vector.broadcast %cst_154 : f32 to vector<8x32xf32>
    %628 = arith.addf %627, %626 : vector<8x32xf32>
    %629 = arith.divf %627, %628 : vector<8x32xf32>
    %630 = vector.extract_strided_slice %617 {offsets = [0, 64], sizes = [8, 32], strides = [1, 1]} : vector<8x128xf32> to vector<8x32xf32>
    %631 = math.tanh %630 : vector<8x32xf32>
    %632 = vector.extract_strided_slice %617 {offsets = [0, 96], sizes = [8, 32], strides = [1, 1]} : vector<8x128xf32> to vector<8x32xf32>
    %633 = arith.negf %632 : vector<8x32xf32>
    %634 = math.exp %633 : vector<8x32xf32>
    %cst_155 = arith.constant 1.000000e+00 : f32
    %635 = vector.broadcast %cst_155 : f32 to vector<8x32xf32>
    %636 = arith.addf %635, %634 : vector<8x32xf32>
    %637 = arith.divf %635, %636 : vector<8x32xf32>
    %638 = arith.mulf %629, %552 : vector<8x32xf32>
    %639 = arith.mulf %623, %631 : vector<8x32xf32>
    %640 = arith.addf %638, %639 : vector<8x32xf32>
    %641 = math.tanh %640 : vector<8x32xf32>
    %642 = arith.mulf %637, %641 : vector<8x32xf32>
    %cst_156 = arith.constant dense<0.000000e+00> : vector<8x128xf32>
    %643 = tpu.matmul %554, %49, %cst_156 {dimension_numbers = #tpu.dot_dimension_numbers<[1], [0], [0], [1], [0, 0, 1, 1], [], []>} : vector<8x32xf32>, vector<32x128xf32>, vector<8x128xf32> -> vector<8x128xf32>
    %cst_157 = arith.constant dense<0.000000e+00> : vector<8x128xf32>
    %644 = tpu.matmul %583, %50, %cst_157 {dimension_numbers = #tpu.dot_dimension_numbers<[1], [0], [0], [1], [0, 0, 1, 1], [], []>} : vector<8x32xf32>, vector<32x128xf32>, vector<8x128xf32> -> vector<8x128xf32>
    %645 = arith.addf %643, %644 : vector<8x128xf32>
    %646 = arith.addf %645, %56 : vector<8x128xf32>
    %647 = vector.extract_strided_slice %646 {offsets = [0, 0], sizes = [8, 32], strides = [1, 1]} : vector<8x128xf32> to vector<8x32xf32>
    %648 = arith.negf %647 : vector<8x32xf32>
    %649 = math.exp %648 : vector<8x32xf32>
    %cst_158 = arith.constant 1.000000e+00 : f32
    %650 = vector.broadcast %cst_158 : f32 to vector<8x32xf32>
    %651 = arith.addf %650, %649 : vector<8x32xf32>
    %652 = arith.divf %650, %651 : vector<8x32xf32>
    %653 = vector.extract_strided_slice %646 {offsets = [0, 32], sizes = [8, 32], strides = [1, 1]} : vector<8x128xf32> to vector<8x32xf32>
    %654 = arith.negf %653 : vector<8x32xf32>
    %655 = math.exp %654 : vector<8x32xf32>
    %cst_159 = arith.constant 1.000000e+00 : f32
    %656 = vector.broadcast %cst_159 : f32 to vector<8x32xf32>
    %657 = arith.addf %656, %655 : vector<8x32xf32>
    %658 = arith.divf %656, %657 : vector<8x32xf32>
    %659 = vector.extract_strided_slice %646 {offsets = [0, 64], sizes = [8, 32], strides = [1, 1]} : vector<8x128xf32> to vector<8x32xf32>
    %660 = math.tanh %659 : vector<8x32xf32>
    %661 = vector.extract_strided_slice %646 {offsets = [0, 96], sizes = [8, 32], strides = [1, 1]} : vector<8x128xf32> to vector<8x32xf32>
    %662 = arith.negf %661 : vector<8x32xf32>
    %663 = math.exp %662 : vector<8x32xf32>
    %cst_160 = arith.constant 1.000000e+00 : f32
    %664 = vector.broadcast %cst_160 : f32 to vector<8x32xf32>
    %665 = arith.addf %664, %663 : vector<8x32xf32>
    %666 = arith.divf %664, %665 : vector<8x32xf32>
    %667 = arith.mulf %658, %581 : vector<8x32xf32>
    %668 = arith.mulf %652, %660 : vector<8x32xf32>
    %669 = arith.addf %667, %668 : vector<8x32xf32>
    %670 = math.tanh %669 : vector<8x32xf32>
    %671 = arith.mulf %666, %670 : vector<8x32xf32>
    %c40 = arith.constant 40 : index
    %c0_161 = arith.constant 0 : index
    %672 = vector.load %arg25[%c40, %c0_161] : memref<64x32xf32, #tpu.memory_space<vmem>>, vector<8x32xf32>
    tpu.vector_store %arg25[%c40, %c0_161], %671 {strides = array<i32>} : memref<64x32xf32, #tpu.memory_space<vmem>>, vector<8x32xf32>,
    %cst_162 = arith.constant dense<0.000000e+00> : vector<8x128xf32>
    %673 = tpu.matmul %613, %47, %cst_162 {dimension_numbers = #tpu.dot_dimension_numbers<[1], [0], [0], [1], [0, 0, 1, 1], [], []>} : vector<8x32xf32>, vector<32x128xf32>, vector<8x128xf32> -> vector<8x128xf32>
    %cst_163 = arith.constant dense<0.000000e+00> : vector<8x128xf32>
    %674 = tpu.matmul %642, %48, %cst_163 {dimension_numbers = #tpu.dot_dimension_numbers<[1], [0], [0], [1], [0, 0, 1, 1], [], []>} : vector<8x32xf32>, vector<32x128xf32>, vector<8x128xf32> -> vector<8x128xf32>
    %675 = arith.addf %673, %674 : vector<8x128xf32>
    %676 = arith.addf %675, %53 : vector<8x128xf32>
    %677 = vector.extract_strided_slice %676 {offsets = [0, 0], sizes = [8, 32], strides = [1, 1]} : vector<8x128xf32> to vector<8x32xf32>
    %678 = arith.negf %677 : vector<8x32xf32>
    %679 = math.exp %678 : vector<8x32xf32>
    %cst_164 = arith.constant 1.000000e+00 : f32
    %680 = vector.broadcast %cst_164 : f32 to vector<8x32xf32>
    %681 = arith.addf %680, %679 : vector<8x32xf32>
    %682 = arith.divf %680, %681 : vector<8x32xf32>
    %683 = vector.extract_strided_slice %676 {offsets = [0, 32], sizes = [8, 32], strides = [1, 1]} : vector<8x128xf32> to vector<8x32xf32>
    %684 = arith.negf %683 : vector<8x32xf32>
    %685 = math.exp %684 : vector<8x32xf32>
    %cst_165 = arith.constant 1.000000e+00 : f32
    %686 = vector.broadcast %cst_165 : f32 to vector<8x32xf32>
    %687 = arith.addf %686, %685 : vector<8x32xf32>
    %688 = arith.divf %686, %687 : vector<8x32xf32>
    %689 = vector.extract_strided_slice %676 {offsets = [0, 64], sizes = [8, 32], strides = [1, 1]} : vector<8x128xf32> to vector<8x32xf32>
    %690 = math.tanh %689 : vector<8x32xf32>
    %691 = vector.extract_strided_slice %676 {offsets = [0, 96], sizes = [8, 32], strides = [1, 1]} : vector<8x128xf32> to vector<8x32xf32>
    %692 = arith.negf %691 : vector<8x32xf32>
    %693 = math.exp %692 : vector<8x32xf32>
    %cst_166 = arith.constant 1.000000e+00 : f32
    %694 = vector.broadcast %cst_166 : f32 to vector<8x32xf32>
    %695 = arith.addf %694, %693 : vector<8x32xf32>
    %696 = arith.divf %694, %695 : vector<8x32xf32>
    %697 = arith.mulf %688, %640 : vector<8x32xf32>
    %698 = arith.mulf %682, %690 : vector<8x32xf32>
    %699 = arith.addf %697, %698 : vector<8x32xf32>
    %700 = math.tanh %699 : vector<8x32xf32>
    %701 = arith.mulf %696, %700 : vector<8x32xf32>
    %cst_167 = arith.constant dense<0.000000e+00> : vector<8x128xf32>
    %702 = tpu.matmul %642, %49, %cst_167 {dimension_numbers = #tpu.dot_dimension_numbers<[1], [0], [0], [1], [0, 0, 1, 1], [], []>} : vector<8x32xf32>, vector<32x128xf32>, vector<8x128xf32> -> vector<8x128xf32>
    %cst_168 = arith.constant dense<0.000000e+00> : vector<8x128xf32>
    %703 = tpu.matmul %671, %50, %cst_168 {dimension_numbers = #tpu.dot_dimension_numbers<[1], [0], [0], [1], [0, 0, 1, 1], [], []>} : vector<8x32xf32>, vector<32x128xf32>, vector<8x128xf32> -> vector<8x128xf32>
    %704 = arith.addf %702, %703 : vector<8x128xf32>
    %705 = arith.addf %704, %56 : vector<8x128xf32>
    %706 = vector.extract_strided_slice %705 {offsets = [0, 0], sizes = [8, 32], strides = [1, 1]} : vector<8x128xf32> to vector<8x32xf32>
    %707 = arith.negf %706 : vector<8x32xf32>
    %708 = math.exp %707 : vector<8x32xf32>
    %cst_169 = arith.constant 1.000000e+00 : f32
    %709 = vector.broadcast %cst_169 : f32 to vector<8x32xf32>
    %710 = arith.addf %709, %708 : vector<8x32xf32>
    %711 = arith.divf %709, %710 : vector<8x32xf32>
    %712 = vector.extract_strided_slice %705 {offsets = [0, 32], sizes = [8, 32], strides = [1, 1]} : vector<8x128xf32> to vector<8x32xf32>
    %713 = arith.negf %712 : vector<8x32xf32>
    %714 = math.exp %713 : vector<8x32xf32>
    %cst_170 = arith.constant 1.000000e+00 : f32
    %715 = vector.broadcast %cst_170 : f32 to vector<8x32xf32>
    %716 = arith.addf %715, %714 : vector<8x32xf32>
    %717 = arith.divf %715, %716 : vector<8x32xf32>
    %718 = vector.extract_strided_slice %705 {offsets = [0, 64], sizes = [8, 32], strides = [1, 1]} : vector<8x128xf32> to vector<8x32xf32>
    %719 = math.tanh %718 : vector<8x32xf32>
    %720 = vector.extract_strided_slice %705 {offsets = [0, 96], sizes = [8, 32], strides = [1, 1]} : vector<8x128xf32> to vector<8x32xf32>
    %721 = arith.negf %720 : vector<8x32xf32>
    %722 = math.exp %721 : vector<8x32xf32>
    %cst_171 = arith.constant 1.000000e+00 : f32
    %723 = vector.broadcast %cst_171 : f32 to vector<8x32xf32>
    %724 = arith.addf %723, %722 : vector<8x32xf32>
    %725 = arith.divf %723, %724 : vector<8x32xf32>
    %726 = arith.mulf %717, %669 : vector<8x32xf32>
    %727 = arith.mulf %711, %719 : vector<8x32xf32>
    %728 = arith.addf %726, %727 : vector<8x32xf32>
    %729 = math.tanh %728 : vector<8x32xf32>
    %730 = arith.mulf %725, %729 : vector<8x32xf32>
    %c48 = arith.constant 48 : index
    %c0_172 = arith.constant 0 : index
    %731 = vector.load %arg25[%c48, %c0_172] : memref<64x32xf32, #tpu.memory_space<vmem>>, vector<8x32xf32>
    tpu.vector_store %arg25[%c48, %c0_172], %730 {strides = array<i32>} : memref<64x32xf32, #tpu.memory_space<vmem>>, vector<8x32xf32>,
    %cst_173 = arith.constant dense<0.000000e+00> : vector<8x128xf32>
    %732 = tpu.matmul %701, %49, %cst_173 {dimension_numbers = #tpu.dot_dimension_numbers<[1], [0], [0], [1], [0, 0, 1, 1], [], []>} : vector<8x32xf32>, vector<32x128xf32>, vector<8x128xf32> -> vector<8x128xf32>
    %cst_174 = arith.constant dense<0.000000e+00> : vector<8x128xf32>
    %733 = tpu.matmul %730, %50, %cst_174 {dimension_numbers = #tpu.dot_dimension_numbers<[1], [0], [0], [1], [0, 0, 1, 1], [], []>} : vector<8x32xf32>, vector<32x128xf32>, vector<8x128xf32> -> vector<8x128xf32>
    %734 = arith.addf %732, %733 : vector<8x128xf32>
    %735 = arith.addf %734, %56 : vector<8x128xf32>
    %736 = vector.extract_strided_slice %735 {offsets = [0, 0], sizes = [8, 32], strides = [1, 1]} : vector<8x128xf32> to vector<8x32xf32>
    %737 = arith.negf %736 : vector<8x32xf32>
    %738 = math.exp %737 : vector<8x32xf32>
    %cst_175 = arith.constant 1.000000e+00 : f32
    %739 = vector.broadcast %cst_175 : f32 to vector<8x32xf32>
    %740 = arith.addf %739, %738 : vector<8x32xf32>
    %741 = arith.divf %739, %740 : vector<8x32xf32>
    %742 = vector.extract_strided_slice %735 {offsets = [0, 32], sizes = [8, 32], strides = [1, 1]} : vector<8x128xf32> to vector<8x32xf32>
    %743 = arith.negf %742 : vector<8x32xf32>
    %744 = math.exp %743 : vector<8x32xf32>
    %cst_176 = arith.constant 1.000000e+00 : f32
    %745 = vector.broadcast %cst_176 : f32 to vector<8x32xf32>
    %746 = arith.addf %745, %744 : vector<8x32xf32>
    %747 = arith.divf %745, %746 : vector<8x32xf32>
    %748 = vector.extract_strided_slice %735 {offsets = [0, 64], sizes = [8, 32], strides = [1, 1]} : vector<8x128xf32> to vector<8x32xf32>
    %749 = math.tanh %748 : vector<8x32xf32>
    %750 = vector.extract_strided_slice %735 {offsets = [0, 96], sizes = [8, 32], strides = [1, 1]} : vector<8x128xf32> to vector<8x32xf32>
    %751 = arith.negf %750 : vector<8x32xf32>
    %752 = math.exp %751 : vector<8x32xf32>
    %cst_177 = arith.constant 1.000000e+00 : f32
    %753 = vector.broadcast %cst_177 : f32 to vector<8x32xf32>
    %754 = arith.addf %753, %752 : vector<8x32xf32>
    %755 = arith.divf %753, %754 : vector<8x32xf32>
    %756 = arith.mulf %747, %728 : vector<8x32xf32>
    %757 = arith.mulf %741, %749 : vector<8x32xf32>
    %758 = arith.addf %756, %757 : vector<8x32xf32>
    %759 = math.tanh %758 : vector<8x32xf32>
    %760 = arith.mulf %755, %759 : vector<8x32xf32>
    %c56 = arith.constant 56 : index
    %c0_178 = arith.constant 0 : index
    %761 = vector.load %arg25[%c56, %c0_178] : memref<64x32xf32, #tpu.memory_space<vmem>>, vector<8x32xf32>
    tpu.vector_store %arg25[%c56, %c0_178], %760 {strides = array<i32>} : memref<64x32xf32, #tpu.memory_space<vmem>>, vector<8x32xf32>,
    %c0_179 = arith.constant 0 : index
    %c0_180 = arith.constant 0 : index
    %762 = vector.load %arg25[%c0_179, %c0_180] : memref<64x32xf32, #tpu.memory_space<vmem>>, vector<64x32xf32>
    %c0_181 = arith.constant 0 : index
    %c0_182 = arith.constant 0 : index
    %763 = vector.load %arg22[%c0_181, %c0_182] : memref<32x128xf32, #tpu.memory_space<vmem>>, vector<32x128xf32>
    %cst_183 = arith.constant dense<0.000000e+00> : vector<64x128xf32>
    %764 = tpu.matmul %762, %763, %cst_183 {dimension_numbers = #tpu.dot_dimension_numbers<[1], [0], [0], [1], [0, 0, 1, 1], [], []>} : vector<64x32xf32>, vector<32x128xf32>, vector<64x128xf32> -> vector<64x128xf32>
    %c0_184 = arith.constant 0 : index
    %c0_185 = arith.constant 0 : index
    %765 = vector.load %arg23[%c0_184, %c0_185] : memref<1x128xf32, #tpu.memory_space<vmem>>, vector<1x128xf32>
    %766 = vector.broadcast %765 : vector<1x128xf32> to vector<64x128xf32>
    %767 = arith.addf %764, %766 : vector<64x128xf32>
    %c0_186 = arith.constant 0 : index
    %c0_187 = arith.constant 0 : index
    %768 = vector.load %arg24[%c0_186, %c0_187] : memref<64x128xf32, #tpu.memory_space<vmem>>, vector<64x128xf32>
    tpu.vector_store %arg24[%c0_186, %c0_187], %767 {strides = array<i32>} : memref<64x128xf32, #tpu.memory_space<vmem>>, vector<64x128xf32>,
    return
  }
}

</mosaic_0001>

<bundles_post_ra>
// kernel: vqa_forward.1
= control target key start
LH: loop header
LB: loop body
LE: loop exit
PB: predicated region body
PF: predicated region fallthrough
CT: control target
= control target key end

     0   :  { %vm269_vm0 = vcmask 7168   ;;  %v2925_v0 = vmov 0   ;;  %vm212_vm1 = vcmask 392192   ;;  %vm87_vm2 = vcmask 1043456   ;;  %s3966_s6 = inlined_call_operand.vmem [shape: f32[8,8,1], index: 6, kind: input, shape index: {}]   ;;  %s3967_s2 = inlined_call_operand.vmem [shape: f32[1,64], index: 2, kind: input, shape index: {}]   ;;  %s3968_s5 = inlined_call_operand.vmem [shape: f32[8,8,48], index: 5, kind: input, shape index: {}]   ;;  %s3969_s7 = inlined_call_operand.vmem [shape: f32[48,48], index: 7, kind: input, shape index: {}]   ;;  %s3970_s1 = inlined_call_operand.vmem [shape: f32[4,64], index: 1, kind: input, shape index: {}]   ;;  %s3971_s0 = inlined_call_operand.vmem [shape: f32[8,4], index: 0, kind: input, shape index: {}]   ;;  %s3972_s3 = inlined_call_operand.vmem [shape: f32[64,32], index: 3, kind: input, shape index: {}]   ;;  %s3973_s8 = inlined_call_operand.vmem [shape: f32[1,48], index: 8, kind: input, shape index: {}]   ;;  %s3974_s4 = inlined_call_operand.vmem [shape: f32[1,32], index: 4, kind: input, shape index: {}]   ;;  %s3975_s9 = inlined_call_operand.vmem [shape: f32[48,32], index: 9, kind: input, shape index: {}]   ;;  %s3976_s10 = inlined_call_operand.vmem [shape: f32[1,32], index: 10, kind: input, shape index: {}]   ;;  %s3977_s12 = inlined_call_operand.vmem [shape: f32[16,128], index: 12, kind: input, shape index: {}]   ;;  %s3978_s11 = inlined_call_operand.vmem [shape: f32[64,16], index: 11, kind: input, shape index: {}]   ;;  %s3979_s13 = inlined_call_operand.vmem [shape: f32[64,128], index: 13, kind: input, shape index: {}]   ;;  %s3980_s15 = inlined_call_operand.vmem [shape: f32[1,128], index: 15, kind: input, shape index: {}]   ;;  %s3981_s14 = inlined_call_operand.vmem [shape: f32[32,128], index: 14, kind: input, shape index: {}]   ;;  %s3982_s16 = inlined_call_operand.vmem [shape: f32[32,128], index: 16, kind: input, shape index: {}]   ;;  %s3983_s17 = inlined_call_operand.vmem [shape: f32[32,128], index: 17, kind: input, shape index: {}]   ;;  %s3984_s18 = inlined_call_operand.vmem [shape: f32[1,128], index: 18, kind: input, shape index: {}]   ;;  %s3985_s20 = inlined_call_operand.vmem [shape: f32[32,128], index: 20, kind: input, shape index: {}]   ;;  %s3986_s19 = inlined_call_operand.vmem [shape: f32[32,128], index: 19, kind: input, shape index: {}]   ;;  %s3987_s21 = inlined_call_operand.vmem [shape: f32[1,128], index: 21, kind: input, shape index: {}]   ;;  %s3988_s22 = inlined_call_operand.vmem [shape: f32[32,128], index: 22, kind: input, shape index: {}]   ;;  %s3989_s23 = inlined_call_operand.vmem [shape: f32[1,128], index: 23, kind: input, shape index: {}]   ;;  %s3990_s24 = inlined_call_operand.vmem [shape: f32[64,128], index: 24, kind: output, shape index: {}]  }
   0x1   :  { %3995 = sst [smem:[#allocation3_spill]] %s3966_s6  ;;  %2683 = vset.pattern.permute.xlu1 %v2925_v0  ;;  %2682 = vset.pattern.permute.xlu0 %v2925_v0  ;;  %vm83_vm3 = vcmask 31744   ;;  %vm408_vm4 = vcmask 1041409   ;;  %vm410_vm5 = vcmask 1042434   ;;  %vm412_vm6 = vcmask 1043459  }
   0x2   :  { %3996 = sst [smem:[#allocation4_spill]] %s3967_s2  ;;  %2684 = vset.pattern.permute.xlu2 %v2925_v0  ;;  %vm414_vm7 = vcmask 1044484   ;;  %vm416_vm8 = vcmask 1045509   ;;  %vm418_vm9 = vcmask 1046534   ;;  %vm420_vm10 = vcmask 1047559  }
   0x3   :  { %3997 = sst [smem:[#allocation5_spill]] %s3968_s5  ;;  %vm124_vm11 = vcmask 523264   ;;  %vm548_vm12 = vcmask 130048   ;;  %vm486_vm13 = vcmask 261120  }
   0x4   :  { %3998 = sst [smem:[#allocation6_spill]] %s3969_s7 }
   0x5   :  { %3999 = sst [smem:[#allocation7_spill]] %s3970_s1 }
   0x6   :  { %4000 = sst [smem:[#allocation8_spill]] %s3971_s0 }
   0x7   :  { %4001 = sst [smem:[#allocation9_spill]] %s3972_s3 }
   0x8   :  { %4002 = sst [smem:[#allocation10_spill]] %s3973_s8 }
   0x9   :  { %4003 = sst [smem:[#allocation11_spill]] %s3974_s4 }
   0xa   :  { %s4004_s27 = sld [smem:[#allocation3_spill]] }
   0xb   :  { %s4005_s3 = sld [smem:[#allocation5_spill]] }
   0xc   :  { %s4006_s30 = sld [smem:[#allocation6_spill]] }
   0xd   :  { %s4008_s4 = sld [smem:[#allocation8_spill]] }
   0xe   :  { %s4009_s1 = sld [smem:[#allocation9_spill]] }
   0xf   :  { %s4011_s2 = sld [smem:[#allocation10_spill]] }
  0x10   :  { %v158_v1 = vld [vmem:[%s4004_s27 + $0x10] sm:$0xff]  ;;  %v156_v2 = vld [vmem:[%s4004_s27] sm:$0xff]  ;;  %v159_v7 = vld [vmem:[%s4004_s27 + $0x18] sm:$0xff] }
  0x11   :  { %v160_v3 = vld [vmem:[%s4004_s27 + $0x20] sm:$0xff]  ;;  %176 = vperm.xlu1 %2683, %v158_v1   ;;  %v284_v4 = vsel %vm269_vm0, %v158_v1, 0.0  ;;  %166 = vperm.xlu0 %2682, %v156_v2   ;;  %v270_v5 = vsel %vm269_vm0, %v156_v2, 0.0  ;;  %v157_v8 = vld [vmem:[%s4004_s27 + $0x8] sm:$0xff]  ;;  %v291_v13 = vsel %vm269_vm0, %v159_v7, 0.0  ;;  %v163_v14 = vld [vmem:[%s4004_s27 + $0x38] sm:$0xff] }
  0x12   :  { %v298_v6 = vsel %vm269_vm0, %v160_v3, 0.0  ;;  %v161_v9 = vld [vmem:[%s4004_s27 + $0x28] sm:$0xff]  ;;  %v285_v10 = vrot.slane %v284_v4, 4  ;;  %v271_v11 = vrot.slane %v270_v5, 4  ;;  %v162_v15 = vld [vmem:[%s4004_s27 + $0x30] sm:$0xff]  ;;  %186 = vperm.xlu2 %2684, %v160_v3   ;;  %v292_v16 = vrot.slane %v291_v13, 4 }
  0x13   :  { %v299_v12 = vrot.slane %v298_v6, 4  ;;  %v277_v17 = vsel %vm269_vm0, %v157_v8, 0.0  ;;  %v305_v18 = vsel %vm269_vm0, %v161_v9, 0.0  ;;  %v319_v19 = vsel %vm269_vm0, %v163_v14, 0.0  ;;  %s4010_s27 = sld [smem:[#allocation4_spill]] }
  0x14   :  { %v286_v20 = vadd.f32 %v285_v10, %v284_v4  ;;  %v272_v21 = vadd.f32 %v271_v11, %v270_v5  ;;  %v278_v23 = vrot.slane %v277_v17, 4  ;;  %v293_v24 = vadd.f32 %v292_v16, %v291_v13 }
  0x15   :  { %v300_v22 = vadd.f32 %v299_v12, %v298_v6  ;;  %v306_v25 = vrot.slane %v305_v18, 4  ;;  %v320_v26 = vrot.slane %v319_v19, 4  ;;  %v312_v27 = vsel %vm269_vm0, %v162_v15, 0.0 }
  0x16   :  { %v287_v28 = vrot.slane %v286_v20, 2  ;;  %v273_v29 = vrot.slane %v272_v21, 2  ;;  %v279_v31 = vadd.f32 %v278_v23, %v277_v17  ;;  %v294_v32 = vrot.slane %v293_v24, 2 }
  0x17   :  { %v301_v30 = vrot.slane %v300_v22, 2  ;;  %v307_v33 = vadd.f32 %v306_v25, %v305_v18  ;;  %v313_v34 = vrot.slane %v312_v27, 4  ;;  %v321_v40 = vadd.f32 %v320_v26, %v319_v19  ;;  %v150_v18 = vld [vmem:[%s4005_s3 + $0x10] sm:$0xff]  ;;  %v148_v19 = vld [vmem:[%s4005_s3] sm:$0xff] }
  0x18   :  { %v288_v35 = vadd.f32 %v287_v28, %v286_v20  ;;  %v274_v36 = vadd.f32 %v273_v29, %v272_v21  ;;  %v280_v37 = vrot.slane %v279_v31, 2  ;;  %v295_v38 = vadd.f32 %v294_v32, %v293_v24  ;;  %v395_v24 = vld [vmem:[%s4006_s30 + $0x28] sm:$0xff]  ;;  %v152_v25 = vld [vmem:[%s4005_s3 + $0x20] sm:$0xff] }
  0x19   :  { %181 = vperm.xlu1 %2683, %v159_v7   ;;  %171 = vperm.xlu0 %2682, %v157_v8   ;;  %v308_v39 = vrot.slane %v307_v33, 2  ;;  %v314_v41 = vadd.f32 %v313_v34, %v312_v27  ;;  %v302_v44 = vadd.f32 %v301_v30, %v300_v22  ;;  %v322_v53 = vrot.slane %v321_v40, 2  ;;  %v394_v27 = vld [vmem:[%s4006_s30 + $0x20] sm:$0xff]  ;;  %v153_v28 = vld [vmem:[%s4005_s3 + $0x28] sm:$0xff] }
  0x1a   :  { %v289_v42 = vrot.slane %v288_v35, 1  ;;  %v275_v43 = vrot.slane %v274_v36, 1  ;;  %v281_v45 = vadd.f32 %v280_v37, %v279_v31  ;;  %v296_v46 = vrot.slane %v295_v38, 1  ;;  %191 = vperm.xlu2 %2684, %v161_v9   ;;  %434 = vmatpush.msra.mxu2 %v395_v24  ;;  %v393_v31 = vld [vmem:[%s4006_s30 + $0x18] sm:$0xff]  ;;  %v149_v34 = vld [vmem:[%s4005_s3 + $0x8] sm:$0xff] }
  0x1b   :  { %v309_v47 = vadd.f32 %v308_v39, %v307_v33  ;;  %v315_v48 = vrot.slane %v314_v41, 2  ;;  %v303_v56 = vrot.slane %v302_v44, 1  ;;  %v323_v63 = vadd.f32 %v322_v53, %v321_v40  ;;  %v151_v33 = vld [vmem:[%s4005_s3 + $0x18] sm:$0xff] }
  0x1c   :  { %v290_v49 = vadd.f32 %v289_v42, %v288_v35  ;;  %v276_v50 = vadd.f32 %v275_v43, %v274_v36  ;;  %v282_v51 = vrot.slane %v281_v45, 1  ;;  %v297_v58 = vadd.f32 %v296_v46, %v295_v38  ;;  %435 = vmatpush.msra.mxu2 %v394_v27  ;;  %v392_v35 = vld [vmem:[%s4006_s30 + $0x10] sm:$0xff] }
  0x1d   :  { %v310_v52 = vrot.slane %v309_v47, 1  ;;  %v316_v59 = vadd.f32 %v315_v48, %v314_v41  ;;  %v304_v62 = vadd.f32 %v303_v56, %v302_v44  ;;  %v324_v5 = vrot.slane %v323_v63, 1  ;;  %v390_v48 = vld [vmem:[%s4006_s30] sm:$0xff] }
  0x1e   :  { %v328_v54 = vmax.f32 %v290_v49, 1e-06  ;;  %v326_v55 = vmax.f32 %v276_v50, 1e-06  ;;  %v283_v57 = vadd.f32 %v282_v51, %v281_v45  ;;  %v329_v0 = vmax.f32 %v297_v58, 1e-06  ;;  %436 = vmatpush.msra.mxu2 %v393_v31 }
  0x1f   :  { %v311_v61 = vadd.f32 %v310_v52, %v309_v47  ;;  %v317_v1 = vrot.slane %v316_v59, 1  ;;  %v330_v4 = vmax.f32 %v304_v62, 1e-06  ;;  %v325_v9 = vadd.f32 %v324_v5, %v323_v63  ;;  %v391_v45 = vld [vmem:[%s4006_s30 + $0x8] sm:$0xff]  ;;  %s4007_s30 = sld [smem:[#allocation7_spill]]  ;;  %v119_v62 = vld [vmem:[%s4009_s1 + $0x38] sm:$0xff] }
  0x20   :  { %2693 = vrcp.f32 %v328_v54  ;;  %v327_v60 = vmax.f32 %v283_v57, 1e-06  ;;  %437 = vmatpush.msra.mxu2 %v392_v35  ;;  %v154_v57 = vld [vmem:[%s4005_s3 + $0x30] sm:$0xff] }
  0x21   :  { %2695 = vrcp.f32 %v326_v55  ;;  %201 = vperm.xlu1 %2683, %v163_v14   ;;  %196 = vperm.xlu0 %2682, %v162_v15   ;;  %v331_v2 = vmax.f32 %v311_v61, 1e-06  ;;  %v318_v7 = vadd.f32 %v317_v1, %v316_v59  ;;  %v333_v13 = vmax.f32 %v325_v9, 1e-06  ;;  %v155_v55 = vld [vmem:[%s4005_s3 + $0x38] sm:$0xff]  ;;  %v77_v59 = vld [vmem:[%s4008_s4] sm:$0xff] }
  0x22   :  { %2697 = vrcp.f32 %v327_v60  ;;  %438 = vmatpush.msra.mxu2 %v391_v45 }
  0x23   :  { %2699 = vrcp.f32 %v329_v0  ;;  %v332_v10 = vmax.f32 %v318_v7, 1e-06  ;;  %v118_v7 = vld [vmem:[%s4009_s1 + $0x30] sm:$0xff] }
  0x24   :  { %2701 = vrcp.f32 %v331_v2  ;;  %439 = vmatpush.msra.mxu2 %v390_v48 }
  0x25   :  { %2703 = vrcp.f32 %v330_v4  ;;  %v78_v58 = vld [vmem:[%s4007_s30] sm:$0xf] }
  0x26   :  { %v2694_v3 = vpop.eup %2693  ;;  %2705 = vrcp.f32 %v332_v10  ;;  %2592 = vmatpush.msk.msra.mxu1 %vm87_vm2, %v78_v58 }
  0x27   :  { %v2696_v6 = vpop.eup %2695  ;;  %2707 = vrcp.f32 %v333_v13  ;;  %2593 = vmatmul.msk.f32.vlgmr.msra.gmra.mxu1 %vm83_vm3, %v77_v59  ;;  %v117_v13 = vld [vmem:[%s4009_s1 + $0x28] sm:$0xff] }
  0x28   :  { %344 = vperm.xlu2 %2684, %v2696_v6   ;;  %v2698_v8 = vpop.eup %2697  ;;  %136 = vmatpush.msrb.mxu1 %v119_v62 }
  0x29   :  { %354 = vperm.xlu1 %2683, %v2694_v3   ;;  %349 = vperm.xlu0 %2682, %v2698_v8   ;;  %v2700_v11 = vpop.eup %2699 }
  0x2a   :  { %v2702_v12 = vpop.eup %2701  ;;  %137 = vmatpush.msrb.mxu1 %v118_v7  ;;  %v112_v7 = vld [vmem:[%s4009_s1] sm:$0xff] }
  0x2b   :  { %v2704_v14 = vpop.eup %2703 }
  0x2c   :  { %v2706_v15 = vpop.eup %2705  ;;  %138 = vmatpush.msrb.mxu1 %v117_v13  ;;  %v449_v13 = vld [vmem:[%s3975_s9 + $0x20] sm:$0xff] }
  0x2d   :  { %v2708_v16 = vpop.eup %2707 }
  0x30   :  { %359 = vperm.xlu2 %2684, %v2700_v11  }
  0x31   :  { %369 = vperm.xlu1 %2683, %v2702_v12   ;;  %364 = vperm.xlu0 %2682, %v2704_v14  }
  0x38   :  { %374 = vperm.xlu2 %2684, %v2706_v15  }
  0x39   :  { %379 = vperm.xlu0 %2682, %v2708_v16  }
  0x6c   :  { %v187_v17 = vpop.permute.xlu2 %186 }
  0x6d   :  { %v208_v32 = vmul.f32 %v187_v17, %v152_v25 }
  0x6f   :  { %v241_v44 = vsel %vm212_vm1, %v208_v32, 0.0  ;;  %v114_v32 = vld [vmem:[%s4009_s1 + $0x10] sm:$0xff] }
  0x70   :  { %v242_v53 = vrot.slane %v241_v44, 4 }
  0x72   :  { %v243_v3 = vadd.f32 %v242_v53, %v241_v44 }
  0x74   :  { %v192_v36 = vpop.permute.xlu2 %191  ;;  %v244_v17 = vrot.slane %v243_v3, 2 }
  0x75   :  { %v209_v37 = vmul.f32 %v192_v36, %v153_v28 }
  0x76   :  { %v245_v31 = vadd.f32 %v244_v17, %v243_v3  ;;  %v445_v17 = vld [vmem:[%s3975_s9] sm:$0xff] }
  0x77   :  { %v248_v49 = vsel %vm212_vm1, %v209_v37, 0.0 }
  0x78   :  { %v249_v60 = vrot.slane %v248_v49, 4 }
  0x7a   :  { %v250_v9 = vadd.f32 %v249_v60, %v248_v49 }
  0x83   :  { %v177_v20 = vpop.permute.xlu1 %176  ;;  %v167_v21 = vpop.permute.xlu0 %166 }
  0x84   :  { %v206_v22 = vmul.f32 %v177_v20, %v150_v18  ;;  %v204_v23 = vmul.f32 %v167_v21, %v148_v19  ;;  %v345_v18 = vpop.permute.xlu2 %344  ;;  %v116_v21 = vld [vmem:[%s4009_s1 + $0x20] sm:$0xff] }
  0x85   :  { %139 = vmatpush.msrb.mxu1 %v116_v21  ;;  %v538_v21 = vld [vmem:[%s3978_s11] sm:$0xff] }
  0x86   :  { %v213_v26 = vsel %vm212_vm1, %v204_v23, 0.0  ;;  %v227_v29 = vsel %vm212_vm1, %v206_v22, 0.0  ;;  %v251_v23 = vrot.slane %v250_v9, 2 }
  0x87   :  { %v214_v30 = vrot.slane %v213_v26, 4  ;;  %v228_v38 = vrot.slane %v227_v29, 4 }
  0x88   :  { %v252_v37 = vadd.f32 %v251_v23, %v250_v9  ;;  %v2685_v9 = vld [vmem:[%s4010_s27] ss:$0 sm:$0xff]  ;;  %v484_v23 = vld [vmem:[%s3979_s13 + $0x30] sm:$0xff] }
  0x89   :  { %v215_v41 = vadd.f32 %v214_v30, %v213_v26  ;;  %v229_v50 = vadd.f32 %v228_v38, %v227_v29  ;;  %v115_v26 = vld [vmem:[%s4009_s1 + $0x18] sm:$0xff]  ;;  %v113_v38 = vld [vmem:[%s4009_s1 + $0x8] sm:$0xff] }
  0x8a   :  { %140 = vmatpush.msrb.mxu1 %v115_v26  ;;  %v253_v48 = vrot.slane %v252_v37, 1  ;;  %v2686_v26 = vld [vmem:[%s4011_s2] ss:$0 sm:$0xff]  ;;  %s4012_s2 = sld [smem:[#allocation11_spill]] }
  0x8b   :  { %v182_v39 = vpop.permute.xlu1 %181  ;;  %v172_v40 = vpop.permute.xlu0 %171  ;;  %v216_v54 = vrot.slane %v215_v41, 2  ;;  %v230_v63 = vrot.slane %v229_v50, 2 }
  0x8c   :  { %v207_v42 = vmul.f32 %v182_v39, %v151_v33  ;;  %v205_v43 = vmul.f32 %v172_v40, %v149_v34  ;;  %141 = vmatpush.msrb.mxu1 %v114_v32  ;;  %v360_v45 = vpop.permute.xlu2 %359  ;;  %v544_v32 = vld [vmem:[%s3978_s11 + $0x30] sm:$0xff] }
  0x8d   :  { %v217_v4 = vadd.f32 %v216_v54, %v215_v41  ;;  %v231_v15 = vadd.f32 %v230_v63, %v229_v50 }
  0x8e   :  { %v234_v46 = vsel %vm212_vm1, %v207_v42, 0.0  ;;  %v220_v47 = vsel %vm212_vm1, %v205_v43, 0.0  ;;  %v246_v42 = vrot.slane %v245_v31, 1  ;;  %142 = vmatpush.msrb.mxu1 %v113_v38 }
  0x8f   :  { %v235_v51 = vrot.slane %v234_v46, 4  ;;  %v221_v52 = vrot.slane %v220_v47, 4  ;;  %v218_v19 = vrot.slane %v217_v4, 1  ;;  %v232_v28 = vrot.slane %v231_v15, 1 }
  0x90   :  { %v247_v49 = vadd.f32 %v246_v42, %v245_v31  ;;  %143 = vmatpush.msrb.mxu1 %v112_v7  ;;  %v539_v31 = vld [vmem:[%s3978_s11 + $0x8] sm:$0xff]  ;;  %v478_v42 = vld [vmem:[%s3979_s13] sm:$0xff] }
  0x91   :  { %v222_v56 = vadd.f32 %v221_v52, %v220_v47  ;;  %v236_v61 = vadd.f32 %v235_v51, %v234_v46  ;;  %v219_v29 = vadd.f32 %v218_v19, %v217_v4  ;;  %v233_v39 = vadd.f32 %v232_v28, %v231_v15  ;;  %v447_v15 = vld [vmem:[%s3975_s9 + $0x10] sm:$0xff]  ;;  %v546_v19 = vld [vmem:[%s3977_s12] sm:$0xff] }
  0x93   :  { %v223_v0 = vrot.slane %v222_v56, 2  ;;  %v202_v1 = vpop.permute.xlu1 %201  ;;  %v197_v2 = vpop.permute.xlu0 %196  ;;  %v237_v10 = vrot.slane %v236_v61, 2  ;;  %v382_v41 = vmul.f32 %v345_v18, %v219_v29  ;;  %v547_v18 = vld [vmem:[%s3977_s12 + $0x8] sm:$0xff] }
  0x94   :  { %v211_v5 = vmul.f32 %v202_v1, %v155_v55  ;;  %v210_v6 = vmul.f32 %v197_v2, %v154_v57  ;;  %v375_v63 = vpop.permute.xlu2 %374  ;;  %2676 = vmatpush.msra.mxu3 %v547_v18  ;;  %587 = vmatpush.msrb.mxu2 %v547_v18 }
  0x95   :  { %v224_v8 = vadd.f32 %v223_v0, %v222_v56  ;;  %v238_v24 = vadd.f32 %v237_v10, %v236_v61  ;;  %v254_v56 = vadd.f32 %v253_v48, %v252_v37  ;;  %v2687_v37 = vld [vmem:[%s4012_s2] ss:$0 sm:$0xff] }
  0x96   :  { %v262_v11 = vsel %vm212_vm1, %v211_v5, 0.0  ;;  %v255_v12 = vsel %vm212_vm1, %v210_v6, 0.0  ;;  %2677 = vmatpush.msra.mxu3 %v546_v19  ;;  %588 = vmatpush.msrb.mxu2 %v546_v19 }
  0x97   :  { %v256_v14 = vrot.slane %v255_v12, 4  ;;  %v225_v16 = vrot.slane %v224_v8, 1  ;;  %v263_v20 = vrot.slane %v262_v11, 4  ;;  %v239_v35 = vrot.slane %v238_v24, 1 }
  0x99   :  { %v257_v22 = vadd.f32 %v256_v14, %v255_v12  ;;  %v226_v25 = vadd.f32 %v225_v16, %v224_v8  ;;  %v264_v30 = vadd.f32 %v263_v20, %v262_v11  ;;  %v240_v46 = vadd.f32 %v239_v35, %v238_v24  ;;  %v450_v8 = vld [vmem:[%s3975_s9 + $0x28] sm:$0xff]  ;;  %v448_v14 = vld [vmem:[%s3975_s9 + $0x18] sm:$0xff]  ;;  %v542_v24 = vld [vmem:[%s3978_s11 + $0x20] sm:$0xff] }
  0x9a   :  { %468 = vmatpush.msra.mxu1 %v450_v8  ;;  %v446_v16 = vld [vmem:[%s3975_s9 + $0x8] sm:$0xff]  ;;  %v541_v20 = vld [vmem:[%s3978_s11 + $0x18] sm:$0xff]  ;;  %v480_v35 = vld [vmem:[%s3979_s13 + $0x10] sm:$0xff] }
  0x9b   :  { %v355_v27 = vpop.permute.xlu1 %354  ;;  %v258_v33 = vrot.slane %v257_v22, 2  ;;  %v350_v34 = vpop.permute.xlu0 %349  ;;  %v265_v40 = vrot.slane %v264_v30, 2  ;;  %v385_v55 = vmul.f32 %v360_v45, %v240_v46  ;;  %2602 = vmatmul.msk.f32.vlgmr.msra.gmra.mxu3 %vm548_vm12, %v541_v20  ;;  %v3273_v45 = vld [vmem:[%s3981_s14 + $0x8] sm:$0xff]  ;;  %v3280_v46 = vld [vmem:[%s3981_s14] sm:$0xff] }
  0x9c   :  { %v383_v36 = vmul.f32 %v350_v34, %v226_v25  ;;  %v384_v44 = vmul.f32 %v355_v27, %v233_v39  ;;  %469 = vmatpush.msra.mxu1 %v449_v13  ;;  %v543_v25 = vld [vmem:[%s3978_s11 + $0x28] sm:$0xff]  ;;  %v481_v34 = vld [vmem:[%s3979_s13 + $0x18] sm:$0xff] }
  0x9d   :  { %v259_v43 = vadd.f32 %v258_v33, %v257_v22  ;;  %v266_v50 = vadd.f32 %v265_v40, %v264_v30  ;;  %v485_v22 = vld [vmem:[%s3979_s13 + $0x38] sm:$0xff]  ;;  %v483_v30 = vld [vmem:[%s3979_s13 + $0x28] sm:$0xff]  ;;  %v482_v33 = vld [vmem:[%s3979_s13 + $0x20] sm:$0xff] }
  0x9e   :  { %v409_v47 = vsel %vm408_vm4, %v383_v36, %v382_v41  ;;  %470 = vmatpush.msra.mxu1 %v448_v14  ;;  %502 = vmatpush.msra.mxu0 %v485_v22  ;;  %v479_v36 = vld [vmem:[%s3979_s13 + $0x8] sm:$0xff]  ;;  %v540_v40 = vld [vmem:[%s3978_s11 + $0x10] sm:$0xff]  ;;  %v545_v41 = vld [vmem:[%s3978_s11 + $0x38] sm:$0xff] }
  0x9f   :  { %v260_v51 = vrot.slane %v259_v43, 1  ;;  %v411_v52 = vsel %vm410_vm5, %v384_v44, %v409_v47  ;;  %v267_v60 = vrot.slane %v266_v50, 1  ;;  %v3266_v44 = vld [vmem:[%s3981_s14 + $0x10] sm:$0xff]  ;;  %v2688_v47 = vld [vmem:[%s3976_s10] ss:$0 sm:$0xff]  ;;  %s2927_s10 = smov 64  }
  0xa0   :  { %v413_v59 = vsel %vm412_vm6, %v385_v55, %v411_v52  ;;  %471 = vmatpush.msra.mxu1 %v447_v15  ;;  %503 = vmatpush.msra.mxu0 %v484_v23  ;;  %v2689_v55 = vld [vmem:[%s3980_s15] ss:$0 sm:$0xff]  ;;  %s2928_s15 = smov 32   ;;  %v3324_v22 = vld [vmem:[%s3982_s16 + $0x10] sm:$0xff]  ;;  %v3330_v23 = vld [vmem:[%s3983_s17 + $0x18] sm:$0xff] }
  0xa1   :  { %v261_v61 = vadd.f32 %v260_v51, %v259_v43  ;;  %v268_v0 = vadd.f32 %v267_v60, %v266_v50  ;;  %v3261_v43 = vld [vmem:[%s3981_s14 + $0x18] sm:$0xff]  ;;  %v2926_v50 = vmov 0.0  }
  0xa2   :  { %472 = vmatpush.msra.mxu1 %v446_v16  ;;  %504 = vmatpush.msra.mxu0 %v483_v30  ;;  %v3365_v30 = vld [vmem:[%s3983_s17] sm:$0xff] }
  0xa3   :  { %v370_v53 = vpop.permute.xlu1 %369  ;;  %v365_v54 = vpop.permute.xlu0 %364  ;;  %v388_v3 = vmul.f32 %v375_v63, %v261_v61  ;;  %2603 = vmatmul.msk.f32.gmra.mxu3 %vm548_vm12, %v542_v24  ;;  %v3335_v24 = vld [vmem:[%s3982_s16 + $0x8] sm:$0xff] }
  0xa4   :  { %v386_v57 = vmul.f32 %v365_v54, %v247_v49  ;;  %v387_v58 = vmul.f32 %v370_v53, %v254_v56  ;;  %v108_v10 = vpop.f32.mrf.mxu1  ;;  %473 = vmatpush.msra.mxu1 %v445_v17  ;;  %505 = vmatpush.msra.mxu0 %v482_v33 }
  0xa5   :  { %v109_v11 = vadd.f32 %v2685_v9, %v108_v10 }
  0xa6   :  { %v415_v62 = vsel %vm414_vm7, %v386_v57, %v413_v59  ;;  %525 = vmatpush.msrb.mxu0 %v481_v34 }
  0xa7   :  { %v417_v1 = vsel %vm416_vm8, %v387_v58, %v415_v62  ;;  %v111_v12 = vmax.f32 %v109_v11, 0.0 }
  0xa8   :  { %v419_v5 = vsel %vm418_vm9, %v388_v3, %v417_v1  ;;  %526 = vmatpush.msrb.mxu0 %v480_v35 }
  0xa9   :  { %2594 = vmatmul.msk.f32.vlgmr.msrb.gmra.mxu1 %vm124_vm11, %v111_v12 }
  0xaa   :  { %527 = vmatpush.msrb.mxu0 %v479_v36  ;;  %722 = vmatpush.msrb.mxu1 %v3261_v43 }
  0xab   :  { %v380_v2 = vpop.permute.xlu0 %379  ;;  %2604 = vmatmul.msk.f32.gmra.mxu3 %vm548_vm12, %v543_v25  ;;  %v3342_v25 = vld [vmem:[%s3982_s16] sm:$0xff] }
  0xac   :  { %v389_v4 = vmul.f32 %v380_v2, %v268_v0  ;;  %528 = vmatpush.msrb.mxu0 %v478_v42  ;;  %723 = vmatpush.msrb.mxu1 %v3266_v44 }
  0xae   :  { %v421_v6 = vsel %vm420_vm10, %v389_v4, %v419_v5  ;;  %724 = vmatpush.msrb.mxu1 %v3273_v45 }
  0xaf   :  { %2595 = vmatmul.msk.f32.vlgmr.msra.gmra.mxu2 %vm212_vm1, %v421_v6 }
  0xb0   :  { %725 = vmatpush.msrb.mxu1 %v3280_v46 }
  0xb3   :  { %2605 = vmatmul.msk.f32.gmra.mxu3 %vm548_vm12, %v544_v32 }
  0xb7   :  { %2599 = vmatmul.msk.f32.vlgmr.msrb.gmra.mxu2 %vm548_vm12, %v538_v21  ;;  %v3319_v21 = vld [vmem:[%s3982_s16 + $0x18] sm:$0xff] }
  0xb8   :  { %800 = vmatpush.msrb.mxu3 %v3319_v21 }
  0xba   :  { %801 = vmatpush.msrb.mxu3 %v3324_v22 }
  0xbb   :  { %2606 = vmatmul.msk.f32.gmra.mxu3 %vm548_vm12, %v545_v41 }
  0xbc   :  { %802 = vmatpush.msrb.mxu3 %v3335_v24 }
  0xbe   :  { %803 = vmatpush.msrb.mxu3 %v3342_v25 }
  0xbf   :  { %2600 = vmatmul.msk.f32.gmra.mxu2 %vm548_vm12, %v539_v31 }
  0xc0   :  { %947 = vmatpush.msra.mxu3 %v3319_v21 }
  0xc2   :  { %948 = vmatpush.msra.mxu3 %v3324_v22 }
  0xc4   :  { %949 = vmatpush.msra.mxu3 %v3335_v24 }
  0xc6   :  { %950 = vmatpush.msra.mxu3 %v3342_v25 }
  0xc7   :  { %2601 = vmatmul.msk.f32.gmra.mxu2 %vm548_vm12, %v540_v40 }
 0x11e   :  { %v3295_v51 = vpop.f32.mrf.mxu3 }
 0x126   :  { %v145_v38 = vpop.f32.mrf.mxu1  ;;  %v3297_v52 = vpop.f32.mrf.mxu3 }
 0x127   :  { %v146_v39 = vadd.f32 %v2687_v37, %v145_v38  ;;  %v3386_v38 = vld [vmem:[%s3984_s18] ss:$0 sm:$0xff] }
 0x129   :  { %2597 = vmatmul.msk.f32.vlgmr.msra.gmra.mxu0 %vm486_vm13, %v146_v39 }
 0x12a   :  { %658 = vmatpush.msra.mxu0 %v3261_v43 }
 0x12c   :  { %659 = vmatpush.msra.mxu0 %v3266_v44 }
 0x12e   :  { %660 = vmatpush.msra.mxu0 %v3273_v45  ;;  %v3299_v54 = vpop.f32.mrf.mxu3 }
 0x130   :  { %661 = vmatpush.msra.mxu0 %v3280_v46 }
 0x132   :  { %v441_v27 = vpop.f32.mrf.mxu2 }
 0x133   :  { %v442_v28 = vadd.f32 %v2686_v26, %v441_v27 }
 0x135   :  { %2709 = vtanh.f32 %v442_v28  ;;  %v3354_v28 = vld [vmem:[%s3983_s17 + $0x10] sm:$0xff] }
 0x136   :  { %v608_v59 = vpop.f32.mrf.mxu3 }
 0x13a   :  { %v590_v60 = vpop.f32.mrf.mxu2 }
 0x13b   :  { %v2710_v29 = vpop.eup %2709 }
 0x13c   :  { %2596 = vmatmul.msk.f32.vlgmr.msra.gmra.mxu1 %vm212_vm1, %v2710_v29  ;;  %v3359_v29 = vld [vmem:[%s3983_s17 + $0x8] sm:$0xff] }
 0x13d   :  { %864 = vmatpush.msra.mxu1 %v3261_v43 }
 0x13e   :  { %v3380_v33 = vpop.f32.mrf.mxu3 }
 0x13f   :  { %865 = vmatpush.msra.mxu1 %v3266_v44 }
 0x141   :  { %866 = vmatpush.msra.mxu1 %v3273_v45 }
 0x142   :  { %v593_v32 = vpop.f32.mrf.mxu2 }
 0x143   :  { %867 = vmatpush.msra.mxu1 %v3280_v46 }
 0x1a6   :  { %v507_v53 = vpop.f32.mrf.mxu0 }
 0x1b9   :  { %v475_v48 = vpop.f32.mrf.mxu1 }
 0x1ba   :  { %v476_v49 = vadd.f32 %v2688_v47, %v475_v48 }
 0x1bc   :  { %2598 = vmatmul.msk.f32.vlgmr.msrb.gmra.mxu0 %vm486_vm13, %v476_v49 }
 0x1bd   :  { %780 = vmatpush.msrb.mxu0 %v3330_v23 }
 0x1bf   :  { %781 = vmatpush.msrb.mxu0 %v3354_v28 }
 0x1c1   :  { %782 = vmatpush.msrb.mxu0 %v3359_v29 }
 0x1c3   :  { %783 = vmatpush.msrb.mxu0 %v3365_v30 }
 0x1c4   :  { %662 = vmatmul.f32.vlgmr.msra.gmra.mxu0 %v2926_v50 }
 0x1c5   :  { %927 = vmatpush.msra.mxu0 %v3330_v23 }
 0x1c7   :  { %928 = vmatpush.msra.mxu0 %v3354_v28 }
 0x1c9   :  { %929 = vmatpush.msra.mxu0 %v3359_v29 }
 0x1cb   :  { %930 = vmatpush.msra.mxu0 %v3365_v30 }
 0x1cc   :  { %784 = vmatmul.f32.vlgmr.msrb.gmra.mxu0 %v2926_v50 }
 0x239   :  { %v530_v56 = vpop.f32.mrf.mxu0 }
 0x23a   :  { %v531_v57 = vadd.f32 %v530_v56, %v507_v53 }
 0x23c   :  { %v3304_v58 = vadd.f32 %v2689_v55, %v531_v57 }
 0x23e   :  { %v3307_v61 = vadd.f32 %v608_v59, %v3304_v58  ;;  %v642_v62 = vadd.f32 %v590_v60, %v3304_v58  ;;  %v704_v34 = vadd.f32 %v593_v32, %v3304_v58 }
 0x241   :  { %v663_v63 = vpop.f32.mrf.mxu0 }
 0x242   :  { %v666_v0 = vadd.f32 %v663_v63, %v642_v62 }
 0x244   :  { %2711 = vtanh.f32 %v666_v0  ;;  %v2607_v2 = vmul.f32 -1.442695, %v666_v0 }
 0x246   :  { %2713 = vpow2.f32 %v2607_v2 }
 0x249   :  { %v785_v37 = vpop.f32.mrf.mxu0 }
 0x24a   :  { %v2712_v1 = vpop.eup %2711 }
 0x24b   :  { %689 = vrot.lane.b32.xlu1 %v2712_v1, %s2927_s10 }
 0x24c   :  { %v2714_v3 = vpop.eup %2713 }
 0x24d   :  { %v670_v4 = vadd.f32 1.0, %v2714_v3 }
 0x24f   :  { %2715 = vrcp.f32 %v670_v4  ;;  %v682_v10 = vand.u32 2147483648, %v670_v4  ;;  %vm676_vm15 = vweird.f32 %v670_v4  ;;  %v680_v11 = vand.u32 2147483647, %v670_v4 }
 0x251   :  { %v683_v13 = vor.u32 1.1754944e-38, %v682_v10  ;;  %vm681_vm1 = vcmp.eq.f32.partialorder %v680_v11, 8.507059e+37 }
 0x255   :  { %v2716_v5 = vpop.eup %2715 }
 0x256   :  { %v672_v6 = vmul.f32 %v2716_v5, %v670_v4  ;;  %vm677_vm14 = vweird.f32 %v2716_v5 }
 0x257   :  { %vm678_vm0 = vmor %vm676_vm15, %vm677_vm14 }
 0x258   :  { %v673_v7 = vsub.f32 1.0, %v672_v6 }
 0x25a   :  { %v674_v8 = vmul.f32 %v2716_v5, %v673_v7 }
 0x25c   :  { %v675_v9 = vadd.f32 %v2716_v5, %v674_v8 }
 0x25e   :  { %v679_v12 = vsel %vm678_vm0, %v2716_v5, %v675_v9 }
 0x25f   :  { %v684_v15 = vsel %vm681_vm1, %v683_v13, %v679_v12 }
 0x260   :  { %v687_v17 = vmul.f32 0.0, %v684_v15 }
 0x2bd   :  { %v690_v14 = vpop.permute.xlu1 %689 }
 0x2be   :  { %v692_v16 = vmul.f32 %v690_v14, %v684_v15 }
 0x2c0   :  { %694 = vrot.lane.b32.xlu2 %v692_v16, %s2928_s15 }
 0x31a   :  { %v695_v18 = vpop.permute.xlu2 %694 }
 0x31b   :  { %v3312_v19 = vadd.f32 %v695_v18, %v687_v17 }
 0x31d   :  { %2717 = vtanh.f32 %v3312_v19 }
 0x323   :  { %v2718_v20 = vpop.eup %2717 }
 0x324   :  { %700 = vrot.lane.b32.xlu0 %v2718_v20, %s2927_s10 }
 0x396   :  { %v701_v26 = vpop.permute.xlu0 %700 }
 0x397   :  { %v703_v27 = vmul.f32 %v701_v26, %v684_v15 }
 0x399   :  { %706 = vrot.lane.b32.xlu1 %v703_v27, %s2928_s15 }
 0x40b   :  { %v707_v31 = vpop.permute.xlu1 %706 }
 0x40c   :  { %2608 = vmatmul.msk.f32.vlgmr.msrb.gmra.mxu1 %vm486_vm13, %v707_v31  ;;  %2610 = vmatmul.msk.f32.vlgmr.msrb.gmra.mxu3 %vm486_vm13, %v707_v31 }
 0x40d   :  { %1094 = vmatpush.msrb.mxu3 %v3261_v43 }
 0x40f   :  { %1095 = vmatpush.msrb.mxu3 %v3266_v44 }
 0x411   :  { %1096 = vmatpush.msrb.mxu3 %v3273_v45 }
 0x413   :  { %1097 = vmatpush.msrb.mxu3 %v3280_v46 }
 0x489   :  { %v727_v35 = vpop.f32.mrf.mxu1 }
 0x48a   :  { %v730_v36 = vadd.f32 %v727_v35, %v704_v34 }
 0x48c   :  { %2719 = vtanh.f32 %v730_v36  ;;  %v2609_v48 = vmul.f32 -1.442695, %v730_v36 }
 0x48f   :  { %v805_v39 = vpop.f32.mrf.mxu3 }
 0x490   :  { %v806_v40 = vadd.f32 %v805_v39, %v785_v37 }
 0x492   :  { %v2720_v41 = vpop.eup %2719  ;;  %v808_v42 = vadd.f32 %v3386_v38, %v806_v40 }
 0x493   :  { %753 = vrot.lane.b32.xlu2 %v2720_v41, %s2927_s10 }
 0x494   :  { %2721 = vtanh.f32 %v808_v42  ;;  %v2611_v59 = vmul.f32 -1.442695, %v808_v42 }
 0x495   :  { %2723 = vpow2.f32 %v2609_v48  ;;  %v3414_v48 = vld [vmem:[%s3986_s19 + $0x18] sm:$0xff] }
 0x496   :  { %1025 = vmatpush.msrb.mxu0 %v3414_v48  ;;  %1953 = vmatpush.msra.mxu2 %v3414_v48 }
 0x49a   :  { %v2722_v47 = vpop.eup %2721 }
 0x49b   :  { %831 = vrot.lane.b32.xlu0 %v2722_v47, %s2927_s10  ;;  %v2724_v49 = vpop.eup %2723  ;;  %v3409_v47 = vld [vmem:[%s3985_s20 + $0x18] sm:$0xff] }
 0x49c   :  { %v734_v53 = vadd.f32 1.0, %v2724_v49  ;;  %v3419_v49 = vld [vmem:[%s3985_s20 + $0x10] sm:$0xff]  ;;  %1005 = vmatpush.msrb.mxu1 %v3409_v47 }
 0x49e   :  { %2725 = vrcp.f32 %v734_v53  ;;  %v746_v63 = vand.u32 2147483648, %v734_v53  ;;  %vm740_vm3 = vweird.f32 %v734_v53  ;;  %v744_v0 = vand.u32 2147483647, %v734_v53  ;;  %1006 = vmatpush.msrb.mxu1 %v3419_v49 }
 0x49f   :  { %2727 = vpow2.f32 %v2611_v59  ;;  %v3450_v59 = vld [vmem:[%s3986_s19] sm:$0xff] }
 0x4a0   :  { %v747_v3 = vor.u32 1.1754944e-38, %v746_v63  ;;  %vm745_vm5 = vcmp.eq.f32.partialorder %v744_v0, 8.507059e+37 }
 0x4a4   :  { %v2726_v55 = vpop.eup %2725 }
 0x4a5   :  { %v736_v56 = vmul.f32 %v2726_v55, %v734_v53  ;;  %vm741_vm2 = vweird.f32 %v2726_v55  ;;  %v2728_v1 = vpop.eup %2727  ;;  %v3426_v53 = vld [vmem:[%s3986_s19 + $0x10] sm:$0xff] }
 0x4a6   :  { %vm742_vm4 = vmor %vm740_vm3, %vm741_vm2  ;;  %v812_v4 = vadd.f32 1.0, %v2728_v1  ;;  %1026 = vmatpush.msrb.mxu0 %v3426_v53  ;;  %1954 = vmatpush.msra.mxu2 %v3426_v53 }
 0x4a7   :  { %v737_v57 = vsub.f32 1.0, %v736_v56  ;;  %v3436_v56 = vld [vmem:[%s3986_s19 + $0x8] sm:$0xff] }
 0x4a8   :  { %2729 = vrcp.f32 %v812_v4  ;;  %v824_v13 = vand.u32 2147483648, %v812_v4  ;;  %vm818_vm7 = vweird.f32 %v812_v4  ;;  %v822_v14 = vand.u32 2147483647, %v812_v4  ;;  %1027 = vmatpush.msrb.mxu0 %v3436_v56  ;;  %1955 = vmatpush.msra.mxu2 %v3436_v56 }
 0x4a9   :  { %v738_v60 = vmul.f32 %v2726_v55, %v737_v57  ;;  %v3445_v57 = vld [vmem:[%s3985_s20] sm:$0xff] }
 0x4aa   :  { %v825_v16 = vor.u32 1.1754944e-38, %v824_v13  ;;  %vm823_vm9 = vcmp.eq.f32.partialorder %v822_v14, 8.507059e+37  ;;  %1028 = vmatpush.msrb.mxu0 %v3450_v59  ;;  %1956 = vmatpush.msra.mxu2 %v3450_v59 }
 0x4ab   :  { %v739_v62 = vadd.f32 %v2726_v55, %v738_v60  ;;  %v596_v60 = vpop.f32.mrf.mxu2 }
 0x4ac   :  { %2165 = vmatpush.msrb.mxu2 %v3409_v47 }
 0x4ad   :  { %v743_v2 = vsel %vm742_vm4, %v2726_v55, %v739_v62  ;;  %v3431_v55 = vld [vmem:[%s3985_s20 + $0x8] sm:$0xff]  ;;  %v846_v62 = vadd.f32 %v596_v60, %v3304_v58 }
 0x4ae   :  { %v748_v6 = vsel %vm745_vm5, %v747_v3, %v743_v2  ;;  %v2730_v8 = vpop.eup %2729  ;;  %1007 = vmatpush.msrb.mxu1 %v3431_v55  ;;  %2166 = vmatpush.msrb.mxu2 %v3419_v49 }
 0x4af   :  { %v814_v9 = vmul.f32 %v2730_v8, %v812_v4  ;;  %vm819_vm6 = vweird.f32 %v2730_v8  ;;  %v751_v26 = vmul.f32 %v748_v6, %v3312_v19 }
 0x4b0   :  { %vm820_vm8 = vmor %vm818_vm7, %vm819_vm6  ;;  %1008 = vmatpush.msrb.mxu1 %v3445_v57  ;;  %2167 = vmatpush.msrb.mxu2 %v3431_v55 }
 0x4b1   :  { %v815_v10 = vsub.f32 1.0, %v814_v9 }
 0x4b2   :  { %2168 = vmatpush.msrb.mxu2 %v3445_v57 }
 0x4b3   :  { %v816_v11 = vmul.f32 %v2730_v8, %v815_v10 }
 0x4b5   :  { %v817_v12 = vadd.f32 %v2730_v8, %v816_v11 }
 0x4b7   :  { %v821_v15 = vsel %vm820_vm8, %v2730_v8, %v817_v12 }
 0x4b8   :  { %v826_v18 = vsel %vm823_vm9, %v825_v16, %v821_v15 }
 0x4b9   :  { %v829_v32 = vmul.f32 0.0, %v826_v18 }
 0x4ed   :  { %v754_v5 = vpop.permute.xlu2 %753 }
 0x4ee   :  { %v756_v7 = vmul.f32 %v754_v5, %v748_v6 }
 0x4f0   :  { %758 = vrot.lane.b32.xlu1 %v756_v7, %s2928_s15  ;;  %v3491_v7 = vld [vmem:[%s3987_s21] ss:$0 sm:$0xff] }
 0x50d   :  { %v832_v17 = vpop.permute.xlu0 %831 }
 0x50e   :  { %v834_v20 = vmul.f32 %v832_v17, %v826_v18 }
 0x510   :  { %836 = vrot.lane.b32.xlu2 %v834_v20, %s2928_s15 }
 0x562   :  { %v759_v27 = vpop.permute.xlu1 %758 }
 0x563   :  { %v3394_v31 = vadd.f32 %v759_v27, %v751_v26 }
 0x565   :  { %2731 = vtanh.f32 %v3394_v31 }
 0x56a   :  { %v837_v34 = vpop.permute.xlu2 %836 }
 0x56b   :  { %v2732_v35 = vpop.eup %2731  ;;  %v3397_v36 = vadd.f32 %v837_v34, %v829_v32 }
 0x56c   :  { %764 = vrot.lane.b32.xlu0 %v2732_v35, %s2927_s10 }
 0x56d   :  { %2733 = vtanh.f32 %v3397_v36 }
 0x573   :  { %v2734_v37 = vpop.eup %2733 }
 0x574   :  { %842 = vrot.lane.b32.xlu1 %v2734_v37, %s2927_s10 }
 0x5de   :  { %v765_v39 = vpop.permute.xlu0 %764 }
 0x5df   :  { %v767_v40 = vmul.f32 %v765_v39, %v748_v6 }
 0x5e1   :  { %848 = vrot.lane.b32.xlu2 %v767_v40, %s2928_s15 }
 0x5e6   :  { %v843_v19 = vpop.permute.xlu1 %842 }
 0x5e7   :  { %v845_v41 = vmul.f32 %v843_v19, %v826_v18 }
 0x5e9   :  { %911 = vrot.lane.b32.xlu0 %v845_v41, %s2928_s15 }
 0x63b   :  { %v849_v42 = vpop.permute.xlu2 %848 }
 0x63c   :  { %2612 = vmatmul.msk.f32.vlgmr.msra.gmra.mxu1 %vm486_vm13, %v849_v42  ;;  %2615 = vmatmul.msk.f32.vlgmr.msra.gmra.mxu3 %vm486_vm13, %v849_v42 }
 0x63d   :  { %1237 = vmatpush.msra.mxu3 %v3409_v47  ;;  %1157 = vmatpush.msra.mxu1 %v3330_v23 }
 0x63f   :  { %1238 = vmatpush.msra.mxu3 %v3419_v49  ;;  %1158 = vmatpush.msra.mxu1 %v3354_v28 }
 0x641   :  { %1239 = vmatpush.msra.mxu3 %v3431_v55  ;;  %1159 = vmatpush.msra.mxu1 %v3359_v29 }
 0x643   :  { %1240 = vmatpush.msra.mxu3 %v3445_v57  ;;  %1160 = vmatpush.msra.mxu1 %v3365_v30 }
 0x644   :  { %1009 = vmatmul.f32.vlgmr.msrb.gmra.mxu1 %v2926_v50 }
 0x645   :  { %1257 = vmatpush.msrb.mxu1 %v3414_v48 }
 0x647   :  { %1258 = vmatpush.msrb.mxu1 %v3426_v53 }
 0x649   :  { %1259 = vmatpush.msrb.mxu1 %v3436_v56 }
 0x64b   :  { %1260 = vmatpush.msrb.mxu1 %v3450_v59 }
 0x65b   :  { %v912_v50 = vpop.permute.xlu0 %911 }
 0x65c   :  { %2614 = vmatmul.msk.f32.vlgmr.msra.gmra.mxu0 %vm486_vm13, %v912_v50 }
 0x65d   :  { %1177 = vmatpush.msra.mxu0 %v3319_v21 }
 0x65f   :  { %1178 = vmatpush.msra.mxu0 %v3324_v22 }
 0x661   :  { %1179 = vmatpush.msra.mxu0 %v3335_v24 }
 0x663   :  { %1180 = vmatpush.msra.mxu0 %v3342_v25 }
 0x664   :  { %2617 = vmatmul.msk.f32.vlgmr.msrb.gmra.mxu0 %vm486_vm13, %v912_v50 }
 0x665   :  { %1326 = vmatpush.msrb.mxu0 %v3261_v43 }
 0x667   :  { %1327 = vmatpush.msrb.mxu0 %v3266_v44 }
 0x669   :  { %1328 = vmatpush.msrb.mxu0 %v3273_v45 }
 0x66b   :  { %1329 = vmatpush.msrb.mxu0 %v3280_v46 }
 0x6b9   :  { %v869_v63 = vpop.f32.mrf.mxu1 }
 0x6ba   :  { %v872_v0 = vadd.f32 %v869_v63, %v846_v62 }
 0x6bc   :  { %2735 = vtanh.f32 %v872_v0  ;;  %v2613_v13 = vmul.f32 -1.442695, %v872_v0 }
 0x6bf   :  { %v952_v2 = vpop.f32.mrf.mxu3 }
 0x6c1   :  { %v1010_v6 = vpop.f32.mrf.mxu1 }
 0x6c2   :  { %v2736_v1 = vpop.eup %2735 }
 0x6c3   :  { %895 = vrot.lane.b32.xlu1 %v2736_v1, %s2927_s10 }
 0x6d9   :  { %v932_v3 = vpop.f32.mrf.mxu0 }
 0x6da   :  { %v953_v4 = vadd.f32 %v952_v2, %v932_v3 }
 0x6dc   :  { %v955_v5 = vadd.f32 %v3386_v38, %v953_v4 }
 0x6de   :  { %2737 = vtanh.f32 %v955_v5  ;;  %v2616_v15 = vmul.f32 -1.442695, %v955_v5 }
 0x6e1   :  { %v1030_v8 = vpop.f32.mrf.mxu0 }
 0x6e2   :  { %v1031_v9 = vadd.f32 %v1030_v8, %v1010_v6 }
 0x6e4   :  { %v2738_v10 = vpop.eup %2737  ;;  %v1033_v11 = vadd.f32 %v3491_v7, %v1031_v9 }
 0x6e5   :  { %978 = vrot.lane.b32.xlu2 %v2738_v10, %s2927_s10 }
 0x6e6   :  { %2739 = vtanh.f32 %v1033_v11  ;;  %v2618_v41 = vmul.f32 -1.442695, %v1033_v11 }
 0x6e7   :  { %2741 = vpow2.f32 %v2613_v13 }
 0x6e8   :  { %2743 = vpow2.f32 %v2616_v15 }
 0x6ec   :  { %v2740_v12 = vpop.eup %2739 }
 0x6ed   :  { %1056 = vrot.lane.b32.xlu0 %v2740_v12, %s2927_s10  ;;  %v2742_v14 = vpop.eup %2741 }
 0x6ee   :  { %v876_v16 = vadd.f32 1.0, %v2742_v14  ;;  %v2744_v17 = vpop.eup %2743 }
 0x6ef   :  { %v959_v20 = vadd.f32 1.0, %v2744_v17 }
 0x6f0   :  { %2745 = vrcp.f32 %v876_v16  ;;  %v888_v39 = vand.u32 2147483648, %v876_v16  ;;  %vm882_vm11 = vweird.f32 %v876_v16  ;;  %v886_v40 = vand.u32 2147483647, %v876_v16 }
 0x6f1   :  { %2747 = vrcp.f32 %v959_v20  ;;  %v971_v2 = vand.u32 2147483648, %v959_v20  ;;  %vm965_vm0 = vweird.f32 %v959_v20  ;;  %v969_v3 = vand.u32 2147483647, %v959_v20 }
 0x6f2   :  { %v889_v50 = vor.u32 1.1754944e-38, %v888_v39  ;;  %vm887_vm14 = vcmp.eq.f32.partialorder %v886_v40, 8.507059e+37  ;;  %2749 = vpow2.f32 %v2618_v41 }
 0x6f3   :  { %v972_v6 = vor.u32 1.1754944e-38, %v971_v2  ;;  %vm970_vm2 = vcmp.eq.f32.partialorder %v969_v3, 8.507059e+37 }
 0x6f6   :  { %v2746_v18 = vpop.eup %2745 }
 0x6f7   :  { %v878_v26 = vmul.f32 %v2746_v18, %v876_v16  ;;  %v2748_v32 = vpop.eup %2747  ;;  %vm883_vm10 = vweird.f32 %v2746_v18 }
 0x6f8   :  { %v961_v35 = vmul.f32 %v2748_v32, %v959_v20  ;;  %vm884_vm12 = vmor %vm882_vm11, %vm883_vm10  ;;  %vm966_vm15 = vweird.f32 %v2748_v32  ;;  %v2750_v4 = vpop.eup %2749 }
 0x6f9   :  { %v879_v27 = vsub.f32 1.0, %v878_v26  ;;  %vm967_vm1 = vmor %vm965_vm0, %vm966_vm15  ;;  %v1037_v8 = vadd.f32 1.0, %v2750_v4 }
 0x6fa   :  { %v962_v19 = vsub.f32 1.0, %v961_v35 }
 0x6fb   :  { %v880_v34 = vmul.f32 %v2746_v18, %v879_v27  ;;  %2751 = vrcp.f32 %v1037_v8  ;;  %v1049_v17 = vand.u32 2147483648, %v1037_v8  ;;  %vm1043_vm4 = vweird.f32 %v1037_v8 }
 0x6fc   :  { %v963_v60 = vmul.f32 %v2748_v32, %v962_v19 }
 0x6fd   :  { %v881_v37 = vadd.f32 %v2746_v18, %v880_v34  ;;  %v1050_v26 = vor.u32 1.1754944e-38, %v1049_v17 }
 0x6fe   :  { %v964_v1 = vadd.f32 %v2748_v32, %v963_v60 }
 0x6ff   :  { %v885_v42 = vsel %vm884_vm12, %v2746_v18, %v881_v37  ;;  %v1047_v18 = vand.u32 2147483647, %v1037_v8 }
 0x700   :  { %v890_v63 = vsel %vm887_vm14, %v889_v50, %v885_v42  ;;  %v968_v5 = vsel %vm967_vm1, %v2748_v32, %v964_v1 }
 0x701   :  { %v973_v10 = vsel %vm970_vm2, %v972_v6, %v968_v5  ;;  %v2752_v12 = vpop.eup %2751  ;;  %vm1048_vm6 = vcmp.eq.f32.partialorder %v1047_v18, 8.507059e+37  ;;  %v893_v19 = vmul.f32 %v890_v63, %v3394_v31 }
 0x702   :  { %v1039_v13 = vmul.f32 %v2752_v12, %v1037_v8  ;;  %vm1044_vm3 = vweird.f32 %v2752_v12  ;;  %v976_v35 = vmul.f32 %v973_v10, %v3397_v36 }
 0x703   :  { %vm1045_vm5 = vmor %vm1043_vm4, %vm1044_vm3 }
 0x704   :  { %v1040_v14 = vsub.f32 1.0, %v1039_v13 }
 0x706   :  { %v1041_v15 = vmul.f32 %v2752_v12, %v1040_v14 }
 0x708   :  { %v1042_v16 = vadd.f32 %v2752_v12, %v1041_v15 }
 0x70a   :  { %v1046_v20 = vsel %vm1045_vm5, %v2752_v12, %v1042_v16 }
 0x70b   :  { %v1051_v32 = vsel %vm1048_vm6, %v1050_v26, %v1046_v20 }
 0x70c   :  { %v1054_v60 = vmul.f32 0.0, %v1051_v32 }
 0x735   :  { %v896_v62 = vpop.permute.xlu1 %895 }
 0x736   :  { %v898_v0 = vmul.f32 %v896_v62, %v890_v63 }
 0x738   :  { %900 = vrot.lane.b32.xlu1 %v898_v0, %s2928_s15 }
 0x73f   :  { %v979_v9 = vpop.permute.xlu2 %978 }
 0x740   :  { %v981_v11 = vmul.f32 %v979_v9, %v973_v10  ;;  %v1076_v9 = vadd.f32 %v3295_v51, %v3304_v58 }
 0x742   :  { %983 = vrot.lane.b32.xlu2 %v981_v11, %s2928_s15 }
 0x75f   :  { %v1057_v27 = vpop.permute.xlu0 %1056 }
 0x760   :  { %v1059_v34 = vmul.f32 %v1057_v27, %v1051_v32 }
 0x762   :  { %1061 = vrot.lane.b32.xlu0 %v1059_v34, %s2928_s15 }
 0x79c   :  { %v984_v37 = vpop.permute.xlu2 %983 }
 0x79d   :  { %v3500_v39 = vadd.f32 %v984_v37, %v976_v35 }
 0x79f   :  { %2753 = vtanh.f32 %v3500_v39 }
 0x7a5   :  { %v2754_v40 = vpop.eup %2753 }
 0x7a6   :  { %989 = vrot.lane.b32.xlu2 %v2754_v40, %s2927_s10 }
 0x7aa   :  { %v901_v41 = vpop.permute.xlu1 %900 }
 0x7ab   :  { %v3505_v42 = vadd.f32 %v901_v41, %v893_v19 }
 0x7ad   :  { %2755 = vtanh.f32 %v3505_v42 }
 0x7b3   :  { %v2756_v50 = vpop.eup %2755 }
 0x7b4   :  { %906 = vrot.lane.b32.xlu1 %v2756_v50, %s2927_s10 }
 0x7d4   :  { %v1062_v36 = vpop.permute.xlu0 %1061 }
 0x7d5   :  { %v3509_v62 = vadd.f32 %v1062_v36, %v1054_v60 }
 0x7d7   :  { %2757 = vtanh.f32 %v3509_v62 }
 0x7dd   :  { %v2758_v0 = vpop.eup %2757 }
 0x7de   :  { %1067 = vrot.lane.b32.xlu0 %v2758_v0, %s2927_s10 }
 0x800   :  { %v990_v1 = vpop.permute.xlu2 %989 }
 0x801   :  { %v992_v2 = vmul.f32 %v990_v1, %v973_v10 }
 0x803   :  { %1141 = vrot.lane.b32.xlu2 %v992_v2, %s2928_s15 }
 0x826   :  { %v907_v31 = vpop.permute.xlu1 %906 }
 0x827   :  { %v909_v3 = vmul.f32 %v907_v31, %v890_v63 }
 0x829   :  { %1078 = vrot.lane.b32.xlu1 %v909_v3, %s2928_s15 }
 0x850   :  { %v1068_v4 = vpop.permute.xlu0 %1067 }
 0x851   :  { %v1070_v5 = vmul.f32 %v1068_v4, %v1051_v32 }
 0x853   :  { %1072 = vrot.lane.b32.xlu0 %v1070_v5, %s2928_s15 }
 0x85d   :  { %v1142_v6 = vpop.permute.xlu2 %1141 }
 0x85e   :  { %2621 = vmatmul.msk.f32.vlgmr.msra.gmra.mxu1 %vm486_vm13, %v1142_v6 }
 0x85f   :  { %1409 = vmatpush.msra.mxu1 %v3319_v21 }
 0x861   :  { %1410 = vmatpush.msra.mxu1 %v3324_v22 }
 0x863   :  { %1411 = vmatpush.msra.mxu1 %v3335_v24 }
 0x865   :  { %1412 = vmatpush.msra.mxu1 %v3342_v25 }
 0x866   :  { %2625 = vmatmul.msk.f32.vlgmr.msrb.gmra.mxu1 %vm486_vm13, %v1142_v6 }
 0x867   :  { %1558 = vmatpush.msrb.mxu1 %v3261_v43 }
 0x869   :  { %1559 = vmatpush.msrb.mxu1 %v3266_v44 }
 0x86b   :  { %1560 = vmatpush.msrb.mxu1 %v3273_v45 }
 0x86d   :  { %1561 = vmatpush.msrb.mxu1 %v3280_v46 }
 0x89b   :  { %v1079_v63 = vpop.permute.xlu1 %1078 }
 0x89c   :  { %2619 = vmatmul.msk.f32.vlgmr.msrb.gmra.mxu3 %vm486_vm13, %v1079_v63  ;;  %2622 = vmatmul.msk.f32.vlgmr.msra.gmra.mxu0 %vm486_vm13, %v1079_v63 }
 0x89d   :  { %1389 = vmatpush.msrb.mxu3 %v3330_v23  ;;  %1469 = vmatpush.msra.mxu0 %v3409_v47 }
 0x89f   :  { %1390 = vmatpush.msrb.mxu3 %v3354_v28  ;;  %1470 = vmatpush.msra.mxu0 %v3419_v49 }
 0x8a1   :  { %1391 = vmatpush.msrb.mxu3 %v3359_v29  ;;  %1471 = vmatpush.msra.mxu0 %v3431_v55 }
 0x8a3   :  { %1392 = vmatpush.msrb.mxu3 %v3365_v30  ;;  %1472 = vmatpush.msra.mxu0 %v3445_v57 }
 0x8c5   :  { %v1073_v43 = vpop.permute.xlu0 %1072 }
 0x8c6   :  { %1075 = vst.msk [vmem:[#allocation2] sm:$0xff] %vm486_vm13, %v1073_v43  ;;  %2624 = vmatmul.msk.f32.vlgmr.msra.gmra.mxu3 %vm486_vm13, %v1073_v43 }
 0x8c7   :  { %1489 = vmatpush.msra.mxu3 %v3414_v48 }
 0x8c9   :  { %1490 = vmatpush.msra.mxu3 %v3426_v53 }
 0x8cb   :  { %1491 = vmatpush.msra.mxu3 %v3436_v56 }
 0x8cd   :  { %1492 = vmatpush.msra.mxu3 %v3450_v59 }
 0x8db   :  { %v1162_v44 = vpop.f32.mrf.mxu1 }
 0x8e3   :  { %v1262_v14 = vpop.f32.mrf.mxu1 }
 0x919   :  { %v1182_v45 = vpop.f32.mrf.mxu0 }
 0x91a   :  { %v1183_v46 = vadd.f32 %v1182_v45, %v1162_v44 }
 0x91c   :  { %v1185_v8 = vadd.f32 %v3386_v38, %v1183_v46 }
 0x91e   :  { %2759 = vtanh.f32 %v1185_v8  ;;  %v2623_v27 = vmul.f32 -1.442695, %v1185_v8 }
 0x91f   :  { %v1099_v10 = vpop.f32.mrf.mxu3 }
 0x920   :  { %v1102_v11 = vadd.f32 %v1099_v10, %v1076_v9 }
 0x922   :  { %2761 = vtanh.f32 %v1102_v11  ;;  %v2620_v20 = vmul.f32 -1.442695, %v1102_v11 }
 0x924   :  { %v2760_v12 = vpop.eup %2759 }
 0x925   :  { %1208 = vrot.lane.b32.xlu1 %v2760_v12, %s2927_s10 }
 0x928   :  { %v2762_v13 = vpop.eup %2761 }
 0x929   :  { %1125 = vrot.lane.b32.xlu2 %v2762_v13, %s2927_s10 }
 0x949   :  { %v1242_v15 = vpop.f32.mrf.mxu3 }
 0x94a   :  { %v1263_v16 = vadd.f32 %v1262_v14, %v1242_v15 }
 0x94c   :  { %v1265_v17 = vadd.f32 %v3491_v7, %v1263_v16 }
 0x94e   :  { %2763 = vtanh.f32 %v1265_v17  ;;  %v2626_v11 = vmul.f32 -1.442695, %v1265_v17 }
 0x94f   :  { %2765 = vpow2.f32 %v2620_v20 }
 0x954   :  { %v2764_v18 = vpop.eup %2763 }
 0x955   :  { %1288 = vrot.lane.b32.xlu0 %v2764_v18, %s2927_s10  ;;  %v2766_v51 = vpop.eup %2765 }
 0x956   :  { %v1106_v26 = vadd.f32 1.0, %v2766_v51 }
 0x958   :  { %2767 = vrcp.f32 %v1106_v26  ;;  %v1118_v50 = vand.u32 2147483648, %v1106_v26  ;;  %vm1112_vm8 = vweird.f32 %v1106_v26  ;;  %v1116_v60 = vand.u32 2147483647, %v1106_v26 }
 0x959   :  { %2769 = vpow2.f32 %v2623_v27 }
 0x95a   :  { %v1119_v1 = vor.u32 1.1754944e-38, %v1118_v50  ;;  %vm1117_vm10 = vcmp.eq.f32.partialorder %v1116_v60, 8.507059e+37 }
 0x95e   :  { %v2768_v32 = vpop.eup %2767 }
 0x95f   :  { %v1108_v34 = vmul.f32 %v2768_v32, %v1106_v26  ;;  %v2770_v35 = vpop.eup %2769  ;;  %vm1113_vm7 = vweird.f32 %v2768_v32 }
 0x960   :  { %v1189_v40 = vadd.f32 1.0, %v2770_v35  ;;  %vm1114_vm9 = vmor %vm1112_vm8, %vm1113_vm7 }
 0x961   :  { %v1109_v37 = vsub.f32 1.0, %v1108_v34 }
 0x962   :  { %2771 = vrcp.f32 %v1189_v40  ;;  %v1201_v43 = vand.u32 2147483648, %v1189_v40  ;;  %vm1195_vm12 = vweird.f32 %v1189_v40  ;;  %v1199_v44 = vand.u32 2147483647, %v1189_v40 }
 0x963   :  { %v1110_v19 = vmul.f32 %v2768_v32, %v1109_v37  ;;  %2773 = vpow2.f32 %v2626_v11 }
 0x964   :  { %v1202_v46 = vor.u32 1.1754944e-38, %v1201_v43  ;;  %vm1200_vm15 = vcmp.eq.f32.partialorder %v1199_v44, 8.507059e+37  ;;  %v1308_v44 = vadd.f32 %v3297_v52, %v3304_v58 }
 0x965   :  { %v1111_v41 = vadd.f32 %v2768_v32, %v1110_v19 }
 0x967   :  { %v1115_v36 = vsel %vm1114_vm9, %v2768_v32, %v1111_v41 }
 0x968   :  { %v2772_v0 = vpop.eup %2771  ;;  %v1120_v2 = vsel %vm1117_vm10, %v1119_v1, %v1115_v36 }
 0x969   :  { %v1191_v4 = vmul.f32 %v2772_v0, %v1189_v40  ;;  %vm1196_vm11 = vweird.f32 %v2772_v0  ;;  %v2774_v12 = vpop.eup %2773  ;;  %v1123_v37 = vmul.f32 %v1120_v2, %v3505_v42 }
 0x96a   :  { %vm1197_vm14 = vmor %vm1195_vm12, %vm1196_vm11  ;;  %v1269_v13 = vadd.f32 1.0, %v2774_v12 }
 0x96b   :  { %v1192_v5 = vsub.f32 1.0, %v1191_v4 }
 0x96c   :  { %2775 = vrcp.f32 %v1269_v13  ;;  %v1281_v51 = vand.u32 2147483648, %v1269_v13  ;;  %vm1275_vm1 = vweird.f32 %v1269_v13  ;;  %v1279_v26 = vand.u32 2147483647, %v1269_v13 }
 0x96d   :  { %v1193_v6 = vmul.f32 %v2772_v0, %v1192_v5 }
 0x96e   :  { %v1282_v32 = vor.u32 1.1754944e-38, %v1281_v51  ;;  %vm1280_vm3 = vcmp.eq.f32.partialorder %v1279_v26, 8.507059e+37 }
 0x96f   :  { %v1194_v63 = vadd.f32 %v2772_v0, %v1193_v6 }
 0x971   :  { %v1198_v45 = vsel %vm1197_vm14, %v2772_v0, %v1194_v63 }
 0x972   :  { %v1203_v9 = vsel %vm1200_vm15, %v1202_v46, %v1198_v45  ;;  %v2776_v14 = vpop.eup %2775 }
 0x973   :  { %v1271_v15 = vmul.f32 %v2776_v14, %v1269_v13  ;;  %vm1276_vm0 = vweird.f32 %v2776_v14  ;;  %v1206_v50 = vmul.f32 %v1203_v9, %v3500_v39 }
 0x974   :  { %vm1277_vm2 = vmor %vm1275_vm1, %vm1276_vm0 }
 0x975   :  { %v1272_v16 = vsub.f32 1.0, %v1271_v15 }
 0x977   :  { %v1273_v18 = vmul.f32 %v2776_v14, %v1272_v16 }
 0x979   :  { %v1274_v20 = vadd.f32 %v2776_v14, %v1273_v18 }
 0x97b   :  { %v1278_v27 = vsel %vm1277_vm2, %v2776_v14, %v1274_v20 }
 0x97c   :  { %v1283_v34 = vsel %vm1280_vm3, %v1282_v32, %v1278_v27 }
 0x97d   :  { %v1286_v42 = vmul.f32 %v1283_v34, %v3509_v62 }
 0x983   :  { %v1126_v31 = vpop.permute.xlu2 %1125 }
 0x984   :  { %v1128_v3 = vmul.f32 %v1126_v31, %v1120_v2 }
 0x986   :  { %1130 = vrot.lane.b32.xlu2 %v1128_v3, %s2928_s15 }
 0x997   :  { %v1209_v8 = vpop.permute.xlu1 %1208 }
 0x998   :  { %v1211_v10 = vmul.f32 %v1209_v8, %v1203_v9 }
 0x99a   :  { %1213 = vrot.lane.b32.xlu1 %v1211_v10, %s2928_s15 }
 0x9c7   :  { %v1289_v17 = vpop.permute.xlu0 %1288 }
 0x9c8   :  { %v1291_v35 = vmul.f32 %v1289_v17, %v1283_v34 }
 0x9ca   :  { %1293 = vrot.lane.b32.xlu0 %v1291_v35, %s2928_s15 }
 0x9e0   :  { %v1131_v40 = vpop.permute.xlu2 %1130 }
 0x9e1   :  { %v3553_v19 = vadd.f32 %v1131_v40, %v1123_v37 }
 0x9e3   :  { %2777 = vtanh.f32 %v3553_v19 }
 0x9e9   :  { %v2778_v41 = vpop.eup %2777 }
 0x9ea   :  { %1136 = vrot.lane.b32.xlu2 %v2778_v41, %s2927_s10 }
 0xa0c   :  { %v1214_v60 = vpop.permute.xlu1 %1213 }
 0xa0d   :  { %v3558_v36 = vadd.f32 %v1214_v60, %v1206_v50 }
 0xa0f   :  { %2779 = vtanh.f32 %v3558_v36 }
 0xa15   :  { %v2780_v0 = vpop.eup %2779 }
 0xa16   :  { %1219 = vrot.lane.b32.xlu1 %v2780_v0, %s2927_s10 }
 0xa3c   :  { %v1294_v1 = vpop.permute.xlu0 %1293 }
 0xa3d   :  { %v3563_v31 = vadd.f32 %v1294_v1, %v1286_v42 }
 0xa3f   :  { %2781 = vtanh.f32 %v3563_v31 }
 0xa44   :  { %v1137_v3 = vpop.permute.xlu2 %1136 }
 0xa45   :  { %v2782_v4 = vpop.eup %2781  ;;  %v1139_v5 = vmul.f32 %v1137_v3, %v1120_v2 }
 0xa46   :  { %1299 = vrot.lane.b32.xlu0 %v2782_v4, %s2927_s10 }
 0xa47   :  { %1310 = vrot.lane.b32.xlu2 %v1139_v5, %s2928_s15 }
 0xa88   :  { %v1220_v39 = vpop.permute.xlu1 %1219 }
 0xa89   :  { %v1222_v6 = vmul.f32 %v1220_v39, %v1203_v9 }
 0xa8b   :  { %1373 = vrot.lane.b32.xlu1 %v1222_v6, %s2928_s15 }
 0xaa1   :  { %v1311_v63 = vpop.permute.xlu2 %1310 }
 0xaa2   :  { %2627 = vmatmul.msk.f32.vlgmr.msrb.gmra.mxu0 %vm486_vm13, %v1311_v63  ;;  %2630 = vmatmul.msk.f32.vlgmr.msra.gmra.mxu1 %vm486_vm13, %v1311_v63 }
 0xaa3   :  { %1621 = vmatpush.msrb.mxu0 %v3330_v23  ;;  %1701 = vmatpush.msra.mxu1 %v3409_v47 }
 0xaa5   :  { %1622 = vmatpush.msrb.mxu0 %v3354_v28  ;;  %1702 = vmatpush.msra.mxu1 %v3419_v49 }
 0xaa7   :  { %1623 = vmatpush.msrb.mxu0 %v3359_v29  ;;  %1703 = vmatpush.msra.mxu1 %v3431_v55 }
 0xaa9   :  { %1624 = vmatpush.msrb.mxu0 %v3365_v30  ;;  %1704 = vmatpush.msra.mxu1 %v3445_v57 }
 0xab8   :  { %v1300_v62 = vpop.permute.xlu0 %1299 }
 0xab9   :  { %v1302_v2 = vmul.f32 %v1300_v62, %v1283_v34 }
 0xabb   :  { %1304 = vrot.lane.b32.xlu0 %v1302_v2, %s2928_s15 }
 0xafd   :  { %v1374_v43 = vpop.permute.xlu1 %1373 }
 0xafe   :  { %2629 = vmatmul.msk.f32.vlgmr.msrb.gmra.mxu3 %vm486_vm13, %v1374_v43 }
 0xaff   :  { %1641 = vmatpush.msrb.mxu3 %v3319_v21 }
 0xb01   :  { %1642 = vmatpush.msrb.mxu3 %v3324_v22 }
 0xb03   :  { %1643 = vmatpush.msrb.mxu3 %v3335_v24 }
 0xb05   :  { %1644 = vmatpush.msrb.mxu3 %v3342_v25 }
 0xb06   :  { %2633 = vmatmul.msk.f32.vlgmr.msra.gmra.mxu3 %vm486_vm13, %v1374_v43 }
 0xb07   :  { %1853 = vmatpush.msra.mxu3 %v3330_v23 }
 0xb09   :  { %1854 = vmatpush.msra.mxu3 %v3354_v28 }
 0xb0b   :  { %1855 = vmatpush.msra.mxu3 %v3359_v29 }
 0xb0d   :  { %1856 = vmatpush.msra.mxu3 %v3365_v30 }
 0xb1f   :  { %v1331_v21 = vpop.f32.mrf.mxu0  ;;  %v1414_v28 = vpop.f32.mrf.mxu1 }
 0xb20   :  { %v1334_v45 = vadd.f32 %v1331_v21, %v1308_v44 }
 0xb22   :  { %2783 = vtanh.f32 %v1334_v45  ;;  %v2628_v52 = vmul.f32 -1.442695, %v1334_v45 }
 0xb24   :  { %2785 = vpow2.f32 %v2628_v52 }
 0xb28   :  { %v2784_v22 = vpop.eup %2783 }
 0xb29   :  { %1357 = vrot.lane.b32.xlu1 %v2784_v22, %s2927_s10 }
 0xb2a   :  { %v2786_v23 = vpop.eup %2785 }
 0xb2b   :  { %v1338_v25 = vadd.f32 1.0, %v2786_v23 }
 0xb2d   :  { %v1305_v24 = vpop.permute.xlu0 %1304  ;;  %2787 = vrcp.f32 %v1338_v25  ;;  %vm1344_vm5 = vweird.f32 %v1338_v25  ;;  %v1348_v11 = vand.u32 2147483647, %v1338_v25 }
 0xb2e   :  { %1307 = vst.msk [vmem:[#allocation2 + $0x8] sm:$0xff] %vm486_vm13, %v1305_v24  ;;  %2632 = vmatmul.msk.f32.vlgmr.msra.gmra.mxu0 %vm486_vm13, %v1305_v24 }
 0xb2f   :  { %1721 = vmatpush.msra.mxu0 %v3414_v48  ;;  %vm1349_vm7 = vcmp.eq.f32.partialorder %v1348_v11, 8.507059e+37 }
 0xb31   :  { %1722 = vmatpush.msra.mxu0 %v3426_v53 }
 0xb33   :  { %1723 = vmatpush.msra.mxu0 %v3436_v56  ;;  %v2788_v8 = vpop.eup %2787 }
 0xb34   :  { %v1340_v9 = vmul.f32 %v2788_v8, %v1338_v25  ;;  %vm1345_vm4 = vweird.f32 %v2788_v8 }
 0xb35   :  { %1724 = vmatpush.msra.mxu0 %v3450_v59  ;;  %v1350_v59 = vand.u32 2147483648, %v1338_v25  ;;  %vm1346_vm6 = vmor %vm1344_vm5, %vm1345_vm4 }
 0xb36   :  { %v1341_v10 = vsub.f32 1.0, %v1340_v9 }
 0xb37   :  { %v1351_v13 = vor.u32 1.1754944e-38, %v1350_v59 }
 0xb38   :  { %v1342_v53 = vmul.f32 %v2788_v8, %v1341_v10 }
 0xb3a   :  { %v1343_v56 = vadd.f32 %v2788_v8, %v1342_v53 }
 0xb3c   :  { %v1347_v12 = vsel %vm1346_vm6, %v2788_v8, %v1343_v56 }
 0xb3d   :  { %v3601_v15 = vsel %vm1349_vm7, %v1351_v13, %v1347_v12 }
 0xb3e   :  { %v1355_v63 = vmul.f32 %v3601_v15, %v3553_v19 }
 0xb81   :  { %v1394_v29 = vpop.f32.mrf.mxu3 }
 0xb82   :  { %v1415_v30 = vadd.f32 %v1414_v28, %v1394_v29 }
 0xb84   :  { %v1417_v46 = vadd.f32 %v3386_v38, %v1415_v30 }
 0xb86   :  { %2789 = vtanh.f32 %v1417_v46  ;;  %v2631_v27 = vmul.f32 -1.442695, %v1417_v46 }
 0xb89   :  { %v1494_v16 = vpop.f32.mrf.mxu3 }
 0xb8c   :  { %v2790_v48 = vpop.eup %2789 }
 0xb8d   :  { %1440 = vrot.lane.b32.xlu2 %v2790_v48, %s2927_s10 }
 0xb9b   :  { %v1358_v14 = vpop.permute.xlu1 %1357 }
 0xb9c   :  { %v1360_v38 = vmul.f32 %v1358_v14, %v3601_v15 }
 0xb9e   :  { %1362 = vrot.lane.b32.xlu1 %v1360_v38, %s2928_s15 }
 0xbab   :  { %v1474_v18 = vpop.f32.mrf.mxu0 }
 0xbac   :  { %v1495_v20 = vadd.f32 %v1494_v16, %v1474_v18  ;;  %v3642_v16 = vld [vmem:[%s3982_s16 + $0x10] sm:$0xff] }
 0xbad   :  { %v2906_v18 = vld [vmem:[%s3981_s14 + $0x10] sm:$0xff] }
 0xbae   :  { %v1497_v51 = vadd.f32 %v3491_v7, %v1495_v20  ;;  %v3652_v20 = vld [vmem:[%s3982_s16 + $0x8] sm:$0xff] }
 0xbb0   :  { %2791 = vtanh.f32 %v1497_v51  ;;  %v2634_v5 = vmul.f32 -1.442695, %v1497_v51  ;;  %v2908_v51 = vld [vmem:[%s3981_s14 + $0x8] sm:$0xff] }
 0xbb1   :  { %2793 = vpow2.f32 %v2631_v27  ;;  %v2910_v27 = vld [vmem:[%s3981_s14] sm:$0xff] }
 0xbb6   :  { %v2792_v26 = vpop.eup %2791 }
 0xbb7   :  { %1520 = vrot.lane.b32.xlu0 %v2792_v26, %s2927_s10  ;;  %v2794_v32 = vpop.eup %2793  ;;  %v3661_v26 = vld [vmem:[%s3982_s16] sm:$0xff] }
 0xbb8   :  { %v1421_v17 = vadd.f32 1.0, %v2794_v32 }
 0xbba   :  { %2795 = vrcp.f32 %v1421_v17  ;;  %v1433_v50 = vand.u32 2147483648, %v1421_v17  ;;  %vm1427_vm9 = vweird.f32 %v1421_v17  ;;  %v1431_v60 = vand.u32 2147483647, %v1421_v17 }
 0xbbb   :  { %2797 = vpow2.f32 %v2634_v5 }
 0xbbc   :  { %v1434_v42 = vor.u32 1.1754944e-38, %v1433_v50  ;;  %vm1432_vm11 = vcmp.eq.f32.partialorder %v1431_v60, 8.507059e+37 }
 0xbc0   :  { %v2796_v34 = vpop.eup %2795 }
 0xbc1   :  { %v1423_v35 = vmul.f32 %v2796_v34, %v1421_v17  ;;  %vm1428_vm8 = vweird.f32 %v2796_v34  ;;  %v2798_v39 = vpop.eup %2797 }
 0xbc2   :  { %vm1429_vm10 = vmor %vm1427_vm9, %vm1428_vm8  ;;  %v1501_v6 = vadd.f32 1.0, %v2798_v39 }
 0xbc3   :  { %v1424_v37 = vsub.f32 1.0, %v1423_v35 }
 0xbc4   :  { %2799 = vrcp.f32 %v1501_v6  ;;  %v1513_v52 = vand.u32 2147483648, %v1501_v6  ;;  %vm1507_vm14 = vweird.f32 %v1501_v6  ;;  %v1511_v23 = vand.u32 2147483647, %v1501_v6 }
 0xbc5   :  { %v1425_v40 = vmul.f32 %v2796_v34, %v1424_v37 }
 0xbc6   :  { %v1514_v19 = vor.u32 1.1754944e-38, %v1513_v52  ;;  %vm1512_vm0 = vcmp.eq.f32.partialorder %v1511_v23, 8.507059e+37 }
 0xbc7   :  { %v1426_v41 = vadd.f32 %v2796_v34, %v1425_v40 }
 0xbc9   :  { %v1430_v0 = vsel %vm1429_vm10, %v2796_v34, %v1426_v41  ;;  %v1540_v34 = vadd.f32 %v3299_v54, %v3304_v58  ;;  %v3688_v54 = vld [vmem:[%s3983_s17 + $0x18] sm:$0xff] }
 0xbca   :  { %v1435_v3 = vsel %vm1432_vm11, %v1434_v42, %v1430_v0  ;;  %v2800_v43 = vpop.eup %2799  ;;  %v3694_v0 = vld [vmem:[%s3983_s17 + $0x10] sm:$0xff]  ;;  %v3700_v42 = vld [vmem:[%s3983_s17 + $0x8] sm:$0xff] }
 0xbcb   :  { %v1503_v44 = vmul.f32 %v2800_v43, %v1501_v6  ;;  %vm1508_vm12 = vweird.f32 %v2800_v43  ;;  %v1438_v46 = vmul.f32 %v1435_v3, %v3558_v36 }
 0xbcc   :  { %vm1509_vm15 = vmor %vm1507_vm14, %vm1508_vm12 }
 0xbcd   :  { %v1504_v45 = vsub.f32 1.0, %v1503_v44 }
 0xbcf   :  { %v1505_v22 = vmul.f32 %v2800_v43, %v1504_v45 }
 0xbd1   :  { %v1506_v24 = vadd.f32 %v2800_v43, %v1505_v22 }
 0xbd3   :  { %v1510_v25 = vsel %vm1509_vm15, %v2800_v43, %v1506_v24 }
 0xbd4   :  { %v1515_v29 = vsel %vm1512_vm0, %v1514_v19, %v1510_v25 }
 0xbd5   :  { %v1518_v56 = vmul.f32 %v1515_v29, %v3563_v31  ;;  %v3633_v31 = vld [vmem:[%s3982_s16 + $0x18] sm:$0xff] }
 0xbe7   :  { %v1441_v1 = vpop.permute.xlu2 %1440 }
 0xbe8   :  { %v1443_v4 = vmul.f32 %v1441_v1, %v1435_v3  ;;  %v3706_v1 = vld [vmem:[%s3983_s17] sm:$0xff] }
 0xbea   :  { %1445 = vrot.lane.b32.xlu2 %v1443_v4, %s2928_s15 }
 0xc10   :  { %v1363_v62 = vpop.permute.xlu1 %1362 }
 0xc11   :  { %v3610_v2 = vadd.f32 %v1363_v62, %v1355_v63 }
 0xc13   :  { %2801 = vtanh.f32 %v3610_v2 }
 0xc19   :  { %v2802_v21 = vpop.eup %2801 }
 0xc1a   :  { %1368 = vrot.lane.b32.xlu1 %v2802_v21, %s2927_s10 }
 0xc29   :  { %v1521_v28 = vpop.permute.xlu0 %1520 }
 0xc2a   :  { %v1523_v30 = vmul.f32 %v1521_v28, %v1515_v29 }
 0xc2c   :  { %1525 = vrot.lane.b32.xlu0 %v1523_v30, %s2928_s15 }
 0xc44   :  { %v1446_v8 = vpop.permute.xlu2 %1445 }
 0xc45   :  { %v3616_v9 = vadd.f32 %v1446_v8, %v1438_v46 }
 0xc47   :  { %2803 = vtanh.f32 %v3616_v9 }
 0xc4d   :  { %v2804_v48 = vpop.eup %2803 }
 0xc4e   :  { %1451 = vrot.lane.b32.xlu2 %v2804_v48, %s2927_s10 }
 0xc8c   :  { %v1369_v10 = vpop.permute.xlu1 %1368 }
 0xc8d   :  { %v1371_v53 = vmul.f32 %v1369_v10, %v3601_v15  ;;  %v2904_v15 = vld [vmem:[%s3981_s14 + $0x18] sm:$0xff] }
 0xc8f   :  { %1542 = vrot.lane.b32.xlu1 %v1371_v53, %s2928_s15 }
 0xc9e   :  { %v1526_v59 = vpop.permute.xlu0 %1525 }
 0xc9f   :  { %v3623_v11 = vadd.f32 %v1526_v59, %v1518_v56 }
 0xca1   :  { %2805 = vtanh.f32 %v3623_v11 }
 0xca7   :  { %v2806_v36 = vpop.eup %2805 }
 0xca8   :  { %v1452_v12 = vpop.permute.xlu2 %1451  ;;  %1531 = vrot.lane.b32.xlu0 %v2806_v36, %s2927_s10 }
 0xca9   :  { %v1454_v13 = vmul.f32 %v1452_v12, %v1435_v3 }
 0xcab   :  { %1605 = vrot.lane.b32.xlu2 %v1454_v13, %s2928_s15 }
 0xd01   :  { %v1543_v14 = vpop.permute.xlu1 %1542 }
 0xd02   :  { %2635 = vmatmul.msk.f32.vlgmr.msrb.gmra.mxu1 %vm486_vm13, %v1543_v14  ;;  %2638 = vmatmul.msk.f32.vlgmr.msrb.gmra.mxu3 %vm486_vm13, %v1543_v14 }
 0xd03   :  { %1873 = vmatpush.msrb.mxu1 %v3633_v31  ;;  %2022 = vmatpush.msrb.mxu3 %v2904_v15 }
 0xd05   :  { %v1606_v38 = vpop.permute.xlu2 %1605  ;;  %1874 = vmatpush.msrb.mxu1 %v3642_v16  ;;  %2023 = vmatpush.msrb.mxu3 %v2906_v18 }
 0xd06   :  { %2637 = vmatmul.msk.f32.vlgmr.msrb.gmra.mxu0 %vm486_vm13, %v1606_v38 }
 0xd07   :  { %1790 = vmatpush.msrb.mxu0 %v2904_v15  ;;  %1875 = vmatpush.msrb.mxu1 %v3652_v20 }
 0xd08   :  { %2024 = vmatpush.msrb.mxu3 %v2908_v51 }
 0xd09   :  { %1791 = vmatpush.msrb.mxu0 %v2906_v18  ;;  %1876 = vmatpush.msrb.mxu1 %v3661_v26 }
 0xd0a   :  { %2025 = vmatpush.msrb.mxu3 %v2910_v27 }
 0xd0b   :  { %1792 = vmatpush.msrb.mxu0 %v2908_v51 }
 0xd0d   :  { %1793 = vmatpush.msrb.mxu0 %v2910_v27 }
 0xd0e   :  { %2641 = vmatmul.msk.f32.vlgmr.msra.gmra.mxu0 %vm486_vm13, %v1606_v38 }
 0xd0f   :  { %1933 = vmatpush.msra.mxu0 %v3409_v47 }
 0xd11   :  { %1934 = vmatpush.msra.mxu0 %v3419_v49  ;;  %v3678_v49 = vld [vmem:[%s3984_s18] ss:$0 sm:$0xff] }
 0xd13   :  { %1935 = vmatpush.msra.mxu0 %v3431_v55 }
 0xd15   :  { %1936 = vmatpush.msra.mxu0 %v3445_v57 }
 0xd1a   :  { %v1532_v32 = vpop.permute.xlu0 %1531 }
 0xd1b   :  { %v1534_v17 = vmul.f32 %v1532_v32, %v1515_v29 }
 0xd1d   :  { %1536 = vrot.lane.b32.xlu0 %v1534_v17, %s2928_s15 }
 0xd7f   :  { %v1563_v35 = vpop.f32.mrf.mxu1 }
 0xd80   :  { %v1566_v37 = vadd.f32 %v1563_v35, %v1540_v34 }
 0xd82   :  { %2807 = vtanh.f32 %v1566_v37  ;;  %v2636_v39 = vmul.f32 -1.442695, %v1566_v37 }
 0xd83   :  { %v1626_v40 = vpop.f32.mrf.mxu0 }
 0xd85   :  { %v1646_v41 = vpop.f32.mrf.mxu3 }
 0xd86   :  { %v1647_v50 = vadd.f32 %v1646_v41, %v1626_v40 }
 0xd88   :  { %v2808_v47 = vpop.eup %2807  ;;  %v1649_v55 = vadd.f32 %v3678_v49, %v1647_v50 }
 0xd89   :  { %1589 = vrot.lane.b32.xlu1 %v2808_v47, %s2927_s10 }
 0xd8a   :  { %2809 = vtanh.f32 %v1649_v55  ;;  %v2639_v3 = vmul.f32 -1.442695, %v1649_v55 }
 0xd8b   :  { %v1726_v14 = vpop.f32.mrf.mxu0 }
 0xd8c   :  { %2811 = vpow2.f32 %v2639_v3 }
 0xd8f   :  { %v1537_v57 = vpop.permute.xlu0 %1536 }
 0xd90   :  { %v2810_v60 = vpop.eup %2809  ;;  %1539 = vst.msk [vmem:[#allocation2 + $0x10] sm:$0xff] %vm486_vm13, %v1537_v57  ;;  %2640 = vmatmul.msk.f32.vlgmr.msra.gmra.mxu1 %vm486_vm13, %v1537_v57 }
 0xd91   :  { %1672 = vrot.lane.b32.xlu2 %v2810_v60, %s2927_s10  ;;  %2085 = vmatpush.msra.mxu1 %v3688_v54 }
 0xd92   :  { %v2812_v4 = vpop.eup %2811 }
 0xd93   :  { %2086 = vmatpush.msra.mxu1 %v3694_v0  ;;  %v1653_v5 = vadd.f32 1.0, %v2812_v4 }
 0xd95   :  { %2087 = vmatpush.msra.mxu1 %v3700_v42  ;;  %2813 = vrcp.f32 %v1653_v5  ;;  %v1665_v24 = vand.u32 2147483648, %v1653_v5  ;;  %vm1659_vm2 = vweird.f32 %v1653_v5  ;;  %v1663_v52 = vand.u32 2147483647, %v1653_v5 }
 0xd96   :  { %2815 = vpow2.f32 %v2636_v39 }
 0xd97   :  { %2088 = vmatpush.msra.mxu1 %v3706_v1  ;;  %v1666_v19 = vor.u32 1.1754944e-38, %v1665_v24  ;;  %vm1664_vm4 = vcmp.eq.f32.partialorder %v1663_v52, 8.507059e+37 }
 0xd9b   :  { %v2814_v6 = vpop.eup %2813 }
 0xd9c   :  { %v2816_v63 = vpop.eup %2815  ;;  %v1655_v62 = vmul.f32 %v2814_v6, %v1653_v5  ;;  %vm1660_vm1 = vweird.f32 %v2814_v6 }
 0xd9d   :  { %v1570_v43 = vadd.f32 1.0, %v2816_v63  ;;  %vm1661_vm3 = vmor %vm1659_vm2, %vm1660_vm1 }
 0xd9e   :  { %v1656_v44 = vsub.f32 1.0, %v1655_v62 }
 0xd9f   :  { %2817 = vrcp.f32 %v1570_v43  ;;  %v1582_v10 = vand.u32 2147483648, %v1570_v43  ;;  %vm1576_vm6 = vweird.f32 %v1570_v43  ;;  %v1580_v53 = vand.u32 2147483647, %v1570_v43 }
 0xda0   :  { %v1657_v21 = vmul.f32 %v2814_v6, %v1656_v44 }
 0xda1   :  { %v1583_v59 = vor.u32 1.1754944e-38, %v1582_v10  ;;  %vm1581_vm8 = vcmp.eq.f32.partialorder %v1580_v53, 8.507059e+37 }
 0xda2   :  { %v1658_v45 = vadd.f32 %v2814_v6, %v1657_v21 }
 0xda4   :  { %v1662_v23 = vsel %vm1661_vm3, %v2814_v6, %v1658_v45 }
 0xda5   :  { %v2818_v22 = vpop.eup %2817  ;;  %v1667_v29 = vsel %vm1664_vm4, %v1666_v19, %v1662_v23  ;;  %v3736_v19 = vld [vmem:[%s3986_s19 + $0x18] sm:$0xff] }
 0xda6   :  { %v1572_v25 = vmul.f32 %v2818_v22, %v1570_v43  ;;  %vm1577_vm5 = vweird.f32 %v2818_v22  ;;  %v1670_v27 = vmul.f32 %v1667_v29, %v3616_v9 }
 0xda7   :  { %vm1578_vm7 = vmor %vm1576_vm6, %vm1577_vm5 }
 0xda8   :  { %v1573_v46 = vsub.f32 1.0, %v1572_v25 }
 0xdaa   :  { %v1574_v8 = vmul.f32 %v2818_v22, %v1573_v46  ;;  %v3766_v46 = vld [vmem:[%s3985_s20 + $0x8] sm:$0xff] }
 0xdac   :  { %v1575_v48 = vadd.f32 %v2818_v22, %v1574_v8  ;;  %v3772_v8 = vld [vmem:[%s3986_s19] sm:$0xff] }
 0xdae   :  { %v1579_v56 = vsel %vm1578_vm7, %v2818_v22, %v1575_v48  ;;  %v3778_v48 = vld [vmem:[%s3985_s20] sm:$0xff] }
 0xdaf   :  { %v1584_v12 = vsel %vm1581_vm8, %v1583_v59, %v1579_v56 }
 0xdeb   :  { %v1673_v28 = vpop.permute.xlu2 %1672 }
 0xdec   :  { %v1675_v30 = vmul.f32 %v1673_v28, %v1667_v29  ;;  %v3748_v28 = vld [vmem:[%s3986_s19 + $0x10] sm:$0xff] }
 0xdee   :  { %1677 = vrot.lane.b32.xlu2 %v1675_v30, %s2928_s15  ;;  %v3760_v30 = vld [vmem:[%s3986_s19 + $0x8] sm:$0xff] }
 0xdfb   :  { %v1590_v36 = vpop.permute.xlu1 %1589 }
 0xdfc   :  { %v1592_v13 = vmul.f32 %v1590_v36, %v1584_v12 }
 0xdfe   :  { %1594 = vrot.lane.b32.xlu1 %v1592_v13, %s2928_s15 }
 0xe0d   :  { %v1706_v15 = vpop.f32.mrf.mxu1 }
 0xe0e   :  { %v1727_v38 = vadd.f32 %v1726_v14, %v1706_v15 }
 0xe10   :  { %v1729_v18 = vadd.f32 %v3491_v7, %v1727_v38  ;;  %v1587_v7 = vmul.f32 %v1584_v12, %v3610_v2 }
 0xe12   :  { %2819 = vtanh.f32 %v1729_v18  ;;  %v2642_v35 = vmul.f32 -1.442695, %v1729_v18 }
 0xe18   :  { %v2820_v51 = vpop.eup %2819 }
 0xe19   :  { %1752 = vrot.lane.b32.xlu0 %v2820_v51, %s2927_s10 }
 0xe48   :  { %v1678_v32 = vpop.permute.xlu2 %1677 }
 0xe49   :  { %v3714_v17 = vadd.f32 %v1678_v32, %v1670_v27 }
 0xe4b   :  { %2821 = vtanh.f32 %v3714_v17 }
 0xe4c   :  { %2823 = vpow2.f32 %v2642_v35 }
 0xe51   :  { %v2822_v34 = vpop.eup %2821 }
 0xe52   :  { %1683 = vrot.lane.b32.xlu2 %v2822_v34, %s2927_s10  ;;  %v2824_v37 = vpop.eup %2823 }
 0xe53   :  { %v1733_v40 = vadd.f32 1.0, %v2824_v37 }
 0xe55   :  { %2825 = vrcp.f32 %v1733_v40  ;;  %v1745_v4 = vand.u32 2147483648, %v1733_v40  ;;  %vm1739_vm10 = vweird.f32 %v1733_v40  ;;  %v1743_v5 = vand.u32 2147483647, %v1733_v40 }
 0xe57   :  { %v1746_v2 = vor.u32 1.1754944e-38, %v1745_v4  ;;  %vm1744_vm12 = vcmp.eq.f32.partialorder %v1743_v5, 8.507059e+37 }
 0xe5b   :  { %v2826_v9 = vpop.eup %2825 }
 0xe5c   :  { %v1735_v47 = vmul.f32 %v2826_v9, %v1733_v40  ;;  %vm1740_vm9 = vweird.f32 %v2826_v9 }
 0xe5d   :  { %vm1741_vm11 = vmor %vm1739_vm10, %vm1740_vm9 }
 0xe5e   :  { %v1736_v57 = vsub.f32 1.0, %v1735_v47 }
 0xe60   :  { %v1737_v60 = vmul.f32 %v2826_v9, %v1736_v57 }
 0xe62   :  { %v1738_v3 = vadd.f32 %v2826_v9, %v1737_v60 }
 0xe64   :  { %v1742_v39 = vsel %vm1741_vm11, %v2826_v9, %v1738_v3 }
 0xe65   :  { %v1747_v63 = vsel %vm1744_vm12, %v1746_v2, %v1742_v39 }
 0xe66   :  { %v1750_v22 = vmul.f32 %v1747_v63, %v3623_v11  ;;  %v3742_v11 = vld [vmem:[%s3985_s20 + $0x18] sm:$0xff] }
 0xe70   :  { %v1595_v41 = vpop.permute.xlu1 %1594 }
 0xe71   :  { %v3719_v50 = vadd.f32 %v1595_v41, %v1587_v7 }
 0xe73   :  { %2827 = vtanh.f32 %v3719_v50 }
 0xe79   :  { %v2828_v55 = vpop.eup %2827 }
 0xe7a   :  { %1600 = vrot.lane.b32.xlu1 %v2828_v55, %s2927_s10 }
 0xe8b   :  { %v1753_v6 = vpop.permute.xlu0 %1752 }
 0xe8c   :  { %v1755_v62 = vmul.f32 %v1753_v6, %v1747_v63 }
 0xe8e   :  { %1757 = vrot.lane.b32.xlu0 %v1755_v62, %s2928_s15 }
 0xeac   :  { %v1684_v43 = vpop.permute.xlu2 %1683 }
 0xead   :  { %v1686_v44 = vmul.f32 %v1684_v43, %v1667_v29  ;;  %v3754_v29 = vld [vmem:[%s3985_s20 + $0x10] sm:$0xff] }
 0xeaf   :  { %1837 = vrot.lane.b32.xlu2 %v1686_v44, %s2928_s15 }
 0xeec   :  { %v1601_v21 = vpop.permute.xlu1 %1600 }
 0xeed   :  { %v1603_v45 = vmul.f32 %v1601_v21, %v1584_v12 }
 0xeef   :  { %1774 = vrot.lane.b32.xlu1 %v1603_v45, %s2928_s15  ;;  %v3810_v45 = vld [vmem:[%s3987_s21] ss:$0 sm:$0xff] }
 0xf00   :  { %v1758_v24 = vpop.permute.xlu0 %1757 }
 0xf01   :  { %v3727_v52 = vadd.f32 %v1758_v24, %v1750_v22 }
 0xf03   :  { %2829 = vtanh.f32 %v3727_v52 }
 0xf09   :  { %v2830_v23 = vpop.eup %2829  ;;  %v1838_v25 = vpop.permute.xlu2 %1837 }
 0xf0a   :  { %2645 = vmatmul.msk.f32.vlgmr.msra.gmra.mxu3 %vm486_vm13, %v1838_v25  ;;  %2649 = vmatmul.msk.f32.vlgmr.msra.gmra.mxu2 %vm486_vm13, %v1838_v25 }
 0xf0b   :  { %1763 = vrot.lane.b32.xlu0 %v2830_v23, %s2927_s10  ;;  %2185 = vmatpush.msra.mxu3 %v3736_v19 }
 0xf0c   :  { %2338 = vmatpush.msra.mxu2 %v3742_v11 }
 0xf0d   :  { %2186 = vmatpush.msra.mxu3 %v3748_v28 }
 0xf0e   :  { %2339 = vmatpush.msra.mxu2 %v3754_v29 }
 0xf0f   :  { %2187 = vmatpush.msra.mxu3 %v3760_v30 }
 0xf10   :  { %2340 = vmatpush.msra.mxu2 %v3766_v46 }
 0xf11   :  { %2188 = vmatpush.msra.mxu3 %v3772_v8 }
 0xf12   :  { %2341 = vmatpush.msra.mxu2 %v3778_v48 }
 0xf61   :  { %v1775_v10 = vpop.permute.xlu1 %1774 }
 0xf62   :  { %2643 = vmatmul.msk.f32.vlgmr.msrb.gmra.mxu0 %vm486_vm13, %v1775_v10  ;;  %2646 = vmatmul.msk.f32.vlgmr.msrb.gmra.mxu1 %vm486_vm13, %v1775_v10 }
 0xf63   :  { %2105 = vmatpush.msrb.mxu0 %v3633_v31  ;;  %2253 = vmatpush.msrb.mxu1 %v3688_v54 }
 0xf65   :  { %2106 = vmatpush.msrb.mxu0 %v3642_v16  ;;  %2254 = vmatpush.msrb.mxu1 %v3694_v0 }
 0xf67   :  { %2107 = vmatpush.msrb.mxu0 %v3652_v20  ;;  %2255 = vmatpush.msrb.mxu1 %v3700_v42 }
 0xf69   :  { %2108 = vmatpush.msrb.mxu0 %v3661_v26  ;;  %2256 = vmatpush.msrb.mxu1 %v3706_v1 }
 0xf7d   :  { %v1764_v53 = vpop.permute.xlu0 %1763 }
 0xf7e   :  { %v1766_v56 = vmul.f32 %v1764_v53, %v1747_v63 }
 0xf80   :  { %1768 = vrot.lane.b32.xlu0 %v1766_v56, %s2928_s15 }
 0xf8d   :  { %v1858_v59 = vpop.f32.mrf.mxu3  ;;  %v1958_v43 = vpop.f32.mrf.mxu2 }
 0xfdf   :  { %v1795_v36 = vpop.f32.mrf.mxu0  ;;  %v1878_v12 = vpop.f32.mrf.mxu1 }
 0xfe0   :  { %v1798_v54 = vadd.f32 %v1795_v36, %v3307_v61  ;;  %v1879_v13 = vadd.f32 %v1878_v12, %v1858_v59 }
 0xfe2   :  { %2831 = vtanh.f32 %v1798_v54  ;;  %v1881_v0 = vadd.f32 %v3678_v49, %v1879_v13  ;;  %v2644_v18 = vmul.f32 -1.442695, %v1798_v54 }
 0xfe4   :  { %2833 = vtanh.f32 %v1881_v0  ;;  %v2647_v61 = vmul.f32 -1.442695, %v1881_v0 }
 0xfe6   :  { %2835 = vpow2.f32 %v2647_v61 }
 0xfe8   :  { %v2832_v14 = vpop.eup %2831 }
 0xfe9   :  { %1821 = vrot.lane.b32.xlu1 %v2832_v14, %s2927_s10 }
 0xfea   :  { %v2834_v42 = vpop.eup %2833 }
 0xfeb   :  { %1904 = vrot.lane.b32.xlu2 %v2834_v42, %s2927_s10 }
 0xfec   :  { %v2836_v15 = vpop.eup %2835 }
 0xfed   :  { %v1885_v38 = vadd.f32 1.0, %v2836_v15 }
 0xfef   :  { %2837 = vrcp.f32 %v1885_v38  ;;  %vm1891_vm15 = vweird.f32 %v1885_v38 }
 0xff0   :  { %2839 = vpow2.f32 %v2644_v18 }
 0xff2   :  { %v1769_v1 = vpop.permute.xlu0 %1768 }
 0xff3   :  { %1771 = vst.msk [vmem:[#allocation2 + $0x18] sm:$0xff] %vm486_vm13, %v1769_v1  ;;  %2648 = vmatmul.msk.f32.vlgmr.msra.gmra.mxu0 %vm486_vm13, %v1769_v1 }
 0xff4   :  { %2278 = vmatpush.msra.mxu0 %v3633_v31 }
 0xff5   :  { %v2838_v51 = vpop.eup %2837 }
 0xff6   :  { %2279 = vmatpush.msra.mxu0 %v3642_v16  ;;  %v1887_v27 = vmul.f32 %v2838_v51, %v1885_v38  ;;  %v2840_v34 = vpop.eup %2839  ;;  %vm1892_vm14 = vweird.f32 %v2838_v51  ;;  %v1897_v16 = vand.u32 2147483648, %v1885_v38 }
 0xff7   :  { %v1802_v35 = vadd.f32 1.0, %v2840_v34  ;;  %vm1893_vm0 = vmor %vm1891_vm15, %vm1892_vm14 }
 0xff8   :  { %2280 = vmatpush.msra.mxu0 %v3652_v20  ;;  %v1888_v32 = vsub.f32 1.0, %v1887_v27  ;;  %v1895_v20 = vand.u32 2147483647, %v1885_v38  ;;  %v1898_v40 = vor.u32 1.1754944e-38, %v1897_v16 }
 0xff9   :  { %2841 = vrcp.f32 %v1802_v35  ;;  %v1814_v4 = vand.u32 2147483648, %v1802_v35  ;;  %vm1808_vm3 = vweird.f32 %v1802_v35  ;;  %v1812_v5 = vand.u32 2147483647, %v1802_v35 }
 0xffa   :  { %2281 = vmatpush.msra.mxu0 %v3661_v26  ;;  %v1889_v37 = vmul.f32 %v2838_v51, %v1888_v32  ;;  %vm1896_vm1 = vcmp.eq.f32.partialorder %v1895_v20, 8.507059e+37 }
 0xffb   :  { %v1815_v2 = vor.u32 1.1754944e-38, %v1814_v4  ;;  %vm1813_vm5 = vcmp.eq.f32.partialorder %v1812_v5, 8.507059e+37 }
 0xffc   :  { %v1890_v31 = vadd.f32 %v2838_v51, %v1889_v37 }
 0xffe   :  { %v1894_v26 = vsel %vm1893_vm0, %v2838_v51, %v1890_v31 }
 0xfff   :  { %v2842_v7 = vpop.eup %2841  ;;  %v3802_v9 = vsel %vm1896_vm1, %v1898_v40, %v1894_v26 }
0x1000   :  { %v1804_v55 = vmul.f32 %v2842_v7, %v1802_v35  ;;  %vm1809_vm2 = vweird.f32 %v2842_v7  ;;  %v1902_v23 = vmul.f32 %v3802_v9, %v3714_v17 }
0x1001   :  { %vm1810_vm4 = vmor %vm1808_vm3, %vm1809_vm2 }
0x1002   :  { %v1805_v57 = vsub.f32 1.0, %v1804_v55 }
0x1004   :  { %v1806_v60 = vmul.f32 %v2842_v7, %v1805_v57 }
0x1006   :  { %v1807_v3 = vadd.f32 %v2842_v7, %v1806_v60 }
0x1008   :  { %v1811_v39 = vsel %vm1810_vm4, %v2842_v7, %v1807_v3 }
0x1009   :  { %v1816_v63 = vsel %vm1813_vm5, %v1815_v2, %v1811_v39 }
0x100a   :  { %v1819_v12 = vmul.f32 %v1816_v63, %v3719_v50 }
0x1045   :  { %v1905_v41 = vpop.permute.xlu2 %1904 }
0x1046   :  { %v1907_v47 = vmul.f32 %v1905_v41, %v3802_v9 }
0x1048   :  { %1909 = vrot.lane.b32.xlu2 %v1907_v47, %s2928_s15 }
0x105b   :  { %v1822_v6 = vpop.permute.xlu1 %1821 }
0x105c   :  { %v1824_v62 = vmul.f32 %v1822_v6, %v1816_v63 }
0x105e   :  { %1826 = vrot.lane.b32.xlu1 %v1824_v62, %s2928_s15 }
0x1070   :  { %v1938_v44 = vpop.f32.mrf.mxu0 }
0x1071   :  { %v1959_v21 = vadd.f32 %v1958_v43, %v1938_v44 }
0x1073   :  { %v1961_v22 = vadd.f32 %v3810_v45, %v1959_v21 }
0x1075   :  { %2843 = vtanh.f32 %v1961_v22  ;;  %v2650_v56 = vmul.f32 -1.442695, %v1961_v22 }
0x107b   :  { %v2844_v24 = vpop.eup %2843 }
0x107c   :  { %1984 = vrot.lane.b32.xlu0 %v2844_v24, %s2927_s10 }
0x10a2   :  { %v1910_v25 = vpop.permute.xlu2 %1909 }
0x10a3   :  { %v3816_v10 = vadd.f32 %v1910_v25, %v1902_v23 }
0x10a5   :  { %2845 = vtanh.f32 %v3816_v10 }
0x10a6   :  { %2847 = vpow2.f32 %v2650_v56 }
0x10ab   :  { %v2846_v53 = vpop.eup %2845 }
0x10ac   :  { %1915 = vrot.lane.b32.xlu2 %v2846_v53, %s2927_s10  ;;  %v2848_v59 = vpop.eup %2847 }
0x10ad   :  { %v1965_v36 = vadd.f32 1.0, %v2848_v59 }
0x10af   :  { %2849 = vrcp.f32 %v1965_v36  ;;  %v1977_v15 = vand.u32 2147483648, %v1965_v36  ;;  %vm1971_vm7 = vweird.f32 %v1965_v36  ;;  %v1975_v38 = vand.u32 2147483647, %v1965_v36 }
0x10b1   :  { %v1978_v18 = vor.u32 1.1754944e-38, %v1977_v15  ;;  %vm1976_vm9 = vcmp.eq.f32.partialorder %v1975_v38, 8.507059e+37 }
0x10b5   :  { %v2850_v17 = vpop.eup %2849 }
0x10b6   :  { %v1967_v14 = vmul.f32 %v2850_v17, %v1965_v36  ;;  %vm1972_vm6 = vweird.f32 %v2850_v17 }
0x10b7   :  { %vm1973_vm8 = vmor %vm1971_vm7, %vm1972_vm6 }
0x10b8   :  { %v1968_v42 = vsub.f32 1.0, %v1967_v14 }
0x10ba   :  { %v1969_v1 = vmul.f32 %v2850_v17, %v1968_v42 }
0x10bc   :  { %v1970_v61 = vadd.f32 %v2850_v17, %v1969_v1 }
0x10be   :  { %v1974_v50 = vsel %vm1973_vm8, %v2850_v17, %v1970_v61 }
0x10bf   :  { %v1979_v27 = vsel %vm1976_vm9, %v1978_v18, %v1974_v50 }
0x10c0   :  { %v1982_v37 = vmul.f32 %v1979_v27, %v3727_v52 }
0x10d0   :  { %v1827_v54 = vpop.permute.xlu1 %1826 }
0x10d1   :  { %v3821_v13 = vadd.f32 %v1827_v54, %v1819_v12 }
0x10d3   :  { %2851 = vtanh.f32 %v3821_v13 }
0x10d9   :  { %v2852_v0 = vpop.eup %2851 }
0x10da   :  { %1832 = vrot.lane.b32.xlu1 %v2852_v0, %s2927_s10 }
0x10ee   :  { %v1985_v51 = vpop.permute.xlu0 %1984 }
0x10ef   :  { %v1987_v32 = vmul.f32 %v1985_v51, %v1979_v27 }
0x10f1   :  { %1989 = vrot.lane.b32.xlu0 %v1987_v32, %s2928_s15 }
0x1106   :  { %v1916_v26 = vpop.permute.xlu2 %1915 }
0x1107   :  { %v1918_v40 = vmul.f32 %v1916_v26, %v3802_v9 }
0x114c   :  { %v1833_v34 = vpop.permute.xlu1 %1832 }
0x114d   :  { %v1835_v35 = vmul.f32 %v1833_v34, %v1816_v63 }
0x114f   :  { %2006 = vrot.lane.b32.xlu1 %v1835_v35, %s2928_s15 }
0x1163   :  { %v1990_v31 = vpop.permute.xlu0 %1989 }
0x1164   :  { %v3828_v16 = vadd.f32 %v1990_v31, %v1982_v37 }
0x1166   :  { %2853 = vtanh.f32 %v3828_v16 }
0x116c   :  { %v2854_v20 = vpop.eup %2853 }
0x116d   :  { %1995 = vrot.lane.b32.xlu0 %v2854_v20, %s2927_s10 }
0x1175   :  { %2069 = vrot.lane.b32.xlu0 %v1918_v40, %s2928_s15 }
0x11c1   :  { %v2007_v7 = vpop.permute.xlu1 %2006 }
0x11c2   :  { %2651 = vmatmul.msk.f32.vlgmr.msrb.gmra.mxu3 %vm486_vm13, %v2007_v7  ;;  %2654 = vmatmul.msk.f32.vlgmr.msrb.gmra.mxu0 %vm486_vm13, %v2007_v7 }
0x11c3   :  { %2358 = vmatpush.msrb.mxu3 %v3736_v19  ;;  %2448 = vmatpush.msrb.mxu0 %v3736_v19 }
0x11c5   :  { %2359 = vmatpush.msrb.mxu3 %v3748_v28  ;;  %2449 = vmatpush.msrb.mxu0 %v3748_v28  ;;  %v2004_v28 = vadd.f32 %v3380_v33, %v3304_v58 }
0x11c7   :  { %2360 = vmatpush.msrb.mxu3 %v3760_v30  ;;  %2450 = vmatpush.msrb.mxu0 %v3760_v30 }
0x11c9   :  { %2361 = vmatpush.msrb.mxu3 %v3772_v8  ;;  %2451 = vmatpush.msrb.mxu0 %v3772_v8 }
0x11df   :  { %v1996_v52 = vpop.permute.xlu0 %1995 }
0x11e0   :  { %v1998_v41 = vmul.f32 %v1996_v52, %v1979_v27 }
0x11e2   :  { %2000 = vrot.lane.b32.xlu2 %v1998_v41, %s2928_s15 }
0x11e7   :  { %v2070_v9 = vpop.permute.xlu0 %2069 }
0x11e8   :  { %2653 = vmatmul.msk.f32.vlgmr.msra.gmra.mxu1 %vm486_vm13, %v2070_v9  ;;  %2657 = vmatmul.msk.f32.vlgmr.msra.gmra.mxu3 %vm486_vm13, %v2070_v9 }
0x11e9   :  { %2423 = vmatpush.msra.mxu1 %v3742_v11 }
0x11eb   :  { %2424 = vmatpush.msra.mxu1 %v3754_v29 }
0x11ed   :  { %2425 = vmatpush.msra.mxu1 %v3766_v46 }
0x11ef   :  { %2426 = vmatpush.msra.mxu1 %v3778_v48 }
0x123c   :  { %v2001_v19 = vpop.permute.xlu2 %2000 }
0x123d   :  { %2003 = vst.msk [vmem:[#allocation2 + $0x20] sm:$0xff] %vm486_vm13, %v2001_v19  ;;  %2656 = vmatmul.msk.f32.vlgmr.msrb.gmra.mxu2 %vm486_vm13, %v2001_v19 }
0x123f   :  { %v2110_v11 = vpop.f32.mrf.mxu0 }
0x1245   :  { %v2027_v30 = vpop.f32.mrf.mxu3 }
0x1246   :  { %v2030_v8 = vadd.f32 %v2027_v30, %v2004_v28 }
0x1248   :  { %2855 = vtanh.f32 %v2030_v8  ;;  %v2652_v57 = vmul.f32 -1.442695, %v2030_v8 }
0x124e   :  { %v2856_v47 = vpop.eup %2855 }
0x124f   :  { %2053 = vrot.lane.b32.xlu0 %v2856_v47, %s2927_s10 }
0x1265   :  { %v2090_v29 = vpop.f32.mrf.mxu1 }
0x1266   :  { %v2111_v55 = vadd.f32 %v2110_v11, %v2090_v29 }
0x1268   :  { %v2113_v46 = vadd.f32 %v3678_v49, %v2111_v55 }
0x126a   :  { %2857 = vtanh.f32 %v2113_v46  ;;  %v2655_v5 = vmul.f32 -1.442695, %v2113_v46 }
0x126b   :  { %2859 = vpow2.f32 %v2652_v57  ;;  %v2190_v21 = vpop.f32.mrf.mxu3 }
0x1270   :  { %v2858_v48 = vpop.eup %2857 }
0x1271   :  { %2136 = vrot.lane.b32.xlu1 %v2858_v48, %s2927_s10  ;;  %v2860_v60 = vpop.eup %2859 }
0x1272   :  { %v2034_v3 = vadd.f32 1.0, %v2860_v60 }
0x1274   :  { %2861 = vrcp.f32 %v2034_v3  ;;  %v2046_v6 = vand.u32 2147483648, %v2034_v3  ;;  %vm2040_vm11 = vweird.f32 %v2034_v3  ;;  %v2044_v63 = vand.u32 2147483647, %v2034_v3 }
0x1275   :  { %2863 = vpow2.f32 %v2655_v5 }
0x1276   :  { %v2047_v43 = vor.u32 1.1754944e-38, %v2046_v6  ;;  %vm2045_vm14 = vcmp.eq.f32.partialorder %v2044_v63, 8.507059e+37  ;;  %v2509_v6 = vld [vmem:[%s3988_s22 + $0x10] sm:$0xff]  ;;  %v2508_v63 = vld [vmem:[%s3988_s22 + $0x8] sm:$0xff] }
0x127a   :  { %v2862_v58 = vpop.eup %2861 }
0x127b   :  { %v2036_v33 = vmul.f32 %v2862_v58, %v2034_v3  ;;  %vm2041_vm10 = vweird.f32 %v2862_v58  ;;  %v2864_v44 = vpop.eup %2863 }
0x127c   :  { %vm2042_vm12 = vmor %vm2040_vm11, %vm2041_vm10  ;;  %v2117_v56 = vadd.f32 1.0, %v2864_v44  ;;  %v2499_v44 = vld [vmem:[#allocation2] sm:$0xff] }
0x127d   :  { %v2037_v4 = vsub.f32 1.0, %v2036_v33 }
0x127e   :  { %v2129_v42 = vand.u32 2147483648, %v2117_v56  ;;  %vm2123_vm0 = vweird.f32 %v2117_v56  ;;  %v2127_v1 = vand.u32 2147483647, %v2117_v56 }
0x127f   :  { %v2038_v39 = vmul.f32 %v2862_v58, %v2037_v4 }
0x1280   :  { %v2130_v15 = vor.u32 1.1754944e-38, %v2129_v42  ;;  %vm2128_vm2 = vcmp.eq.f32.partialorder %v2127_v1, 8.507059e+37  ;;  %v3912_v42 = vld [vmem:[%s3989_s23] ss:$0 sm:$0xff] }
0x1281   :  { %v2039_v2 = vadd.f32 %v2862_v58, %v2038_v39 }
0x1283   :  { %v2043_v62 = vsel %vm2042_vm12, %v2862_v58, %v2039_v2  ;;  %v2510_v2 = vld [vmem:[%s3988_s22 + $0x18] sm:$0xff] }
0x1284   :  { %v3858_v25 = vsel %vm2045_vm14, %v2047_v43, %v2043_v62  ;;  %2551 = vmatpush.msrb.mxu2 %v2510_v2  ;;  %v2507_v62 = vld [vmem:[%s3988_s22] sm:$0xff] }
0x1285   :  { %v2051_v28 = vmul.f32 %v3858_v25, %v3821_v13 }
0x1286   :  { %2552 = vmatpush.msrb.mxu2 %v2509_v6 }
0x1288   :  { %2553 = vmatpush.msrb.mxu2 %v2508_v63 }
0x128a   :  { %2554 = vmatpush.msrb.mxu2 %v2507_v62 }
0x12c0   :  { %v2170_v22 = vpop.f32.mrf.mxu2 }
0x12c1   :  { %v2191_v24 = vadd.f32 %v2190_v21, %v2170_v22  ;;  %v2054_v23 = vpop.permute.xlu0 %2053  ;;  %v2500_v21 = vld [vmem:[#allocation2 + $0x8] sm:$0xff]  ;;  %v2501_v22 = vld [vmem:[#allocation2 + $0x10] sm:$0xff] }
0x12c2   :  { %v2056_v53 = vmul.f32 %v2054_v23, %v3858_v25  ;;  %v2503_v23 = vld [vmem:[#allocation2 + $0x20] sm:$0xff] }
0x12c3   :  { %v2193_v59 = vadd.f32 %v3810_v45, %v2191_v24  ;;  %v2502_v24 = vld [vmem:[#allocation2 + $0x18] sm:$0xff] }
0x12c4   :  { %2058 = vrot.lane.b32.xlu0 %v2056_v53, %s2928_s15 }
0x12c5   :  { %2865 = vtanh.f32 %v2193_v59  ;;  %v2658_v51 = vmul.f32 -1.442695, %v2193_v59 }
0x12c6   :  { %2867 = vrcp.f32 %v2117_v56 }
0x12c7   :  { %2869 = vpow2.f32 %v2658_v51 }
0x12cb   :  { %v2866_v36 = vpop.eup %2865 }
0x12cc   :  { %2216 = vrot.lane.b32.xlu2 %v2866_v36, %s2927_s10  ;;  %v2868_v12 = vpop.eup %2867 }
0x12cd   :  { %v2119_v54 = vmul.f32 %v2868_v12, %v2117_v56  ;;  %vm2124_vm15 = vweird.f32 %v2868_v12  ;;  %v2870_v27 = vpop.eup %2869 }
0x12ce   :  { %vm2125_vm1 = vmor %vm2123_vm0, %vm2124_vm15  ;;  %v2197_v32 = vadd.f32 1.0, %v2870_v27 }
0x12cf   :  { %v2120_v17 = vsub.f32 1.0, %v2119_v54 }
0x12d0   :  { %2871 = vrcp.f32 %v2197_v32  ;;  %v2209_v26 = vand.u32 2147483648, %v2197_v32  ;;  %vm2203_vm4 = vweird.f32 %v2197_v32  ;;  %v2207_v40 = vand.u32 2147483647, %v2197_v32 }
0x12d1   :  { %v2121_v0 = vmul.f32 %v2868_v12, %v2120_v17 }
0x12d2   :  { %v2210_v52 = vor.u32 1.1754944e-38, %v2209_v26  ;;  %vm2208_vm6 = vcmp.eq.f32.partialorder %v2207_v40, 8.507059e+37 }
0x12d3   :  { %v2122_v14 = vadd.f32 %v2868_v12, %v2121_v0 }
0x12d5   :  { %v2126_v61 = vsel %vm2125_vm1, %v2868_v12, %v2122_v14 }
0x12d6   :  { %v2131_v50 = vsel %vm2128_vm2, %v2130_v15, %v2126_v61  ;;  %v2872_v34 = vpop.eup %2871 }
0x12d7   :  { %v2199_v35 = vmul.f32 %v2872_v34, %v2197_v32  ;;  %vm2204_vm3 = vweird.f32 %v2872_v34  ;;  %v2134_v11 = vmul.f32 %v2131_v50, %v3816_v10 }
0x12d8   :  { %vm2205_vm5 = vmor %vm2203_vm4, %vm2204_vm3 }
0x12d9   :  { %v2200_v37 = vsub.f32 1.0, %v2199_v35 }
0x12db   :  { %v2201_v31 = vmul.f32 %v2872_v34, %v2200_v37 }
0x12dd   :  { %v2202_v20 = vadd.f32 %v2872_v34, %v2201_v31 }
0x12df   :  { %v2206_v7 = vsel %vm2205_vm5, %v2872_v34, %v2202_v20 }
0x12e0   :  { %v2211_v9 = vsel %vm2208_vm6, %v2210_v52, %v2206_v7 }
0x12e1   :  { %v2214_v48 = vmul.f32 %v2211_v9, %v3828_v16 }
0x12e3   :  { %v2137_v38 = vpop.permute.xlu1 %2136 }
0x12e4   :  { %v2139_v18 = vmul.f32 %v2137_v38, %v2131_v50 }
0x12e6   :  { %2141 = vrot.lane.b32.xlu1 %v2139_v18, %s2928_s15 }
0x1326   :  { %v2217_v41 = vpop.permute.xlu2 %2216 }
0x1327   :  { %v2219_v19 = vmul.f32 %v2217_v41, %v2211_v9 }
0x1329   :  { %2221 = vrot.lane.b32.xlu2 %v2219_v19, %s2928_s15 }
0x1336   :  { %v2059_v30 = vpop.permute.xlu0 %2058 }
0x1337   :  { %v2061_v8 = vadd.f32 %v2059_v30, %v2051_v28 }
0x1339   :  { %2873 = vtanh.f32 %v2061_v8 }
0x133f   :  { %v2874_v47 = vpop.eup %2873 }
0x1340   :  { %2064 = vrot.lane.b32.xlu0 %v2874_v47, %s2927_s10 }
0x1358   :  { %v2142_v29 = vpop.permute.xlu1 %2141 }
0x1359   :  { %v3870_v55 = vadd.f32 %v2142_v29, %v2134_v11 }
0x135b   :  { %2875 = vtanh.f32 %v3870_v55 }
0x1361   :  { %v2876_v46 = vpop.eup %2875 }
0x1362   :  { %2147 = vrot.lane.b32.xlu1 %v2876_v46, %s2927_s10 }
0x1383   :  { %v2222_v57 = vpop.permute.xlu2 %2221 }
0x1384   :  { %v3875_v13 = vadd.f32 %v2222_v57, %v2214_v48 }
0x1386   :  { %2877 = vtanh.f32 %v3875_v13 }
0x138c   :  { %v2878_v60 = vpop.eup %2877 }
0x138d   :  { %2227 = vrot.lane.b32.xlu2 %v2878_v60, %s2927_s10 }
0x13b2   :  { %v2065_v3 = vpop.permute.xlu0 %2064 }
0x13b3   :  { %v2067_v10 = vmul.f32 %v2065_v3, %v3858_v25 }
0x13b5   :  { %2262 = vrot.lane.b32.xlu0 %v2067_v10, %s2928_s15 }
0x13d4   :  { %v2148_v58 = vpop.permute.xlu1 %2147 }
0x13d5   :  { %v2150_v33 = vmul.f32 %v2148_v58, %v2131_v50 }
0x13d7   :  { %2237 = vrot.lane.b32.xlu2 %v2150_v33, %s2928_s15 }
0x13e7   :  { %v2228_v4 = vpop.permute.xlu2 %2227 }
0x13e8   :  { %v2230_v5 = vmul.f32 %v2228_v4, %v2211_v9 }
0x13ea   :  { %2232 = vrot.lane.b32.xlu1 %v2230_v5, %s2928_s15 }
0x1427   :  { %v2263_v16 = vpop.permute.xlu0 %2262 }
0x1428   :  { %2660 = vmatmul.msk.f32.vlgmr.msra.gmra.mxu0 %vm486_vm13, %v2263_v16 }
0x1431   :  { %v2238_v39 = vpop.permute.xlu2 %2237 }
0x1432   :  { %2659 = vmatmul.msk.f32.vlgmr.msrb.gmra.mxu1 %vm486_vm13, %v2238_v39  ;;  %2663 = vmatmul.msk.f32.vlgmr.msrb.gmra.mxu3 %vm486_vm13, %v2238_v39 }
0x145c   :  { %v2233_v43 = vpop.permute.xlu1 %2232 }
0x145d   :  { %2235 = vst.msk [vmem:[#allocation2 + $0x28] sm:$0xff] %vm486_vm13, %v2233_v43  ;;  %2662 = vmatmul.msk.f32.vlgmr.msra.gmra.mxu2 %vm486_vm13, %v2233_v43 }
0x1464   :  { %v2504_v25 = vld [vmem:[#allocation2 + $0x28] sm:$0xff] }
0x1465   :  { %2668 = vmatmul.msk.f32.vlgmr.msrb.gmra.mxu2 %vm486_vm13, %v2499_v44 }
0x146d   :  { %2669 = vmatmul.msk.f32.gmra.mxu2 %vm486_vm13, %v2500_v21 }
0x1475   :  { %2670 = vmatmul.msk.f32.gmra.mxu2 %vm486_vm13, %v2501_v22 }
0x147d   :  { %2671 = vmatmul.msk.f32.gmra.mxu2 %vm486_vm13, %v2502_v24 }
0x1485   :  { %2672 = vmatmul.msk.f32.gmra.mxu2 %vm486_vm13, %v2503_v23 }
0x148d   :  { %2673 = vmatmul.msk.f32.gmra.mxu2 %vm486_vm13, %v2504_v25 }
0x14a5   :  { %v2283_v53 = vpop.f32.mrf.mxu0 }
0x14af   :  { %v2258_v56 = vpop.f32.mrf.mxu1 }
0x14b0   :  { %v2284_v59 = vadd.f32 %v2283_v53, %v2258_v56 }
0x14b2   :  { %v2286_v36 = vadd.f32 %v3678_v49, %v2284_v59 }
0x14b4   :  { %2879 = vtanh.f32 %v2286_v36  ;;  %v2661_v51 = vmul.f32 -1.442695, %v2286_v36 }
0x14b5   :  { %v2363_v54 = vpop.f32.mrf.mxu3 }
0x14ba   :  { %v2880_v12 = vpop.eup %2879 }
0x14bb   :  { %2309 = vrot.lane.b32.xlu1 %v2880_v12, %s2927_s10 }
0x14e0   :  { %v2343_v17 = vpop.f32.mrf.mxu2 }
0x14e1   :  { %v2364_v0 = vadd.f32 %v2363_v54, %v2343_v17 }
0x14e3   :  { %v2366_v14 = vadd.f32 %v3810_v45, %v2364_v0 }
0x14e5   :  { %2881 = vtanh.f32 %v2366_v14  ;;  %v2664_v7 = vmul.f32 -1.442695, %v2366_v14 }
0x14e6   :  { %2883 = vpow2.f32 %v2661_v51 }
0x14e8   :  { %v2556_v1 = vpop.f32.mrf.mxu2 }
0x14e9   :  { %v2557_v61 = vadd.f32 %v3912_v42, %v2556_v1 }
0x14eb   :  { %v2882_v15 = vpop.eup %2881  ;;  %2580 = vst [vmem:[%s3990_s24] sm:$0xff] %v2557_v61 }
0x14ec   :  { %2389 = vrot.lane.b32.xlu2 %v2882_v15, %s2927_s10  ;;  %v2884_v37 = vpop.eup %2883 }
0x14ed   :  { %v2290_v31 = vadd.f32 1.0, %v2884_v37 }
0x14ef   :  { %2885 = vrcp.f32 %v2290_v31  ;;  %v2302_v8 = vand.u32 2147483648, %v2290_v31  ;;  %vm2296_vm8 = vweird.f32 %v2290_v31  ;;  %v2300_v47 = vand.u32 2147483647, %v2290_v31 }
0x14f0   :  { %v2559_v49 = vpop.f32.mrf.mxu2  ;;  %2887 = vpow2.f32 %v2664_v7 }
0x14f1   :  { %v2560_v38 = vadd.f32 %v3912_v42, %v2559_v49  ;;  %v2303_v29 = vor.u32 1.1754944e-38, %v2302_v8  ;;  %vm2301_vm10 = vcmp.eq.f32.partialorder %v2300_v47, 8.507059e+37 }
0x14f3   :  { %2581 = vst [vmem:[%s3990_s24 + $0x8] sm:$0xff] %v2560_v38 }
0x14f5   :  { %v2886_v40 = vpop.eup %2885 }
0x14f6   :  { %v2292_v52 = vmul.f32 %v2886_v40, %v2290_v31  ;;  %v2888_v19 = vpop.eup %2887  ;;  %vm2297_vm7 = vweird.f32 %v2886_v40 }
0x14f7   :  { %v2370_v28 = vadd.f32 1.0, %v2888_v19  ;;  %vm2298_vm9 = vmor %vm2296_vm8, %vm2297_vm7 }
0x14f8   :  { %v2562_v50 = vpop.f32.mrf.mxu2  ;;  %v2293_v41 = vsub.f32 1.0, %v2292_v52 }
0x14f9   :  { %v2563_v18 = vadd.f32 %v3912_v42, %v2562_v50  ;;  %2889 = vrcp.f32 %v2370_v28  ;;  %v2382_v4 = vand.u32 2147483648, %v2370_v28  ;;  %vm2376_vm12 = vweird.f32 %v2370_v28 }
0x14fa   :  { %v2294_v9 = vmul.f32 %v2886_v40, %v2293_v41  ;;  %v2380_v5 = vand.u32 2147483647, %v2370_v28 }
0x14fb   :  { %2582 = vst [vmem:[%s3990_s24 + $0x10] sm:$0xff] %v2563_v18  ;;  %v2383_v39 = vor.u32 1.1754944e-38, %v2382_v4 }
0x14fc   :  { %v2295_v30 = vadd.f32 %v2886_v40, %v2294_v9  ;;  %vm2381_vm15 = vcmp.eq.f32.partialorder %v2380_v5, 8.507059e+37 }
0x14fe   :  { %v2299_v11 = vsel %vm2298_vm9, %v2886_v40, %v2295_v30 }
0x14ff   :  { %v2304_v48 = vsel %vm2301_vm10, %v2303_v29, %v2299_v11  ;;  %v2890_v60 = vpop.eup %2889 }
0x1500   :  { %v2565_v27 = vpop.f32.mrf.mxu2  ;;  %v2372_v3 = vmul.f32 %v2890_v60, %v2370_v28  ;;  %vm2377_vm11 = vweird.f32 %v2890_v60  ;;  %v2307_v62 = vmul.f32 %v2304_v48, %v3870_v55 }
0x1501   :  { %v2566_v32 = vadd.f32 %v3912_v42, %v2565_v27  ;;  %vm2378_vm14 = vmor %vm2376_vm12, %vm2377_vm11 }
0x1502   :  { %v2373_v10 = vsub.f32 1.0, %v2372_v3 }
0x1503   :  { %2583 = vst [vmem:[%s3990_s24 + $0x18] sm:$0xff] %v2566_v32 }
0x1504   :  { %v2374_v58 = vmul.f32 %v2890_v60, %v2373_v10 }
0x1506   :  { %v2375_v33 = vadd.f32 %v2890_v60, %v2374_v58 }
0x1508   :  { %v2568_v34 = vpop.f32.mrf.mxu2  ;;  %v2379_v16 = vsel %vm2378_vm14, %v2890_v60, %v2375_v33 }
0x1509   :  { %v2569_v35 = vadd.f32 %v3912_v42, %v2568_v34  ;;  %v2384_v6 = vsel %vm2381_vm15, %v2383_v39, %v2379_v16 }
0x150a   :  { %v2387_v22 = vmul.f32 %v2384_v6, %v3875_v13 }
0x150b   :  { %2584 = vst [vmem:[%s3990_s24 + $0x20] sm:$0xff] %v2569_v35 }
0x1510   :  { %v2571_v20 = vpop.f32.mrf.mxu2 }
0x1511   :  { %v2572_v26 = vadd.f32 %v3912_v42, %v2571_v20 }
0x1513   :  { %2585 = vst [vmem:[%s3990_s24 + $0x28] sm:$0xff] %v2572_v26 }
0x152d   :  { %v2310_v46 = vpop.permute.xlu1 %2309 }
0x152e   :  { %v2312_v57 = vmul.f32 %v2310_v46, %v2304_v48 }
0x1530   :  { %2314 = vrot.lane.b32.xlu0 %v2312_v57, %s2928_s15 }
0x1546   :  { %v2390_v2 = vpop.permute.xlu2 %2389 }
0x1547   :  { %v2392_v63 = vmul.f32 %v2390_v2, %v2384_v6 }
0x1549   :  { %2394 = vrot.lane.b32.xlu1 %v2392_v63, %s2928_s15 }
0x15a2   :  { %v2315_v43 = vpop.permute.xlu0 %2314 }
0x15a3   :  { %v2317_v44 = vadd.f32 %v2315_v43, %v2307_v62 }
0x15a5   :  { %2891 = vtanh.f32 %v2317_v44 }
0x15ab   :  { %v2892_v21 = vpop.eup %2891 }
0x15ac   :  { %2320 = vrot.lane.b32.xlu2 %v2892_v21, %s2927_s10 }
0x15bb   :  { %v2395_v24 = vpop.permute.xlu1 %2394 }
0x15bc   :  { %v2397_v23 = vadd.f32 %v2395_v24, %v2387_v22 }
0x15be   :  { %2893 = vtanh.f32 %v2397_v23 }
0x15c4   :  { %v2894_v25 = vpop.eup %2893 }
0x15c5   :  { %2400 = vrot.lane.b32.xlu0 %v2894_v25, %s2927_s10 }
0x1606   :  { %v2321_v53 = vpop.permute.xlu2 %2320 }
0x1607   :  { %v2323_v56 = vmul.f32 %v2321_v53, %v2304_v48 }
0x1609   :  { %2432 = vrot.lane.b32.xlu2 %v2323_v56, %s2928_s15 }
0x1637   :  { %v2401_v59 = vpop.permute.xlu0 %2400 }
0x1638   :  { %v2403_v55 = vmul.f32 %v2401_v59, %v2384_v6 }
0x163a   :  { %2405 = vrot.lane.b32.xlu1 %v2403_v55, %s2928_s15 }
0x1663   :  { %v2433_v36 = vpop.permute.xlu2 %2432 }
0x1664   :  { %2666 = vmatmul.msk.f32.vlgmr.msrb.gmra.mxu0 %vm486_vm13, %v2433_v36 }
0x16ac   :  { %v2406_v12 = vpop.permute.xlu1 %2405 }
0x16ad   :  { %2408 = vst.msk [vmem:[#allocation2 + $0x30] sm:$0xff] %vm486_vm13, %v2406_v12  ;;  %2665 = vmatmul.msk.f32.vlgmr.msra.gmra.mxu1 %vm486_vm13, %v2406_v12 }
0x16b4   :  { %v2505_v13 = vld [vmem:[#allocation2 + $0x30] sm:$0xff] }
0x16b5   :  { %2674 = vmatmul.msk.f32.gmra.mxu2 %vm486_vm13, %v2505_v13 }
0x16e1   :  { %v2453_v54 = vpop.f32.mrf.mxu0 }
0x172a   :  { %v2428_v17 = vpop.f32.mrf.mxu1 }
0x172b   :  { %v2454_v0 = vadd.f32 %v2453_v54, %v2428_v17 }
0x172d   :  { %v2456_v14 = vadd.f32 %v3810_v45, %v2454_v0 }
0x172f   :  { %2895 = vtanh.f32 %v2456_v14  ;;  %v2667_v49 = vmul.f32 -1.442695, %v2456_v14 }
0x1731   :  { %2897 = vpow2.f32 %v2667_v49 }
0x1735   :  { %v2896_v1 = vpop.eup %2895 }
0x1736   :  { %2479 = vrot.lane.b32.xlu0 %v2896_v1, %s2927_s10 }
0x1737   :  { %v2898_v38 = vpop.eup %2897 }
0x1738   :  { %v2574_v61 = vpop.f32.mrf.mxu2  ;;  %v2460_v50 = vadd.f32 1.0, %v2898_v38 }
0x1739   :  { %v2575_v15 = vadd.f32 %v3912_v42, %v2574_v61 }
0x173a   :  { %2899 = vrcp.f32 %v2460_v50  ;;  %v2472_v34 = vand.u32 2147483648, %v2460_v50  ;;  %vm2466_vm1 = vweird.f32 %v2460_v50  ;;  %v2470_v35 = vand.u32 2147483647, %v2460_v50 }
0x173b   :  { %2586 = vst [vmem:[%s3990_s24 + $0x30] sm:$0xff] %v2575_v15 }
0x173c   :  { %v2473_v31 = vor.u32 1.1754944e-38, %v2472_v34  ;;  %vm2471_vm3 = vcmp.eq.f32.partialorder %v2470_v35, 8.507059e+37 }
0x1740   :  { %v2900_v18 = vpop.eup %2899 }
0x1741   :  { %v2462_v51 = vmul.f32 %v2900_v18, %v2460_v50  ;;  %vm2467_vm0 = vweird.f32 %v2900_v18 }
0x1742   :  { %vm2468_vm2 = vmor %vm2466_vm1, %vm2467_vm0 }
0x1743   :  { %v2463_v27 = vsub.f32 1.0, %v2462_v51 }
0x1745   :  { %v2464_v45 = vmul.f32 %v2900_v18, %v2463_v27 }
0x1747   :  { %v2465_v32 = vadd.f32 %v2900_v18, %v2464_v45 }
0x1749   :  { %v2469_v37 = vsel %vm2468_vm2, %v2900_v18, %v2465_v32 }
0x174a   :  { %v2474_v26 = vsel %vm2471_vm3, %v2473_v31, %v2469_v37 }
0x174b   :  { %v2477_v7 = vmul.f32 %v2474_v26, %v2397_v23 }
0x17a8   :  { %v2480_v20 = vpop.permute.xlu0 %2479 }
0x17a9   :  { %v2482_v40 = vmul.f32 %v2480_v20, %v2474_v26 }
0x17ab   :  { %2484 = vrot.lane.b32.xlu1 %v2482_v40, %s2928_s15 }
0x181d   :  { %v2485_v52 = vpop.permute.xlu1 %2484 }
0x181e   :  { %v2487_v41 = vadd.f32 %v2485_v52, %v2477_v7 }
0x1820   :  { %2901 = vtanh.f32 %v2487_v41 }
0x1826   :  { %v2902_v9 = vpop.eup %2901 }
0x1827   :  { %2490 = vrot.lane.b32.xlu2 %v2902_v9, %s2927_s10 }
0x1881   :  { %v2491_v19 = vpop.permute.xlu2 %2490 }
0x1882   :  { %v2493_v28 = vmul.f32 %v2491_v19, %v2474_v26 }
0x1884   :  { %2495 = vrot.lane.b32.xlu0 %v2493_v28, %s2928_s15 }
0x18f6   :  { %v2496_v30 = vpop.permute.xlu0 %2495 }
0x18f7   :  { %2498 = vst.msk [vmem:[#allocation2 + $0x38] sm:$0xff] %vm486_vm13, %v2496_v30 }
0x18fe   :  { %v2506_v8 = vld [vmem:[#allocation2 + $0x38] sm:$0xff] }
0x18ff   :  { %2675 = vmatmul.msk.f32.gmra.mxu2 %vm486_vm13, %v2506_v8 }
0x1982   :  { %v2577_v47 = vpop.f32.mrf.mxu2 }
0x1983   :  { %v2578_v11 = vadd.f32 %v3912_v42, %v2577_v47 }
0x1985   :  { %2587 = vst [vmem:[%s3990_s24 + $0x38] sm:$0xff] %v2578_v11 }

</bundles_post_ra>
